<compile_context>
chip_gen: v7x
topology: tpu7x:2x2x1
jax: 0.10.0
libtpu: 0.0.40
codegen_flags: <defaults>
</compile_context>

<pallas_src>
import functools
import math

import jax
import jax.numpy as jnp
from jax.experimental import pallas as pl
from jax.experimental.pallas import tpu as pltpu

LANE = 128  # lane-dense padding for classifier / loss outputs


# ----------------------------------------------------------------------------
# In-kernel helpers
# ----------------------------------------------------------------------------

def _layernorm(x, g, b, eps=1e-12):
    """Single-pass layernorm over the lane axis (sum & sum-of-squares)."""
    h = x.shape[-1]
    sx = jnp.sum(x, axis=-1, keepdims=True)
    sxx = jnp.sum(x * x, axis=-1, keepdims=True)
    mu = sx / h
    var = sxx / h - mu * mu
    return (x - mu) * jax.lax.rsqrt(var + eps) * g + b


# ----------------------------------------------------------------------------
# Pallas kernels
# ----------------------------------------------------------------------------

def encoder_kernel(x_ref, m_ref, eg_ref, eb_ref,
                   wqkv_ref, bqkv_ref, wo_ref, bo_ref,
                   ln1g_ref, ln1b_ref, w1_ref, b1_ref, w2_ref, b2_ref,
                   ln2g_ref, ln2b_ref, o_ref, h_scr,
                   *, n_heads, scale):
    """All encoder layers for one batch element: grid = (B, L), L innermost.

    The activation is carried across the layer axis in VMEM scratch `h_scr`;
    at l==0 it is initialized with the (embedding + embedding-LayerNorm)
    block.  Each grid step consumes one layer's stacked weights.
    """
    l = pl.program_id(1)

    @pl.when(l == 0)
    def _():
        h_scr[...] = _layernorm(x_ref[...].astype(jnp.float32),
                                eg_ref[...], eb_ref[...])

    x = h_scr[...]                      # (S, H) f32
    m = m_ref[...]                      # (1, S) additive key mask
    H = x.shape[-1]
    dh = H // n_heads

    # ---- fused QKV projection (bf16 operands, f32 accumulation) ----
    qkv = jnp.dot(x.astype(jnp.bfloat16), wqkv_ref[...],
                  preferred_element_type=jnp.float32) + bqkv_ref[...]   # (S, 3H)

    # ---- multi-head attention (heads unrolled, static lane slices) ----
    ctx_parts = []
    for hh in range(n_heads):
        qh = qkv[:, hh * dh:(hh + 1) * dh].astype(jnp.bfloat16)
        kh = qkv[:, H + hh * dh:H + (hh + 1) * dh].astype(jnp.bfloat16)
        vh = qkv[:, 2 * H + hh * dh:2 * H + (hh + 1) * dh].astype(jnp.bfloat16)
        # q·kᵀ with native trans_b (contract dh of both operands)
        s = jax.lax.dot_general(qh, kh, (((1,), (1,)), ((), ())),
                                preferred_element_type=jnp.float32)
        s = s * scale + m
        s = s - jnp.max(s, axis=-1, keepdims=True)
        p = jnp.exp(s)
        p = p * pl.reciprocal(jnp.sum(p, axis=-1, keepdims=True), approx=True)
        ctx_parts.append(jnp.dot(p.astype(jnp.bfloat16), vh,
                                 preferred_element_type=jnp.float32))
    ctx = jnp.concatenate(ctx_parts, axis=-1)                           # (S, H)

    # ---- output projection + residual + LN1 ----
    attn_out = jnp.dot(ctx.astype(jnp.bfloat16), wo_ref[...],
                       preferred_element_type=jnp.float32) + bo_ref[...]
    h1 = _layernorm(x + attn_out, ln1g_ref[...], ln1b_ref[...])

    # ---- FFN (gelu) + residual + LN2 ----
    f = jnp.dot(h1.astype(jnp.bfloat16), w1_ref[...],
                preferred_element_type=jnp.float32) + b1_ref[...]
    f = jax.nn.gelu(f, approximate=True)
    y = jnp.dot(f.astype(jnp.bfloat16), w2_ref[...],
                preferred_element_type=jnp.float32) + b2_ref[...]
    out = _layernorm(h1 + y, ln2g_ref[...], ln2b_ref[...])

    h_scr[...] = out                      # carry to next layer
    o_ref[...] = out.astype(o_ref.dtype)  # per-layer hidden state


def pool_cls_kernel(x_ref, pw_ref, pb_ref, cw_ref, cb_ref, o_ref):
    """Fused pooler (tanh) + classifier; class dim padded to 128 lanes."""
    pooled = jnp.tanh(
        jnp.dot(x_ref[...].astype(jnp.bfloat16), pw_ref[...],
                preferred_element_type=jnp.float32) + pb_ref[...])
    o_ref[...] = jnp.dot(pooled.astype(jnp.bfloat16), cw_ref[...],
                         preferred_element_type=jnp.float32) + cb_ref[...]


def kd_loss_kernel(t_ref, s_ref, y_ref, ce_ref, kl_ref, tot_ref,
                   *, lam0, lam1, T, batch, num_labels):
    """Student CE, KD loss on lane-padded logits, and weighted total."""
    t = t_ref[...]
    s = s_ref[...]
    y = y_ref[...]

    lane = jax.lax.broadcasted_iota(jnp.int32, t.shape, 1)
    valid = lane < num_labels
    neg = jnp.float32(-1e30)
    t = jnp.where(valid, t, neg)
    s = jnp.where(valid, s, neg)

    # student log-softmax / cross-entropy (mean over batch)
    s_shift = s - jnp.max(s, axis=-1, keepdims=True)
    s_logz = jnp.log(jnp.sum(jnp.where(valid, jnp.exp(s_shift), 0.0),
                             axis=-1, keepdims=True))
    s_logp = s_shift - s_logz
    ce = -jnp.sum(jnp.where(valid, y * s_logp, 0.0)) / batch

    # teacher log-softmax
    t_shift = t - jnp.max(t, axis=-1, keepdims=True)
    t_logz = jnp.log(jnp.sum(jnp.where(valid, jnp.exp(t_shift), 0.0),
                             axis=-1, keepdims=True))
    t_logp = t_shift - t_logz

    # loss_kd: tp = softmax(t)/T, sp = softmax(s)/T, kl = sum(tp*log(tp/sp))
    # log(tp) - log(sp) == t_logp - s_logp  (log T cancels; no exp/log roundtrip)
    tp = jnp.exp(t_logp) * (1.0 / T)
    kl = jnp.sum(jnp.where(valid, tp * (t_logp - s_logp), 0.0)) / batch

    total = lam0 * ce + lam1 * kl
    ce_ref[...] = jnp.broadcast_to(ce, ce_ref.shape)
    kl_ref[...] = jnp.broadcast_to(kl, kl_ref.shape)
    tot_ref[...] = jnp.broadcast_to(total, tot_ref.shape)


# ----------------------------------------------------------------------------
# pallas_call wrappers
# ----------------------------------------------------------------------------

def pallas_encoder(emb, mask_add, p, n_heads):
    """Run all encoder layers in one pallas_call. Returns (L, B, S, H) f32."""
    B, S, H = emb.shape
    st = p["layers"]
    L = st["wqkv"].shape[0]
    F = st["w1"].shape[-1]
    dh = H // n_heads
    kern = functools.partial(encoder_kernel,
                             n_heads=n_heads, scale=1.0 / math.sqrt(dh))

    xmap = lambda b, l: (b, 0, 0)      # constant across l -> DMA'd once per b
    cmap = lambda b, l: (0, 0)         # embedding LN params
    wmap = lambda b, l: (l, 0, 0)      # stacked per-layer weights
    omap = lambda b, l: (l, b, 0, 0)   # per-layer hidden-state output

    return pl.pallas_call(
        kern,
        out_shape=jax.ShapeDtypeStruct((L, B, S, H), jnp.float32),
        grid=(B, L),
        in_specs=[
            pl.BlockSpec((None, S, H), xmap),        # embeddings
            pl.BlockSpec((None, 1, S), xmap),        # additive key mask
            pl.BlockSpec((1, H), cmap),              # emb LN gamma
            pl.BlockSpec((1, H), cmap),              # emb LN beta
            pl.BlockSpec((None, H, 3 * H), wmap),    # wqkv
            pl.BlockSpec((None, 1, 3 * H), wmap),    # bqkv
            pl.BlockSpec((None, H, H), wmap),        # wo
            pl.BlockSpec((None, 1, H), wmap),        # bo
            pl.BlockSpec((None, 1, H), wmap),        # ln1 g
            pl.BlockSpec((None, 1, H), wmap),        # ln1 b
            pl.BlockSpec((None, H, F), wmap),        # w1
            pl.BlockSpec((None, 1, F), wmap),        # b1
            pl.BlockSpec((None, F, H), wmap),        # w2
            pl.BlockSpec((None, 1, H), wmap),        # b2
            pl.BlockSpec((None, 1, H), wmap),        # ln2 g
            pl.BlockSpec((None, 1, H), wmap),        # ln2 b
        ],
        out_specs=pl.BlockSpec((None, None, S, H), omap),
        scratch_shapes=[pltpu.VMEM((S, H), jnp.float32)],   # activation carry
        compiler_params=pltpu.CompilerParams(
            dimension_semantics=("parallel", "arbitrary")),
    )(emb, mask_add, p["emb_ln_g"], p["emb_ln_b"],
      st["wqkv"], st["bqkv"], st["wo"], st["bo"],
      st["ln1_g"], st["ln1_b"], st["w1"], st["b1"], st["w2"], st["b2"],
      st["ln2_g"], st["ln2_b"])


def pallas_pool_classifier(x_cls, pw, pb, cw_pad, cb_pad):
    B, H = x_cls.shape
    C = cw_pad.shape[1]
    return pl.pallas_call(
        pool_cls_kernel,
        out_shape=jax.ShapeDtypeStruct((B, C), jnp.float32),
        grid=(1,),
        in_specs=[pl.BlockSpec((B, H), lambda i: (0, 0)),
                  pl.BlockSpec((H, H), lambda i: (0, 0)),
                  pl.BlockSpec((1, H), lambda i: (0, 0)),
                  pl.BlockSpec((H, C), lambda i: (0, 0)),
                  pl.BlockSpec((1, C), lambda i: (0, 0))],
        out_specs=pl.BlockSpec((B, C), lambda i: (0, 0)),
    )(x_cls, pw, pb, cw_pad, cb_pad)


def pallas_kd_loss(t_logits_pad, s_logits_pad, labels_onehot_pad,
                   lambdas, T, num_labels):
    B, C = s_logits_pad.shape
    kern = functools.partial(kd_loss_kernel,
                             lam0=float(lambdas[0]), lam1=float(lambdas[1]),
                             T=float(T), batch=float(B), num_labels=num_labels)
    spec_in = pl.BlockSpec((B, C), lambda i: (0, 0))
    spec_out = pl.BlockSpec((1, C), lambda i: (0, 0))
    ce, kl, tot = pl.pallas_call(
        kern,
        out_shape=(jax.ShapeDtypeStruct((1, C), jnp.float32),
                   jax.ShapeDtypeStruct((1, C), jnp.float32),
                   jax.ShapeDtypeStruct((1, C), jnp.float32)),
        grid=(1,),
        in_specs=[spec_in, spec_in, spec_in],
        out_specs=(spec_out, spec_out, spec_out),
    )(t_logits_pad, s_logits_pad, labels_onehot_pad)
    return ce[0, 0], kl[0, 0], tot[0, 0]


# ----------------------------------------------------------------------------
# Synthetic BERT-style encoder classifier (teacher / student)
# ----------------------------------------------------------------------------

def init_encoder_params(seed, vocab, max_seq, H, n_layers, n_heads, ffn,
                        num_labels):
    key = jax.random.PRNGKey(seed)

    def nxt():
        nonlocal key
        key, sub = jax.random.split(key)
        return sub

    std = 0.02
    bf = jnp.bfloat16

    def rnd(shape):
        return jax.random.normal(nxt(), shape, jnp.float32) * std

    cls_w = rnd((H, num_labels))
    cls_w_pad = jnp.zeros((H, LANE), jnp.float32).at[:, :num_labels].set(cls_w)

    # per-layer weights stacked along a leading L axis (one DMA per grid step)
    names = ("wqkv", "bqkv", "wo", "bo", "ln1_g", "ln1_b",
             "w1", "b1", "w2", "b2", "ln2_g", "ln2_b")
    layers = {k: [] for k in names}
    for _ in range(n_layers):
        wq, wk, wv = rnd((H, H)), rnd((H, H)), rnd((H, H))
        layers["wqkv"].append(jnp.concatenate([wq, wk, wv], axis=1).astype(bf))
        layers["bqkv"].append(jnp.zeros((1, 3 * H), jnp.float32))
        layers["wo"].append(rnd((H, H)).astype(bf))
        layers["bo"].append(jnp.zeros((1, H), jnp.float32))
        layers["ln1_g"].append(jnp.ones((1, H), jnp.float32))
        layers["ln1_b"].append(jnp.zeros((1, H), jnp.float32))
        layers["w1"].append(rnd((H, ffn)).astype(bf))
        layers["b1"].append(jnp.zeros((1, ffn), jnp.float32))
        layers["w2"].append(rnd((ffn, H)).astype(bf))
        layers["b2"].append(jnp.zeros((1, H), jnp.float32))
        layers["ln2_g"].append(jnp.ones((1, H), jnp.float32))
        layers["ln2_b"].append(jnp.zeros((1, H), jnp.float32))
    layers = {k: jnp.stack(v) for k, v in layers.items()}

    return {
        "word_emb": rnd((vocab, H)),
        "pos_emb": rnd((max_seq, H)),
        "emb_ln_g": jnp.ones((1, H), jnp.float32),
        "emb_ln_b": jnp.zeros((1, H), jnp.float32),
        "layers": layers,
        "pool_w": rnd((H, H)).astype(bf),
        "pool_b": jnp.zeros((1, H), jnp.float32),
        "cls_w_pad": cls_w_pad.astype(bf),
        "cls_b_pad": jnp.zeros((1, LANE), jnp.float32),
    }


def encoder_forward(p, input_ids, attention_mask, n_heads):
    """Returns (padded logits [B, 128], list of per-layer hidden states)."""
    B, S = input_ids.shape

    # embeddings (gather is glue); embedding LayerNorm is fused into the
    # encoder kernel at layer 0.
    emb = p["word_emb"][input_ids] + p["pos_emb"][None, :S, :]

    # additive key mask, shape (B, 1, S)
    mask_add = (1.0 - attention_mask.astype(jnp.float32))[:, None, :] * (-1e9)

    hidden_all = pallas_encoder(emb, mask_add, p, n_heads)   # (L, B, S, H)
    h_last = hidden_all[-1]

    logits_pad = pallas_pool_classifier(h_last[:, 0, :], p["pool_w"],
                                        p["pool_b"], p["cls_w_pad"],
                                        p["cls_b_pad"])
    hidden_states = [hidden_all[l] for l in range(hidden_all.shape[0])]
    return logits_pad, hidden_states


# ----------------------------------------------------------------------------
# LoRAKDModel.forward equivalent
# ----------------------------------------------------------------------------

def kd_forward(student_params, teacher_params, input_ids, attention_mask, labels,
               *, num_labels, student_heads, teacher_heads,
               lambdas=(0.5, 0.5), T=1.0):
    # teacher (frozen) and student forward passes
    t_logits_pad, t_hidden = encoder_forward(teacher_params, input_ids,
                                             attention_mask, teacher_heads)
    s_logits_pad, s_hidden = encoder_forward(student_params, input_ids,
                                             attention_mask, student_heads)

    labels_onehot_pad = jax.nn.one_hot(labels, LANE, dtype=jnp.float32)
    ce, lkd, total = pallas_kd_loss(t_logits_pad, s_logits_pad,
                                    labels_onehot_pad, lambdas, T, num_labels)

    s_logits = s_logits_pad[:, :num_labels]
    outputs = {"logits": s_logits, "loss": ce}           # student outputs analog
    losses = [ce, lkd]                                   # detached clones analog
    hidden_states = {"teacher": t_hidden, "student": s_hidden}  # == HF [1:]
    return outputs, total, losses, hidden_states


# ----------------------------------------------------------------------------
# main
# ----------------------------------------------------------------------------

if __name__ == "__main__":
    B, S, VOCAB, NUM_LABELS = 2, 8, 64, 3

    key = jax.random.PRNGKey(0)
    k_ids, k_lab = jax.random.split(key)
    input_ids = jax.random.randint(k_ids, (B, S), 0, VOCAB)
    attention_mask = jnp.array([[1, 1, 1, 1, 1, 1, 1, 1],
                                [1, 1, 1, 1, 1, 1, 0, 0]], dtype=jnp.float32)
    labels = jax.random.randint(k_lab, (B,), 0, NUM_LABELS)

    # student: H=32, 2 layers, 2 heads, ffn=64 | teacher: H=64, 2 layers, 4 heads, ffn=128
    S_HEADS, T_HEADS = 2, 4
    student_params = init_encoder_params(1, VOCAB, S, 32, 2, S_HEADS, 64, NUM_LABELS)
    teacher_params = init_encoder_params(2, VOCAB, S, 64, 2, T_HEADS, 128, NUM_LABELS)

    kd_fn = jax.jit(kd_forward,
                    static_argnames=("num_labels", "student_heads",
                                     "teacher_heads", "lambdas", "T"))

    outputs, total_loss, losses, hidden_states = kd_fn(
        student_params, teacher_params, input_ids, attention_mask, labels,
        num_labels=NUM_LABELS, student_heads=S_HEADS, teacher_heads=T_HEADS,
        lambdas=(0.5, 0.5), T=1.0)

    jax.block_until_ready((outputs["logits"], total_loss, losses[0], losses[1],
                           hidden_states["student"][-1],
                           hidden_states["teacher"][-1]))
    print("KERNEL_OK")
</pallas_src>

<mosaic_0001>
module attributes {stable_mosaic.version = 11 : i64} {
  func.func @pool_cls_kernel(%arg0: i32, %arg1: memref<2x32xf32, #tpu.memory_space<vmem>>, %arg2: memref<32x32xbf16, #tpu.memory_space<vmem>>, %arg3: memref<1x32xf32, #tpu.memory_space<vmem>>, %arg4: memref<32x128xbf16, #tpu.memory_space<vmem>>, %arg5: memref<1x128xf32, #tpu.memory_space<vmem>>, %arg6: memref<2x128xf32, #tpu.memory_space<vmem>>) attributes {dimension_semantics = [#tpu.dimension_semantics<arbitrary>], iteration_bounds = array<i64: 1>, scalar_prefetch = 0 : i64, scratch_operands = 0 : i64, tpu.core_type = #tpu.core_type<tc>, window_params = [{pipeline_mode = #tpu.pipeline_mode<synchronous>, transform_indices = @transform_0, window_bounds = array<i64: 2, 32>}, {pipeline_mode = #tpu.pipeline_mode<synchronous>, transform_indices = @transform_1, window_bounds = array<i64: 32, 32>}, {pipeline_mode = #tpu.pipeline_mode<synchronous>, transform_indices = @transform_2, window_bounds = array<i64: 1, 32>}, {pipeline_mode = #tpu.pipeline_mode<synchronous>, transform_indices = @transform_3, window_bounds = array<i64: 32, 128>}, {pipeline_mode = #tpu.pipeline_mode<synchronous>, transform_indices = @transform_4, window_bounds = array<i64: 1, 128>}, {pipeline_mode = #tpu.pipeline_mode<synchronous>, transform_indices = @transform_5, window_bounds = array<i64: 2, 128>}]} {
    %c0 = arith.constant 0 : index
    %c0_0 = arith.constant 0 : index
    %0 = vector.load %arg1[%c0, %c0_0] : memref<2x32xf32, #tpu.memory_space<vmem>>, vector<2x32xf32>
    %1 = arith.truncf %0 : vector<2x32xf32> to vector<2x32xbf16>
    %c0_1 = arith.constant 0 : index
    %c0_2 = arith.constant 0 : index
    %2 = vector.load %arg2[%c0_1, %c0_2] : memref<32x32xbf16, #tpu.memory_space<vmem>>, vector<32x32xbf16>
    %cst = arith.constant dense<0.000000e+00> : vector<2x32xf32>
    %3 = tpu.matmul %1, %2, %cst {dimension_numbers = #tpu.dot_dimension_numbers<[1], [0], [0], [1], [0, 0, 1, 1], [], []>} : vector<2x32xbf16>, vector<32x32xbf16>, vector<2x32xf32> -> vector<2x32xf32>
    %c0_3 = arith.constant 0 : index
    %c0_4 = arith.constant 0 : index
    %4 = vector.load %arg3[%c0_3, %c0_4] : memref<1x32xf32, #tpu.memory_space<vmem>>, vector<1x32xf32>
    %5 = vector.broadcast %4 : vector<1x32xf32> to vector<2x32xf32>
    %6 = arith.addf %3, %5 : vector<2x32xf32>
    %7 = math.tanh %6 : vector<2x32xf32>
    %8 = arith.truncf %7 : vector<2x32xf32> to vector<2x32xbf16>
    %c0_5 = arith.constant 0 : index
    %c0_6 = arith.constant 0 : index
    %9 = vector.load %arg4[%c0_5, %c0_6] : memref<32x128xbf16, #tpu.memory_space<vmem>>, vector<32x128xbf16>
    %cst_7 = arith.constant dense<0.000000e+00> : vector<2x128xf32>
    %10 = tpu.matmul %8, %9, %cst_7 {dimension_numbers = #tpu.dot_dimension_numbers<[1], [0], [0], [1], [0, 0, 1, 1], [], []>} : vector<2x32xbf16>, vector<32x128xbf16>, vector<2x128xf32> -> vector<2x128xf32>
    %c0_8 = arith.constant 0 : index
    %c0_9 = arith.constant 0 : index
    %11 = vector.load %arg5[%c0_8, %c0_9] : memref<1x128xf32, #tpu.memory_space<vmem>>, vector<1x128xf32>
    %12 = vector.broadcast %11 : vector<1x128xf32> to vector<2x128xf32>
    %13 = arith.addf %10, %12 : vector<2x128xf32>
    %c0_10 = arith.constant 0 : index
    %c0_11 = arith.constant 0 : index
    %14 = vector.load %arg6[%c0_10, %c0_11] : memref<2x128xf32, #tpu.memory_space<vmem>>, vector<2x128xf32>
    tpu.vector_store %arg6[%c0_10, %c0_11], %13 {strides = array<i32>} : memref<2x128xf32, #tpu.memory_space<vmem>>, vector<2x128xf32>,
    return
  }
  func.func @transform_0(%arg0: i32) -> (i32, i32) {
    %c0_i32 = arith.constant 0 : i32
    %c0_i32_0 = arith.constant 0 : i32
    %c0_i32_1 = arith.constant 0 : i32
    return %c0_i32, %c0_i32_0 : i32, i32
  }
  func.func @transform_1(%arg0: i32) -> (i32, i32) {
    %c0_i32 = arith.constant 0 : i32
    %c0_i32_0 = arith.constant 0 : i32
    %c0_i32_1 = arith.constant 0 : i32
    return %c0_i32, %c0_i32_0 : i32, i32
  }
  func.func @transform_2(%arg0: i32) -> (i32, i32) {
    %c0_i32 = arith.constant 0 : i32
    %c0_i32_0 = arith.constant 0 : i32
    %c0_i32_1 = arith.constant 0 : i32
    return %c0_i32, %c0_i32_0 : i32, i32
  }
  func.func @transform_3(%arg0: i32) -> (i32, i32) {
    %c0_i32 = arith.constant 0 : i32
    %c0_i32_0 = arith.constant 0 : i32
    %c0_i32_1 = arith.constant 0 : i32
    return %c0_i32, %c0_i32_0 : i32, i32
  }
  func.func @transform_4(%arg0: i32) -> (i32, i32) {
    %c0_i32 = arith.constant 0 : i32
    %c0_i32_0 = arith.constant 0 : i32
    %c0_i32_1 = arith.constant 0 : i32
    return %c0_i32, %c0_i32_0 : i32, i32
  }
  func.func @transform_5(%arg0: i32) -> (i32, i32) {
    %c0_i32 = arith.constant 0 : i32
    %c0_i32_0 = arith.constant 0 : i32
    %c0_i32_1 = arith.constant 0 : i32
    return %c0_i32, %c0_i32_0 : i32, i32
  }
}

module attributes {stable_mosaic.version = 11 : i64} {
  func.func @encoder_kernel(%arg0: i32, %arg1: i32, %arg2: memref<1x8x32xf32, #tpu.memory_space<vmem>>, %arg3: memref<1x1x8xf32, #tpu.memory_space<vmem>>, %arg4: memref<1x32xf32, #tpu.memory_space<vmem>>, %arg5: memref<1x32xf32, #tpu.memory_space<vmem>>, %arg6: memref<1x32x96xbf16, #tpu.memory_space<vmem>>, %arg7: memref<1x1x96xf32, #tpu.memory_space<vmem>>, %arg8: memref<1x32x32xbf16, #tpu.memory_space<vmem>>, %arg9: memref<1x1x32xf32, #tpu.memory_space<vmem>>, %arg10: memref<1x1x32xf32, #tpu.memory_space<vmem>>, %arg11: memref<1x1x32xf32, #tpu.memory_space<vmem>>, %arg12: memref<1x32x64xbf16, #tpu.memory_space<vmem>>, %arg13: memref<1x1x64xf32, #tpu.memory_space<vmem>>, %arg14: memref<1x64x32xbf16, #tpu.memory_space<vmem>>, %arg15: memref<1x1x32xf32, #tpu.memory_space<vmem>>, %arg16: memref<1x1x32xf32, #tpu.memory_space<vmem>>, %arg17: memref<1x1x32xf32, #tpu.memory_space<vmem>>, %arg18: memref<1x1x8x32xf32, #tpu.memory_space<vmem>>, %arg19: memref<8x32xf32, #tpu.memory_space<vmem>>) attributes {dimension_semantics = [#tpu.dimension_semantics<parallel>, #tpu.dimension_semantics<arbitrary>], iteration_bounds = array<i64: 2, 2>, scalar_prefetch = 0 : i64, scratch_operands = 1 : i64, tpu.core_type = #tpu.core_type<tc>, window_params = [{transform_indices = @transform_0, window_bounds = array<i64: 1, 8, 32>}, {transform_indices = @transform_1, window_bounds = array<i64: 1, 1, 8>}, {pipeline_mode = #tpu.pipeline_mode<synchronous>, transform_indices = @transform_2, window_bounds = array<i64: 1, 32>}, {pipeline_mode = #tpu.pipeline_mode<synchronous>, transform_indices = @transform_3, window_bounds = array<i64: 1, 32>}, {transform_indices = @transform_4, window_bounds = array<i64: 1, 32, 96>}, {transform_indices = @transform_5, window_bounds = array<i64: 1, 1, 96>}, {transform_indices = @transform_6, window_bounds = array<i64: 1, 32, 32>}, {transform_indices = @transform_7, window_bounds = array<i64: 1, 1, 32>}, {transform_indices = @transform_8, window_bounds = array<i64: 1, 1, 32>}, {transform_indices = @transform_9, window_bounds = array<i64: 1, 1, 32>}, {transform_indices = @transform_10, window_bounds = array<i64: 1, 32, 64>}, {transform_indices = @transform_11, window_bounds = array<i64: 1, 1, 64>}, {transform_indices = @transform_12, window_bounds = array<i64: 1, 64, 32>}, {transform_indices = @transform_13, window_bounds = array<i64: 1, 1, 32>}, {transform_indices = @transform_14, window_bounds = array<i64: 1, 1, 32>}, {transform_indices = @transform_15, window_bounds = array<i64: 1, 1, 32>}, {transform_indices = @transform_16, window_bounds = array<i64: 1, 1, 8, 32>}]} {
    %c0_i32 = arith.constant 0 : i32
    %0 = arith.cmpi eq, %arg1, %c0_i32 : i32
    %1 = arith.extui %0 : i1 to i32
    %c0_i32_0 = arith.constant 0 : i32
    %2 = arith.cmpi ne, %1, %c0_i32_0 : i32
    scf.if %2 {
      %c0_74 = arith.constant 0 : index
      %c0_75 = arith.constant 0 : index
      %c0_76 = arith.constant 0 : index
      %156 = vector.load %arg2[%c0_74, %c0_75, %c0_76] : memref<1x8x32xf32, #tpu.memory_space<vmem>>, vector<1x8x32xf32>
      %157 = vector.shape_cast %156 : vector<1x8x32xf32> to vector<8x32xf32>
      %c0_77 = arith.constant 0 : index
      %c0_78 = arith.constant 0 : index
      %158 = vector.load %arg4[%c0_77, %c0_78] : memref<1x32xf32, #tpu.memory_space<vmem>>, vector<1x32xf32>
      %c0_79 = arith.constant 0 : index
      %c0_80 = arith.constant 0 : index
      %159 = vector.load %arg5[%c0_79, %c0_80] : memref<1x32xf32, #tpu.memory_space<vmem>>, vector<1x32xf32>
      %cst_81 = arith.constant dense<0.000000e+00> : vector<8xf32>
      %160 = vector.multi_reduction <add>, %157, %cst_81 [1] : vector<8x32xf32> to vector<8xf32>
      %161 = vector.shape_cast %160 : vector<8xf32> to vector<8x1xf32>
      %162 = arith.mulf %157, %157 : vector<8x32xf32>
      %cst_82 = arith.constant dense<0.000000e+00> : vector<8xf32>
      %163 = vector.multi_reduction <add>, %162, %cst_82 [1] : vector<8x32xf32> to vector<8xf32>
      %164 = vector.shape_cast %163 : vector<8xf32> to vector<8x1xf32>
      %cst_83 = arith.constant 3.200000e+01 : f32
      %165 = vector.broadcast %cst_83 : f32 to vector<8x1xf32>
      %166 = arith.divf %161, %165 : vector<8x1xf32>
      %cst_84 = arith.constant 3.200000e+01 : f32
      %167 = vector.broadcast %cst_84 : f32 to vector<8x1xf32>
      %168 = arith.divf %164, %167 : vector<8x1xf32>
      %169 = arith.mulf %166, %166 : vector<8x1xf32>
      %170 = arith.subf %168, %169 : vector<8x1xf32>
      %171 = vector.broadcast %166 : vector<8x1xf32> to vector<8x32xf32>
      %172 = arith.subf %157, %171 : vector<8x32xf32>
      %cst_85 = arith.constant 9.99999996E-13 : f32
      %173 = vector.broadcast %cst_85 : f32 to vector<8x1xf32>
      %174 = arith.addf %170, %173 : vector<8x1xf32>
      %175 = math.rsqrt %174 : vector<8x1xf32>
      %176 = vector.broadcast %175 : vector<8x1xf32> to vector<8x32xf32>
      %177 = arith.mulf %172, %176 : vector<8x32xf32>
      %178 = vector.broadcast %158 : vector<1x32xf32> to vector<8x32xf32>
      %179 = arith.mulf %177, %178 : vector<8x32xf32>
      %180 = vector.broadcast %159 : vector<1x32xf32> to vector<8x32xf32>
      %181 = arith.addf %179, %180 : vector<8x32xf32>
      %c0_86 = arith.constant 0 : index
      %c0_87 = arith.constant 0 : index
      %182 = vector.load %arg19[%c0_86, %c0_87] : memref<8x32xf32, #tpu.memory_space<vmem>>, vector<8x32xf32>
      tpu.vector_store %arg19[%c0_86, %c0_87], %181 {strides = array<i32>} : memref<8x32xf32, #tpu.memory_space<vmem>>, vector<8x32xf32>,
    } else {
    }
    %c0 = arith.constant 0 : index
    %c0_1 = arith.constant 0 : index
    %3 = vector.load %arg19[%c0, %c0_1] : memref<8x32xf32, #tpu.memory_space<vmem>>, vector<8x32xf32>
    %c0_2 = arith.constant 0 : index
    %c0_3 = arith.constant 0 : index
    %c0_4 = arith.constant 0 : index
    %4 = vector.load %arg3[%c0_2, %c0_3, %c0_4] : memref<1x1x8xf32, #tpu.memory_space<vmem>>, vector<1x1x8xf32>
    %5 = vector.shape_cast %4 : vector<1x1x8xf32> to vector<1x8xf32>
    %6 = arith.truncf %3 : vector<8x32xf32> to vector<8x32xbf16>
    %c0_5 = arith.constant 0 : index
    %c0_6 = arith.constant 0 : index
    %c0_7 = arith.constant 0 : index
    %7 = vector.load %arg6[%c0_5, %c0_6, %c0_7] : memref<1x32x96xbf16, #tpu.memory_space<vmem>>, vector<1x32x96xbf16>
    %8 = vector.shape_cast %7 : vector<1x32x96xbf16> to vector<32x96xbf16>
    %cst = arith.constant dense<0.000000e+00> : vector<8x96xf32>
    %9 = tpu.matmul %6, %8, %cst {dimension_numbers = #tpu.dot_dimension_numbers<[1], [0], [0], [1], [0, 0, 1, 1], [], []>} : vector<8x32xbf16>, vector<32x96xbf16>, vector<8x96xf32> -> vector<8x96xf32>
    %c0_8 = arith.constant 0 : index
    %c0_9 = arith.constant 0 : index
    %c0_10 = arith.constant 0 : index
    %10 = vector.load %arg7[%c0_8, %c0_9, %c0_10] : memref<1x1x96xf32, #tpu.memory_space<vmem>>, vector<1x1x96xf32>
    %11 = vector.shape_cast %10 : vector<1x1x96xf32> to vector<1x96xf32>
    %12 = vector.broadcast %11 : vector<1x96xf32> to vector<8x96xf32>
    %13 = arith.addf %9, %12 : vector<8x96xf32>
    %14 = vector.extract_strided_slice %13 {offsets = [0, 0], sizes = [8, 16], strides = [1, 1]} : vector<8x96xf32> to vector<8x16xf32>
    %15 = arith.truncf %14 : vector<8x16xf32> to vector<8x16xbf16>
    %16 = vector.extract_strided_slice %13 {offsets = [0, 32], sizes = [8, 16], strides = [1, 1]} : vector<8x96xf32> to vector<8x16xf32>
    %17 = arith.truncf %16 : vector<8x16xf32> to vector<8x16xbf16>
    %18 = vector.extract_strided_slice %13 {offsets = [0, 64], sizes = [8, 16], strides = [1, 1]} : vector<8x96xf32> to vector<8x16xf32>
    %19 = arith.truncf %18 : vector<8x16xf32> to vector<8x16xbf16>
    %cst_11 = arith.constant dense<0.000000e+00> : vector<8x8xf32>
    %20 = tpu.matmul %15, %17, %cst_11 {dimension_numbers = #tpu.dot_dimension_numbers<[1], [1], [0], [0], [0, 0, 1, 0], [], []>} : vector<8x16xbf16>, vector<8x16xbf16>, vector<8x8xf32> -> vector<8x8xf32>
    %cst_12 = arith.constant 2.500000e-01 : f32
    %21 = vector.broadcast %cst_12 : f32 to vector<8x8xf32>
    %22 = arith.mulf %20, %21 : vector<8x8xf32>
    %23 = vector.broadcast %5 : vector<1x8xf32> to vector<8x8xf32>
    %24 = arith.addf %22, %23 : vector<8x8xf32>
    %cst_13 = arith.constant dense<0xFF800000> : vector<8xf32>
    %25 = vector.multi_reduction <maximumf>, %24, %cst_13 [1] : vector<8x8xf32> to vector<8xf32>
    %26 = vector.shape_cast %25 : vector<8xf32> to vector<8x1xf32>
    %27 = vector.broadcast %26 : vector<8x1xf32> to vector<8x8xf32>
    %28 = arith.subf %24, %27 : vector<8x8xf32>
    %29 = math.exp %28 : vector<8x8xf32>
    %cst_14 = arith.constant dense<0.000000e+00> : vector<8xf32>
    %30 = vector.multi_reduction <add>, %29, %cst_14 [1] : vector<8x8xf32> to vector<8xf32>
    %31 = vector.shape_cast %30 : vector<8xf32> to vector<8x1xf32>
    %32 = tpu.reciprocal %31 {approx = true} : vector<8x1xf32> -> vector<8x1xf32>
    %33 = vector.broadcast %32 : vector<8x1xf32> to vector<8x8xf32>
    %34 = arith.mulf %29, %33 : vector<8x8xf32>
    %35 = arith.truncf %34 : vector<8x8xf32> to vector<8x8xbf16>
    %cst_15 = arith.constant dense<0.000000e+00> : vector<8x16xf32>
    %36 = tpu.matmul %35, %19, %cst_15 {dimension_numbers = #tpu.dot_dimension_numbers<[1], [0], [0], [1], [0, 0, 1, 1], [], []>} : vector<8x8xbf16>, vector<8x16xbf16>, vector<8x16xf32> -> vector<8x16xf32>
    %37 = vector.extract_strided_slice %13 {offsets = [0, 16], sizes = [8, 16], strides = [1, 1]} : vector<8x96xf32> to vector<8x16xf32>
    %38 = arith.truncf %37 : vector<8x16xf32> to vector<8x16xbf16>
    %39 = vector.extract_strided_slice %13 {offsets = [0, 48], sizes = [8, 16], strides = [1, 1]} : vector<8x96xf32> to vector<8x16xf32>
    %40 = arith.truncf %39 : vector<8x16xf32> to vector<8x16xbf16>
    %41 = vector.extract_strided_slice %13 {offsets = [0, 80], sizes = [8, 16], strides = [1, 1]} : vector<8x96xf32> to vector<8x16xf32>
    %42 = arith.truncf %41 : vector<8x16xf32> to vector<8x16xbf16>
    %cst_16 = arith.constant dense<0.000000e+00> : vector<8x8xf32>
    %43 = tpu.matmul %38, %40, %cst_16 {dimension_numbers = #tpu.dot_dimension_numbers<[1], [1], [0], [0], [0, 0, 1, 0], [], []>} : vector<8x16xbf16>, vector<8x16xbf16>, vector<8x8xf32> -> vector<8x8xf32>
    %cst_17 = arith.constant 2.500000e-01 : f32
    %44 = vector.broadcast %cst_17 : f32 to vector<8x8xf32>
    %45 = arith.mulf %43, %44 : vector<8x8xf32>
    %46 = vector.broadcast %5 : vector<1x8xf32> to vector<8x8xf32>
    %47 = arith.addf %45, %46 : vector<8x8xf32>
    %cst_18 = arith.constant dense<0xFF800000> : vector<8xf32>
    %48 = vector.multi_reduction <maximumf>, %47, %cst_18 [1] : vector<8x8xf32> to vector<8xf32>
    %49 = vector.shape_cast %48 : vector<8xf32> to vector<8x1xf32>
    %50 = vector.broadcast %49 : vector<8x1xf32> to vector<8x8xf32>
    %51 = arith.subf %47, %50 : vector<8x8xf32>
    %52 = math.exp %51 : vector<8x8xf32>
    %cst_19 = arith.constant dense<0.000000e+00> : vector<8xf32>
    %53 = vector.multi_reduction <add>, %52, %cst_19 [1] : vector<8x8xf32> to vector<8xf32>
    %54 = vector.shape_cast %53 : vector<8xf32> to vector<8x1xf32>
    %55 = tpu.reciprocal %54 {approx = true} : vector<8x1xf32> -> vector<8x1xf32>
    %56 = vector.broadcast %55 : vector<8x1xf32> to vector<8x8xf32>
    %57 = arith.mulf %52, %56 : vector<8x8xf32>
    %58 = arith.truncf %57 : vector<8x8xf32> to vector<8x8xbf16>
    %cst_20 = arith.constant dense<0.000000e+00> : vector<8x16xf32>
    %59 = tpu.matmul %58, %42, %cst_20 {dimension_numbers = #tpu.dot_dimension_numbers<[1], [0], [0], [1], [0, 0, 1, 1], [], []>} : vector<8x8xbf16>, vector<8x16xbf16>, vector<8x16xf32> -> vector<8x16xf32>
    %60 = tpu.concatenate %36, %59 in 1 : vector<8x16xf32>, vector<8x16xf32> -> vector<8x32xf32>
    %61 = arith.truncf %60 : vector<8x32xf32> to vector<8x32xbf16>
    %c0_21 = arith.constant 0 : index
    %c0_22 = arith.constant 0 : index
    %c0_23 = arith.constant 0 : index
    %62 = vector.load %arg8[%c0_21, %c0_22, %c0_23] : memref<1x32x32xbf16, #tpu.memory_space<vmem>>, vector<1x32x32xbf16>
    %63 = vector.shape_cast %62 : vector<1x32x32xbf16> to vector<32x32xbf16>
    %cst_24 = arith.constant dense<0.000000e+00> : vector<8x32xf32>
    %64 = tpu.matmul %61, %63, %cst_24 {dimension_numbers = #tpu.dot_dimension_numbers<[1], [0], [0], [1], [0, 0, 1, 1], [], []>} : vector<8x32xbf16>, vector<32x32xbf16>, vector<8x32xf32> -> vector<8x32xf32>
    %c0_25 = arith.constant 0 : index
    %c0_26 = arith.constant 0 : index
    %c0_27 = arith.constant 0 : index
    %65 = vector.load %arg9[%c0_25, %c0_26, %c0_27] : memref<1x1x32xf32, #tpu.memory_space<vmem>>, vector<1x1x32xf32>
    %66 = vector.shape_cast %65 : vector<1x1x32xf32> to vector<1x32xf32>
    %67 = vector.broadcast %66 : vector<1x32xf32> to vector<8x32xf32>
    %68 = arith.addf %64, %67 : vector<8x32xf32>
    %69 = arith.addf %3, %68 : vector<8x32xf32>
    %c0_28 = arith.constant 0 : index
    %c0_29 = arith.constant 0 : index
    %c0_30 = arith.constant 0 : index
    %70 = vector.load %arg10[%c0_28, %c0_29, %c0_30] : memref<1x1x32xf32, #tpu.memory_space<vmem>>, vector<1x1x32xf32>
    %71 = vector.shape_cast %70 : vector<1x1x32xf32> to vector<1x32xf32>
    %c0_31 = arith.constant 0 : index
    %c0_32 = arith.constant 0 : index
    %c0_33 = arith.constant 0 : index
    %72 = vector.load %arg11[%c0_31, %c0_32, %c0_33] : memref<1x1x32xf32, #tpu.memory_space<vmem>>, vector<1x1x32xf32>
    %73 = vector.shape_cast %72 : vector<1x1x32xf32> to vector<1x32xf32>
    %cst_34 = arith.constant dense<0.000000e+00> : vector<8xf32>
    %74 = vector.multi_reduction <add>, %69, %cst_34 [1] : vector<8x32xf32> to vector<8xf32>
    %75 = vector.shape_cast %74 : vector<8xf32> to vector<8x1xf32>
    %76 = arith.mulf %69, %69 : vector<8x32xf32>
    %cst_35 = arith.constant dense<0.000000e+00> : vector<8xf32>
    %77 = vector.multi_reduction <add>, %76, %cst_35 [1] : vector<8x32xf32> to vector<8xf32>
    %78 = vector.shape_cast %77 : vector<8xf32> to vector<8x1xf32>
    %cst_36 = arith.constant 3.200000e+01 : f32
    %79 = vector.broadcast %cst_36 : f32 to vector<8x1xf32>
    %80 = arith.divf %75, %79 : vector<8x1xf32>
    %cst_37 = arith.constant 3.200000e+01 : f32
    %81 = vector.broadcast %cst_37 : f32 to vector<8x1xf32>
    %82 = arith.divf %78, %81 : vector<8x1xf32>
    %83 = arith.mulf %80, %80 : vector<8x1xf32>
    %84 = arith.subf %82, %83 : vector<8x1xf32>
    %85 = vector.broadcast %80 : vector<8x1xf32> to vector<8x32xf32>
    %86 = arith.subf %69, %85 : vector<8x32xf32>
    %cst_38 = arith.constant 9.99999996E-13 : f32
    %87 = vector.broadcast %cst_38 : f32 to vector<8x1xf32>
    %88 = arith.addf %84, %87 : vector<8x1xf32>
    %89 = math.rsqrt %88 : vector<8x1xf32>
    %90 = vector.broadcast %89 : vector<8x1xf32> to vector<8x32xf32>
    %91 = arith.mulf %86, %90 : vector<8x32xf32>
    %92 = vector.broadcast %71 : vector<1x32xf32> to vector<8x32xf32>
    %93 = arith.mulf %91, %92 : vector<8x32xf32>
    %94 = vector.broadcast %73 : vector<1x32xf32> to vector<8x32xf32>
    %95 = arith.addf %93, %94 : vector<8x32xf32>
    %96 = arith.truncf %95 : vector<8x32xf32> to vector<8x32xbf16>
    %c0_39 = arith.constant 0 : index
    %c0_40 = arith.constant 0 : index
    %c0_41 = arith.constant 0 : index
    %97 = vector.load %arg12[%c0_39, %c0_40, %c0_41] : memref<1x32x64xbf16, #tpu.memory_space<vmem>>, vector<1x32x64xbf16>
    %98 = vector.shape_cast %97 : vector<1x32x64xbf16> to vector<32x64xbf16>
    %cst_42 = arith.constant dense<0.000000e+00> : vector<8x64xf32>
    %99 = tpu.matmul %96, %98, %cst_42 {dimension_numbers = #tpu.dot_dimension_numbers<[1], [0], [0], [1], [0, 0, 1, 1], [], []>} : vector<8x32xbf16>, vector<32x64xbf16>, vector<8x64xf32> -> vector<8x64xf32>
    %c0_43 = arith.constant 0 : index
    %c0_44 = arith.constant 0 : index
    %c0_45 = arith.constant 0 : index
    %100 = vector.load %arg13[%c0_43, %c0_44, %c0_45] : memref<1x1x64xf32, #tpu.memory_space<vmem>>, vector<1x1x64xf32>
    %101 = vector.shape_cast %100 : vector<1x1x64xf32> to vector<1x64xf32>
    %102 = vector.broadcast %101 : vector<1x64xf32> to vector<8x64xf32>
    %103 = arith.addf %99, %102 : vector<8x64xf32>
    %104 = arith.mulf %103, %103 : vector<8x64xf32>
    %105 = arith.mulf %103, %104 : vector<8x64xf32>
    %cst_46 = arith.constant 4.471500e-02 : f32
    %106 = vector.broadcast %cst_46 : f32 to vector<8x64xf32>
    %107 = arith.mulf %106, %105 : vector<8x64xf32>
    %108 = arith.addf %103, %107 : vector<8x64xf32>
    %cst_47 = arith.constant 0.797884583 : f32
    %109 = vector.broadcast %cst_47 : f32 to vector<8x64xf32>
    %110 = arith.mulf %109, %108 : vector<8x64xf32>
    %111 = math.tanh %110 : vector<8x64xf32>
    %cst_48 = arith.constant 1.000000e+00 : f32
    %112 = vector.broadcast %cst_48 : f32 to vector<8x64xf32>
    %113 = arith.addf %112, %111 : vector<8x64xf32>
    %cst_49 = arith.constant 5.000000e-01 : f32
    %114 = vector.broadcast %cst_49 : f32 to vector<8x64xf32>
    %115 = arith.mulf %114, %113 : vector<8x64xf32>
    %116 = arith.mulf %103, %115 : vector<8x64xf32>
    %117 = arith.truncf %116 : vector<8x64xf32> to vector<8x64xbf16>
    %c0_50 = arith.constant 0 : index
    %c0_51 = arith.constant 0 : index
    %c0_52 = arith.constant 0 : index
    %118 = vector.load %arg14[%c0_50, %c0_51, %c0_52] : memref<1x64x32xbf16, #tpu.memory_space<vmem>>, vector<1x64x32xbf16>
    %119 = vector.shape_cast %118 : vector<1x64x32xbf16> to vector<64x32xbf16>
    %cst_53 = arith.constant dense<0.000000e+00> : vector<8x32xf32>
    %120 = tpu.matmul %117, %119, %cst_53 {dimension_numbers = #tpu.dot_dimension_numbers<[1], [0], [0], [1], [0, 0, 1, 1], [], []>} : vector<8x64xbf16>, vector<64x32xbf16>, vector<8x32xf32> -> vector<8x32xf32>
    %c0_54 = arith.constant 0 : index
    %c0_55 = arith.constant 0 : index
    %c0_56 = arith.constant 0 : index
    %121 = vector.load %arg15[%c0_54, %c0_55, %c0_56] : memref<1x1x32xf32, #tpu.memory_space<vmem>>, vector<1x1x32xf32>
    %122 = vector.shape_cast %121 : vector<1x1x32xf32> to vector<1x32xf32>
    %123 = vector.broadcast %122 : vector<1x32xf32> to vector<8x32xf32>
    %124 = arith.addf %120, %123 : vector<8x32xf32>
    %125 = arith.addf %95, %124 : vector<8x32xf32>
    %c0_57 = arith.constant 0 : index
    %c0_58 = arith.constant 0 : index
    %c0_59 = arith.constant 0 : index
    %126 = vector.load %arg16[%c0_57, %c0_58, %c0_59] : memref<1x1x32xf32, #tpu.memory_space<vmem>>, vector<1x1x32xf32>
    %127 = vector.shape_cast %126 : vector<1x1x32xf32> to vector<1x32xf32>
    %c0_60 = arith.constant 0 : index
    %c0_61 = arith.constant 0 : index
    %c0_62 = arith.constant 0 : index
    %128 = vector.load %arg17[%c0_60, %c0_61, %c0_62] : memref<1x1x32xf32, #tpu.memory_space<vmem>>, vector<1x1x32xf32>
    %129 = vector.shape_cast %128 : vector<1x1x32xf32> to vector<1x32xf32>
    %cst_63 = arith.constant dense<0.000000e+00> : vector<8xf32>
    %130 = vector.multi_reduction <add>, %125, %cst_63 [1] : vector<8x32xf32> to vector<8xf32>
    %131 = vector.shape_cast %130 : vector<8xf32> to vector<8x1xf32>
    %132 = arith.mulf %125, %125 : vector<8x32xf32>
    %cst_64 = arith.constant dense<0.000000e+00> : vector<8xf32>
    %133 = vector.multi_reduction <add>, %132, %cst_64 [1] : vector<8x32xf32> to vector<8xf32>
    %134 = vector.shape_cast %133 : vector<8xf32> to vector<8x1xf32>
    %cst_65 = arith.constant 3.200000e+01 : f32
    %135 = vector.broadcast %cst_65 : f32 to vector<8x1xf32>
    %136 = arith.divf %131, %135 : vector<8x1xf32>
    %cst_66 = arith.constant 3.200000e+01 : f32
    %137 = vector.broadcast %cst_66 : f32 to vector<8x1xf32>
    %138 = arith.divf %134, %137 : vector<8x1xf32>
    %139 = arith.mulf %136, %136 : vector<8x1xf32>
    %140 = arith.subf %138, %139 : vector<8x1xf32>
    %141 = vector.broadcast %136 : vector<8x1xf32> to vector<8x32xf32>
    %142 = arith.subf %125, %141 : vector<8x32xf32>
    %cst_67 = arith.constant 9.99999996E-13 : f32
    %143 = vector.broadcast %cst_67 : f32 to vector<8x1xf32>
    %144 = arith.addf %140, %143 : vector<8x1xf32>
    %145 = math.rsqrt %144 : vector<8x1xf32>
    %146 = vector.broadcast %145 : vector<8x1xf32> to vector<8x32xf32>
    %147 = arith.mulf %142, %146 : vector<8x32xf32>
    %148 = vector.broadcast %127 : vector<1x32xf32> to vector<8x32xf32>
    %149 = arith.mulf %147, %148 : vector<8x32xf32>
    %150 = vector.broadcast %129 : vector<1x32xf32> to vector<8x32xf32>
    %151 = arith.addf %149, %150 : vector<8x32xf32>
    %c0_68 = arith.constant 0 : index
    %c0_69 = arith.constant 0 : index
    %152 = vector.load %arg19[%c0_68, %c0_69] : memref<8x32xf32, #tpu.memory_space<vmem>>, vector<8x32xf32>
    tpu.vector_store %arg19[%c0_68, %c0_69], %151 {strides = array<i32>} : memref<8x32xf32, #tpu.memory_space<vmem>>, vector<8x32xf32>,
    %c0_70 = arith.constant 0 : index
    %c0_71 = arith.constant 0 : index
    %c0_72 = arith.constant 0 : index
    %c0_73 = arith.constant 0 : index
    %153 = vector.load %arg18[%c0_70, %c0_71, %c0_72, %c0_73] : memref<1x1x8x32xf32, #tpu.memory_space<vmem>>, vector<1x1x8x32xf32>
    %154 = vector.shape_cast %153 : vector<1x1x8x32xf32> to vector<8x32xf32>
    %155 = vector.shape_cast %151 : vector<8x32xf32> to vector<1x1x8x32xf32>
    tpu.vector_store %arg18[%c0_70, %c0_71, %c0_72, %c0_73], %155 {strides = array<i32>} : memref<1x1x8x32xf32, #tpu.memory_space<vmem>>, vector<1x1x8x32xf32>,
    return
  }
  func.func @transform_0(%arg0: i32, %arg1: i32) -> (i32, i32, i32) {
    %c0_i32 = arith.constant 0 : i32
    %c0_i32_0 = arith.constant 0 : i32
    %c0_i32_1 = arith.constant 0 : i32
    return %arg0, %c0_i32, %c0_i32_0 : i32, i32, i32
  }
  func.func @transform_1(%arg0: i32, %arg1: i32) -> (i32, i32, i32) {
    %c0_i32 = arith.constant 0 : i32
    %c0_i32_0 = arith.constant 0 : i32
    %c0_i32_1 = arith.constant 0 : i32
    return %arg0, %c0_i32, %c0_i32_0 : i32, i32, i32
  }
  func.func @transform_2(%arg0: i32, %arg1: i32) -> (i32, i32) {
    %c0_i32 = arith.constant 0 : i32
    %c0_i32_0 = arith.constant 0 : i32
    %c0_i32_1 = arith.constant 0 : i32
    return %c0_i32, %c0_i32_0 : i32, i32
  }
  func.func @transform_3(%arg0: i32, %arg1: i32) -> (i32, i32) {
    %c0_i32 = arith.constant 0 : i32
    %c0_i32_0 = arith.constant 0 : i32
    %c0_i32_1 = arith.constant 0 : i32
    return %c0_i32, %c0_i32_0 : i32, i32
  }
  func.func @transform_4(%arg0: i32, %arg1: i32) -> (i32, i32, i32) {
    %c0_i32 = arith.constant 0 : i32
    %c0_i32_0 = arith.constant 0 : i32
    %c0_i32_1 = arith.constant 0 : i32
    return %arg1, %c0_i32, %c0_i32_0 : i32, i32, i32
  }
  func.func @transform_5(%arg0: i32, %arg1: i32) -> (i32, i32, i32) {
    %c0_i32 = arith.constant 0 : i32
    %c0_i32_0 = arith.constant 0 : i32
    %c0_i32_1 = arith.constant 0 : i32
    return %arg1, %c0_i32, %c0_i32_0 : i32, i32, i32
  }
  func.func @transform_6(%arg0: i32, %arg1: i32) -> (i32, i32, i32) {
    %c0_i32 = arith.constant 0 : i32
    %c0_i32_0 = arith.constant 0 : i32
    %c0_i32_1 = arith.constant 0 : i32
    return %arg1, %c0_i32, %c0_i32_0 : i32, i32, i32
  }
  func.func @transform_7(%arg0: i32, %arg1: i32) -> (i32, i32, i32) {
    %c0_i32 = arith.constant 0 : i32
    %c0_i32_0 = arith.constant 0 : i32
    %c0_i32_1 = arith.constant 0 : i32
    return %arg1, %c0_i32, %c0_i32_0 : i32, i32, i32
  }
  func.func @transform_8(%arg0: i32, %arg1: i32) -> (i32, i32, i32) {
    %c0_i32 = arith.constant 0 : i32
    %c0_i32_0 = arith.constant 0 : i32
    %c0_i32_1 = arith.constant 0 : i32
    return %arg1, %c0_i32, %c0_i32_0 : i32, i32, i32
  }
  func.func @transform_9(%arg0: i32, %arg1: i32) -> (i32, i32, i32) {
    %c0_i32 = arith.constant 0 : i32
    %c0_i32_0 = arith.constant 0 : i32
    %c0_i32_1 = arith.constant 0 : i32
    return %arg1, %c0_i32, %c0_i32_0 : i32, i32, i32
  }
  func.func @transform_10(%arg0: i32, %arg1: i32) -> (i32, i32, i32) {
    %c0_i32 = arith.constant 0 : i32
    %c0_i32_0 = arith.constant 0 : i32
    %c0_i32_1 = arith.constant 0 : i32
    return %arg1, %c0_i32, %c0_i32_0 : i32, i32, i32
  }
  func.func @transform_11(%arg0: i32, %arg1: i32) -> (i32, i32, i32) {
    %c0_i32 = arith.constant 0 : i32
    %c0_i32_0 = arith.constant 0 : i32
    %c0_i32_1 = arith.constant 0 : i32
    return %arg1, %c0_i32, %c0_i32_0 : i32, i32, i32
  }
  func.func @transform_12(%arg0: i32, %arg1: i32) -> (i32, i32, i32) {
    %c0_i32 = arith.constant 0 : i32
    %c0_i32_0 = arith.constant 0 : i32
    %c0_i32_1 = arith.constant 0 : i32
    return %arg1, %c0_i32, %c0_i32_0 : i32, i32, i32
  }
  func.func @transform_13(%arg0: i32, %arg1: i32) -> (i32, i32, i32) {
    %c0_i32 = arith.constant 0 : i32
    %c0_i32_0 = arith.constant 0 : i32
    %c0_i32_1 = arith.constant 0 : i32
    return %arg1, %c0_i32, %c0_i32_0 : i32, i32, i32
  }
  func.func @transform_14(%arg0: i32, %arg1: i32) -> (i32, i32, i32) {
    %c0_i32 = arith.constant 0 : i32
    %c0_i32_0 = arith.constant 0 : i32
    %c0_i32_1 = arith.constant 0 : i32
    return %arg1, %c0_i32, %c0_i32_0 : i32, i32, i32
  }
  func.func @transform_15(%arg0: i32, %arg1: i32) -> (i32, i32, i32) {
    %c0_i32 = arith.constant 0 : i32
    %c0_i32_0 = arith.constant 0 : i32
    %c0_i32_1 = arith.constant 0 : i32
    return %arg1, %c0_i32, %c0_i32_0 : i32, i32, i32
  }
  func.func @transform_16(%arg0: i32, %arg1: i32) -> (i32, i32, i32, i32) {
    %c0_i32 = arith.constant 0 : i32
    %c0_i32_0 = arith.constant 0 : i32
    %c0_i32_1 = arith.constant 0 : i32
    return %arg1, %arg0, %c0_i32, %c0_i32_0 : i32, i32, i32, i32
  }
}

module attributes {stable_mosaic.version = 11 : i64} {
  func.func @encoder_kernel(%arg0: i32, %arg1: i32, %arg2: memref<1x8x64xf32, #tpu.memory_space<vmem>>, %arg3: memref<1x1x8xf32, #tpu.memory_space<vmem>>, %arg4: memref<1x64xf32, #tpu.memory_space<vmem>>, %arg5: memref<1x64xf32, #tpu.memory_space<vmem>>, %arg6: memref<1x64x192xbf16, #tpu.memory_space<vmem>>, %arg7: memref<1x1x192xf32, #tpu.memory_space<vmem>>, %arg8: memref<1x64x64xbf16, #tpu.memory_space<vmem>>, %arg9: memref<1x1x64xf32, #tpu.memory_space<vmem>>, %arg10: memref<1x1x64xf32, #tpu.memory_space<vmem>>, %arg11: memref<1x1x64xf32, #tpu.memory_space<vmem>>, %arg12: memref<1x64x128xbf16, #tpu.memory_space<vmem>>, %arg13: memref<1x1x128xf32, #tpu.memory_space<vmem>>, %arg14: memref<1x128x64xbf16, #tpu.memory_space<vmem>>, %arg15: memref<1x1x64xf32, #tpu.memory_space<vmem>>, %arg16: memref<1x1x64xf32, #tpu.memory_space<vmem>>, %arg17: memref<1x1x64xf32, #tpu.memory_space<vmem>>, %arg18: memref<1x1x8x64xf32, #tpu.memory_space<vmem>>, %arg19: memref<8x64xf32, #tpu.memory_space<vmem>>) attributes {dimension_semantics = [#tpu.dimension_semantics<parallel>, #tpu.dimension_semantics<arbitrary>], iteration_bounds = array<i64: 2, 2>, scalar_prefetch = 0 : i64, scratch_operands = 1 : i64, tpu.core_type = #tpu.core_type<tc>, window_params = [{transform_indices = @transform_0, window_bounds = array<i64: 1, 8, 64>}, {transform_indices = @transform_1, window_bounds = array<i64: 1, 1, 8>}, {pipeline_mode = #tpu.pipeline_mode<synchronous>, transform_indices = @transform_2, window_bounds = array<i64: 1, 64>}, {pipeline_mode = #tpu.pipeline_mode<synchronous>, transform_indices = @transform_3, window_bounds = array<i64: 1, 64>}, {transform_indices = @transform_4, window_bounds = array<i64: 1, 64, 192>}, {transform_indices = @transform_5, window_bounds = array<i64: 1, 1, 192>}, {transform_indices = @transform_6, window_bounds = array<i64: 1, 64, 64>}, {transform_indices = @transform_7, window_bounds = array<i64: 1, 1, 64>}, {transform_indices = @transform_8, window_bounds = array<i64: 1, 1, 64>}, {transform_indices = @transform_9, window_bounds = array<i64: 1, 1, 64>}, {transform_indices = @transform_10, window_bounds = array<i64: 1, 64, 128>}, {transform_indices = @transform_11, window_bounds = array<i64: 1, 1, 128>}, {transform_indices = @transform_12, window_bounds = array<i64: 1, 128, 64>}, {transform_indices = @transform_13, window_bounds = array<i64: 1, 1, 64>}, {transform_indices = @transform_14, window_bounds = array<i64: 1, 1, 64>}, {transform_indices = @transform_15, window_bounds = array<i64: 1, 1, 64>}, {transform_indices = @transform_16, window_bounds = array<i64: 1, 1, 8, 64>}]} {
    %c0_i32 = arith.constant 0 : i32
    %0 = arith.cmpi eq, %arg1, %c0_i32 : i32
    %1 = arith.extui %0 : i1 to i32
    %c0_i32_0 = arith.constant 0 : i32
    %2 = arith.cmpi ne, %1, %c0_i32_0 : i32
    scf.if %2 {
      %c0_84 = arith.constant 0 : index
      %c0_85 = arith.constant 0 : index
      %c0_86 = arith.constant 0 : index
      %202 = vector.load %arg2[%c0_84, %c0_85, %c0_86] : memref<1x8x64xf32, #tpu.memory_space<vmem>>, vector<1x8x64xf32>
      %203 = vector.shape_cast %202 : vector<1x8x64xf32> to vector<8x64xf32>
      %c0_87 = arith.constant 0 : index
      %c0_88 = arith.constant 0 : index
      %204 = vector.load %arg4[%c0_87, %c0_88] : memref<1x64xf32, #tpu.memory_space<vmem>>, vector<1x64xf32>
      %c0_89 = arith.constant 0 : index
      %c0_90 = arith.constant 0 : index
      %205 = vector.load %arg5[%c0_89, %c0_90] : memref<1x64xf32, #tpu.memory_space<vmem>>, vector<1x64xf32>
      %cst_91 = arith.constant dense<0.000000e+00> : vector<8xf32>
      %206 = vector.multi_reduction <add>, %203, %cst_91 [1] : vector<8x64xf32> to vector<8xf32>
      %207 = vector.shape_cast %206 : vector<8xf32> to vector<8x1xf32>
      %208 = arith.mulf %203, %203 : vector<8x64xf32>
      %cst_92 = arith.constant dense<0.000000e+00> : vector<8xf32>
      %209 = vector.multi_reduction <add>, %208, %cst_92 [1] : vector<8x64xf32> to vector<8xf32>
      %210 = vector.shape_cast %209 : vector<8xf32> to vector<8x1xf32>
      %cst_93 = arith.constant 6.400000e+01 : f32
      %211 = vector.broadcast %cst_93 : f32 to vector<8x1xf32>
      %212 = arith.divf %207, %211 : vector<8x1xf32>
      %cst_94 = arith.constant 6.400000e+01 : f32
      %213 = vector.broadcast %cst_94 : f32 to vector<8x1xf32>
      %214 = arith.divf %210, %213 : vector<8x1xf32>
      %215 = arith.mulf %212, %212 : vector<8x1xf32>
      %216 = arith.subf %214, %215 : vector<8x1xf32>
      %217 = vector.broadcast %212 : vector<8x1xf32> to vector<8x64xf32>
      %218 = arith.subf %203, %217 : vector<8x64xf32>
      %cst_95 = arith.constant 9.99999996E-13 : f32
      %219 = vector.broadcast %cst_95 : f32 to vector<8x1xf32>
      %220 = arith.addf %216, %219 : vector<8x1xf32>
      %221 = math.rsqrt %220 : vector<8x1xf32>
      %222 = vector.broadcast %221 : vector<8x1xf32> to vector<8x64xf32>
      %223 = arith.mulf %218, %222 : vector<8x64xf32>
      %224 = vector.broadcast %204 : vector<1x64xf32> to vector<8x64xf32>
      %225 = arith.mulf %223, %224 : vector<8x64xf32>
      %226 = vector.broadcast %205 : vector<1x64xf32> to vector<8x64xf32>
      %227 = arith.addf %225, %226 : vector<8x64xf32>
      %c0_96 = arith.constant 0 : index
      %c0_97 = arith.constant 0 : index
      %228 = vector.load %arg19[%c0_96, %c0_97] : memref<8x64xf32, #tpu.memory_space<vmem>>, vector<8x64xf32>
      tpu.vector_store %arg19[%c0_96, %c0_97], %227 {strides = array<i32>} : memref<8x64xf32, #tpu.memory_space<vmem>>, vector<8x64xf32>,
    } else {
    }
    %c0 = arith.constant 0 : index
    %c0_1 = arith.constant 0 : index
    %3 = vector.load %arg19[%c0, %c0_1] : memref<8x64xf32, #tpu.memory_space<vmem>>, vector<8x64xf32>
    %c0_2 = arith.constant 0 : index
    %c0_3 = arith.constant 0 : index
    %c0_4 = arith.constant 0 : index
    %4 = vector.load %arg3[%c0_2, %c0_3, %c0_4] : memref<1x1x8xf32, #tpu.memory_space<vmem>>, vector<1x1x8xf32>
    %5 = vector.shape_cast %4 : vector<1x1x8xf32> to vector<1x8xf32>
    %6 = arith.truncf %3 : vector<8x64xf32> to vector<8x64xbf16>
    %c0_5 = arith.constant 0 : index
    %c0_6 = arith.constant 0 : index
    %c0_7 = arith.constant 0 : index
    %7 = vector.load %arg6[%c0_5, %c0_6, %c0_7] : memref<1x64x192xbf16, #tpu.memory_space<vmem>>, vector<1x64x192xbf16>
    %8 = vector.shape_cast %7 : vector<1x64x192xbf16> to vector<64x192xbf16>
    %cst = arith.constant dense<0.000000e+00> : vector<8x192xf32>
    %9 = tpu.matmul %6, %8, %cst {dimension_numbers = #tpu.dot_dimension_numbers<[1], [0], [0], [1], [0, 0, 1, 1], [], []>} : vector<8x64xbf16>, vector<64x192xbf16>, vector<8x192xf32> -> vector<8x192xf32>
    %c0_8 = arith.constant 0 : index
    %c0_9 = arith.constant 0 : index
    %c0_10 = arith.constant 0 : index
    %10 = vector.load %arg7[%c0_8, %c0_9, %c0_10] : memref<1x1x192xf32, #tpu.memory_space<vmem>>, vector<1x1x192xf32>
    %11 = vector.shape_cast %10 : vector<1x1x192xf32> to vector<1x192xf32>
    %12 = vector.broadcast %11 : vector<1x192xf32> to vector<8x192xf32>
    %13 = arith.addf %9, %12 : vector<8x192xf32>
    %14 = vector.extract_strided_slice %13 {offsets = [0, 0], sizes = [8, 16], strides = [1, 1]} : vector<8x192xf32> to vector<8x16xf32>
    %15 = arith.truncf %14 : vector<8x16xf32> to vector<8x16xbf16>
    %16 = vector.extract_strided_slice %13 {offsets = [0, 64], sizes = [8, 16], strides = [1, 1]} : vector<8x192xf32> to vector<8x16xf32>
    %17 = arith.truncf %16 : vector<8x16xf32> to vector<8x16xbf16>
    %18 = vector.extract_strided_slice %13 {offsets = [0, 128], sizes = [8, 16], strides = [1, 1]} : vector<8x192xf32> to vector<8x16xf32>
    %19 = arith.truncf %18 : vector<8x16xf32> to vector<8x16xbf16>
    %cst_11 = arith.constant dense<0.000000e+00> : vector<8x8xf32>
    %20 = tpu.matmul %15, %17, %cst_11 {dimension_numbers = #tpu.dot_dimension_numbers<[1], [1], [0], [0], [0, 0, 1, 0], [], []>} : vector<8x16xbf16>, vector<8x16xbf16>, vector<8x8xf32> -> vector<8x8xf32>
    %cst_12 = arith.constant 2.500000e-01 : f32
    %21 = vector.broadcast %cst_12 : f32 to vector<8x8xf32>
    %22 = arith.mulf %20, %21 : vector<8x8xf32>
    %23 = vector.broadcast %5 : vector<1x8xf32> to vector<8x8xf32>
    %24 = arith.addf %22, %23 : vector<8x8xf32>
    %cst_13 = arith.constant dense<0xFF800000> : vector<8xf32>
    %25 = vector.multi_reduction <maximumf>, %24, %cst_13 [1] : vector<8x8xf32> to vector<8xf32>
    %26 = vector.shape_cast %25 : vector<8xf32> to vector<8x1xf32>
    %27 = vector.broadcast %26 : vector<8x1xf32> to vector<8x8xf32>
    %28 = arith.subf %24, %27 : vector<8x8xf32>
    %29 = math.exp %28 : vector<8x8xf32>
    %cst_14 = arith.constant dense<0.000000e+00> : vector<8xf32>
    %30 = vector.multi_reduction <add>, %29, %cst_14 [1] : vector<8x8xf32> to vector<8xf32>
    %31 = vector.shape_cast %30 : vector<8xf32> to vector<8x1xf32>
    %32 = tpu.reciprocal %31 {approx = true} : vector<8x1xf32> -> vector<8x1xf32>
    %33 = vector.broadcast %32 : vector<8x1xf32> to vector<8x8xf32>
    %34 = arith.mulf %29, %33 : vector<8x8xf32>
    %35 = arith.truncf %34 : vector<8x8xf32> to vector<8x8xbf16>
    %cst_15 = arith.constant dense<0.000000e+00> : vector<8x16xf32>
    %36 = tpu.matmul %35, %19, %cst_15 {dimension_numbers = #tpu.dot_dimension_numbers<[1], [0], [0], [1], [0, 0, 1, 1], [], []>} : vector<8x8xbf16>, vector<8x16xbf16>, vector<8x16xf32> -> vector<8x16xf32>
    %37 = vector.extract_strided_slice %13 {offsets = [0, 16], sizes = [8, 16], strides = [1, 1]} : vector<8x192xf32> to vector<8x16xf32>
    %38 = arith.truncf %37 : vector<8x16xf32> to vector<8x16xbf16>
    %39 = vector.extract_strided_slice %13 {offsets = [0, 80], sizes = [8, 16], strides = [1, 1]} : vector<8x192xf32> to vector<8x16xf32>
    %40 = arith.truncf %39 : vector<8x16xf32> to vector<8x16xbf16>
    %41 = vector.extract_strided_slice %13 {offsets = [0, 144], sizes = [8, 16], strides = [1, 1]} : vector<8x192xf32> to vector<8x16xf32>
    %42 = arith.truncf %41 : vector<8x16xf32> to vector<8x16xbf16>
    %cst_16 = arith.constant dense<0.000000e+00> : vector<8x8xf32>
    %43 = tpu.matmul %38, %40, %cst_16 {dimension_numbers = #tpu.dot_dimension_numbers<[1], [1], [0], [0], [0, 0, 1, 0], [], []>} : vector<8x16xbf16>, vector<8x16xbf16>, vector<8x8xf32> -> vector<8x8xf32>
    %cst_17 = arith.constant 2.500000e-01 : f32
    %44 = vector.broadcast %cst_17 : f32 to vector<8x8xf32>
    %45 = arith.mulf %43, %44 : vector<8x8xf32>
    %46 = vector.broadcast %5 : vector<1x8xf32> to vector<8x8xf32>
    %47 = arith.addf %45, %46 : vector<8x8xf32>
    %cst_18 = arith.constant dense<0xFF800000> : vector<8xf32>
    %48 = vector.multi_reduction <maximumf>, %47, %cst_18 [1] : vector<8x8xf32> to vector<8xf32>
    %49 = vector.shape_cast %48 : vector<8xf32> to vector<8x1xf32>
    %50 = vector.broadcast %49 : vector<8x1xf32> to vector<8x8xf32>
    %51 = arith.subf %47, %50 : vector<8x8xf32>
    %52 = math.exp %51 : vector<8x8xf32>
    %cst_19 = arith.constant dense<0.000000e+00> : vector<8xf32>
    %53 = vector.multi_reduction <add>, %52, %cst_19 [1] : vector<8x8xf32> to vector<8xf32>
    %54 = vector.shape_cast %53 : vector<8xf32> to vector<8x1xf32>
    %55 = tpu.reciprocal %54 {approx = true} : vector<8x1xf32> -> vector<8x1xf32>
    %56 = vector.broadcast %55 : vector<8x1xf32> to vector<8x8xf32>
    %57 = arith.mulf %52, %56 : vector<8x8xf32>
    %58 = arith.truncf %57 : vector<8x8xf32> to vector<8x8xbf16>
    %cst_20 = arith.constant dense<0.000000e+00> : vector<8x16xf32>
    %59 = tpu.matmul %58, %42, %cst_20 {dimension_numbers = #tpu.dot_dimension_numbers<[1], [0], [0], [1], [0, 0, 1, 1], [], []>} : vector<8x8xbf16>, vector<8x16xbf16>, vector<8x16xf32> -> vector<8x16xf32>
    %60 = vector.extract_strided_slice %13 {offsets = [0, 32], sizes = [8, 16], strides = [1, 1]} : vector<8x192xf32> to vector<8x16xf32>
    %61 = arith.truncf %60 : vector<8x16xf32> to vector<8x16xbf16>
    %62 = vector.extract_strided_slice %13 {offsets = [0, 96], sizes = [8, 16], strides = [1, 1]} : vector<8x192xf32> to vector<8x16xf32>
    %63 = arith.truncf %62 : vector<8x16xf32> to vector<8x16xbf16>
    %64 = vector.extract_strided_slice %13 {offsets = [0, 160], sizes = [8, 16], strides = [1, 1]} : vector<8x192xf32> to vector<8x16xf32>
    %65 = arith.truncf %64 : vector<8x16xf32> to vector<8x16xbf16>
    %cst_21 = arith.constant dense<0.000000e+00> : vector<8x8xf32>
    %66 = tpu.matmul %61, %63, %cst_21 {dimension_numbers = #tpu.dot_dimension_numbers<[1], [1], [0], [0], [0, 0, 1, 0], [], []>} : vector<8x16xbf16>, vector<8x16xbf16>, vector<8x8xf32> -> vector<8x8xf32>
    %cst_22 = arith.constant 2.500000e-01 : f32
    %67 = vector.broadcast %cst_22 : f32 to vector<8x8xf32>
    %68 = arith.mulf %66, %67 : vector<8x8xf32>
    %69 = vector.broadcast %5 : vector<1x8xf32> to vector<8x8xf32>
    %70 = arith.addf %68, %69 : vector<8x8xf32>
    %cst_23 = arith.constant dense<0xFF800000> : vector<8xf32>
    %71 = vector.multi_reduction <maximumf>, %70, %cst_23 [1] : vector<8x8xf32> to vector<8xf32>
    %72 = vector.shape_cast %71 : vector<8xf32> to vector<8x1xf32>
    %73 = vector.broadcast %72 : vector<8x1xf32> to vector<8x8xf32>
    %74 = arith.subf %70, %73 : vector<8x8xf32>
    %75 = math.exp %74 : vector<8x8xf32>
    %cst_24 = arith.constant dense<0.000000e+00> : vector<8xf32>
    %76 = vector.multi_reduction <add>, %75, %cst_24 [1] : vector<8x8xf32> to vector<8xf32>
    %77 = vector.shape_cast %76 : vector<8xf32> to vector<8x1xf32>
    %78 = tpu.reciprocal %77 {approx = true} : vector<8x1xf32> -> vector<8x1xf32>
    %79 = vector.broadcast %78 : vector<8x1xf32> to vector<8x8xf32>
    %80 = arith.mulf %75, %79 : vector<8x8xf32>
    %81 = arith.truncf %80 : vector<8x8xf32> to vector<8x8xbf16>
    %cst_25 = arith.constant dense<0.000000e+00> : vector<8x16xf32>
    %82 = tpu.matmul %81, %65, %cst_25 {dimension_numbers = #tpu.dot_dimension_numbers<[1], [0], [0], [1], [0, 0, 1, 1], [], []>} : vector<8x8xbf16>, vector<8x16xbf16>, vector<8x16xf32> -> vector<8x16xf32>
    %83 = vector.extract_strided_slice %13 {offsets = [0, 48], sizes = [8, 16], strides = [1, 1]} : vector<8x192xf32> to vector<8x16xf32>
    %84 = arith.truncf %83 : vector<8x16xf32> to vector<8x16xbf16>
    %85 = vector.extract_strided_slice %13 {offsets = [0, 112], sizes = [8, 16], strides = [1, 1]} : vector<8x192xf32> to vector<8x16xf32>
    %86 = arith.truncf %85 : vector<8x16xf32> to vector<8x16xbf16>
    %87 = vector.extract_strided_slice %13 {offsets = [0, 176], sizes = [8, 16], strides = [1, 1]} : vector<8x192xf32> to vector<8x16xf32>
    %88 = arith.truncf %87 : vector<8x16xf32> to vector<8x16xbf16>
    %cst_26 = arith.constant dense<0.000000e+00> : vector<8x8xf32>
    %89 = tpu.matmul %84, %86, %cst_26 {dimension_numbers = #tpu.dot_dimension_numbers<[1], [1], [0], [0], [0, 0, 1, 0], [], []>} : vector<8x16xbf16>, vector<8x16xbf16>, vector<8x8xf32> -> vector<8x8xf32>
    %cst_27 = arith.constant 2.500000e-01 : f32
    %90 = vector.broadcast %cst_27 : f32 to vector<8x8xf32>
    %91 = arith.mulf %89, %90 : vector<8x8xf32>
    %92 = vector.broadcast %5 : vector<1x8xf32> to vector<8x8xf32>
    %93 = arith.addf %91, %92 : vector<8x8xf32>
    %cst_28 = arith.constant dense<0xFF800000> : vector<8xf32>
    %94 = vector.multi_reduction <maximumf>, %93, %cst_28 [1] : vector<8x8xf32> to vector<8xf32>
    %95 = vector.shape_cast %94 : vector<8xf32> to vector<8x1xf32>
    %96 = vector.broadcast %95 : vector<8x1xf32> to vector<8x8xf32>
    %97 = arith.subf %93, %96 : vector<8x8xf32>
    %98 = math.exp %97 : vector<8x8xf32>
    %cst_29 = arith.constant dense<0.000000e+00> : vector<8xf32>
    %99 = vector.multi_reduction <add>, %98, %cst_29 [1] : vector<8x8xf32> to vector<8xf32>
    %100 = vector.shape_cast %99 : vector<8xf32> to vector<8x1xf32>
    %101 = tpu.reciprocal %100 {approx = true} : vector<8x1xf32> -> vector<8x1xf32>
    %102 = vector.broadcast %101 : vector<8x1xf32> to vector<8x8xf32>
    %103 = arith.mulf %98, %102 : vector<8x8xf32>
    %104 = arith.truncf %103 : vector<8x8xf32> to vector<8x8xbf16>
    %cst_30 = arith.constant dense<0.000000e+00> : vector<8x16xf32>
    %105 = tpu.matmul %104, %88, %cst_30 {dimension_numbers = #tpu.dot_dimension_numbers<[1], [0], [0], [1], [0, 0, 1, 1], [], []>} : vector<8x8xbf16>, vector<8x16xbf16>, vector<8x16xf32> -> vector<8x16xf32>
    %106 = tpu.concatenate %36, %59, %82, %105 in 1 : vector<8x16xf32>, vector<8x16xf32>, vector<8x16xf32>, vector<8x16xf32> -> vector<8x64xf32>
    %107 = arith.truncf %106 : vector<8x64xf32> to vector<8x64xbf16>
    %c0_31 = arith.constant 0 : index
    %c0_32 = arith.constant 0 : index
    %c0_33 = arith.constant 0 : index
    %108 = vector.load %arg8[%c0_31, %c0_32, %c0_33] : memref<1x64x64xbf16, #tpu.memory_space<vmem>>, vector<1x64x64xbf16>
    %109 = vector.shape_cast %108 : vector<1x64x64xbf16> to vector<64x64xbf16>
    %cst_34 = arith.constant dense<0.000000e+00> : vector<8x64xf32>
    %110 = tpu.matmul %107, %109, %cst_34 {dimension_numbers = #tpu.dot_dimension_numbers<[1], [0], [0], [1], [0, 0, 1, 1], [], []>} : vector<8x64xbf16>, vector<64x64xbf16>, vector<8x64xf32> -> vector<8x64xf32>
    %c0_35 = arith.constant 0 : index
    %c0_36 = arith.constant 0 : index
    %c0_37 = arith.constant 0 : index
    %111 = vector.load %arg9[%c0_35, %c0_36, %c0_37] : memref<1x1x64xf32, #tpu.memory_space<vmem>>, vector<1x1x64xf32>
    %112 = vector.shape_cast %111 : vector<1x1x64xf32> to vector<1x64xf32>
    %113 = vector.broadcast %112 : vector<1x64xf32> to vector<8x64xf32>
    %114 = arith.addf %110, %113 : vector<8x64xf32>
    %115 = arith.addf %3, %114 : vector<8x64xf32>
    %c0_38 = arith.constant 0 : index
    %c0_39 = arith.constant 0 : index
    %c0_40 = arith.constant 0 : index
    %116 = vector.load %arg10[%c0_38, %c0_39, %c0_40] : memref<1x1x64xf32, #tpu.memory_space<vmem>>, vector<1x1x64xf32>
    %117 = vector.shape_cast %116 : vector<1x1x64xf32> to vector<1x64xf32>
    %c0_41 = arith.constant 0 : index
    %c0_42 = arith.constant 0 : index
    %c0_43 = arith.constant 0 : index
    %118 = vector.load %arg11[%c0_41, %c0_42, %c0_43] : memref<1x1x64xf32, #tpu.memory_space<vmem>>, vector<1x1x64xf32>
    %119 = vector.shape_cast %118 : vector<1x1x64xf32> to vector<1x64xf32>
    %cst_44 = arith.constant dense<0.000000e+00> : vector<8xf32>
    %120 = vector.multi_reduction <add>, %115, %cst_44 [1] : vector<8x64xf32> to vector<8xf32>
    %121 = vector.shape_cast %120 : vector<8xf32> to vector<8x1xf32>
    %122 = arith.mulf %115, %115 : vector<8x64xf32>
    %cst_45 = arith.constant dense<0.000000e+00> : vector<8xf32>
    %123 = vector.multi_reduction <add>, %122, %cst_45 [1] : vector<8x64xf32> to vector<8xf32>
    %124 = vector.shape_cast %123 : vector<8xf32> to vector<8x1xf32>
    %cst_46 = arith.constant 6.400000e+01 : f32
    %125 = vector.broadcast %cst_46 : f32 to vector<8x1xf32>
    %126 = arith.divf %121, %125 : vector<8x1xf32>
    %cst_47 = arith.constant 6.400000e+01 : f32
    %127 = vector.broadcast %cst_47 : f32 to vector<8x1xf32>
    %128 = arith.divf %124, %127 : vector<8x1xf32>
    %129 = arith.mulf %126, %126 : vector<8x1xf32>
    %130 = arith.subf %128, %129 : vector<8x1xf32>
    %131 = vector.broadcast %126 : vector<8x1xf32> to vector<8x64xf32>
    %132 = arith.subf %115, %131 : vector<8x64xf32>
    %cst_48 = arith.constant 9.99999996E-13 : f32
    %133 = vector.broadcast %cst_48 : f32 to vector<8x1xf32>
    %134 = arith.addf %130, %133 : vector<8x1xf32>
    %135 = math.rsqrt %134 : vector<8x1xf32>
    %136 = vector.broadcast %135 : vector<8x1xf32> to vector<8x64xf32>
    %137 = arith.mulf %132, %136 : vector<8x64xf32>
    %138 = vector.broadcast %117 : vector<1x64xf32> to vector<8x64xf32>
    %139 = arith.mulf %137, %138 : vector<8x64xf32>
    %140 = vector.broadcast %119 : vector<1x64xf32> to vector<8x64xf32>
    %141 = arith.addf %139, %140 : vector<8x64xf32>
    %142 = arith.truncf %141 : vector<8x64xf32> to vector<8x64xbf16>
    %c0_49 = arith.constant 0 : index
    %c0_50 = arith.constant 0 : index
    %c0_51 = arith.constant 0 : index
    %143 = vector.load %arg12[%c0_49, %c0_50, %c0_51] : memref<1x64x128xbf16, #tpu.memory_space<vmem>>, vector<1x64x128xbf16>
    %144 = vector.shape_cast %143 : vector<1x64x128xbf16> to vector<64x128xbf16>
    %cst_52 = arith.constant dense<0.000000e+00> : vector<8x128xf32>
    %145 = tpu.matmul %142, %144, %cst_52 {dimension_numbers = #tpu.dot_dimension_numbers<[1], [0], [0], [1], [0, 0, 1, 1], [], []>} : vector<8x64xbf16>, vector<64x128xbf16>, vector<8x128xf32> -> vector<8x128xf32>
    %c0_53 = arith.constant 0 : index
    %c0_54 = arith.constant 0 : index
    %c0_55 = arith.constant 0 : index
    %146 = vector.load %arg13[%c0_53, %c0_54, %c0_55] : memref<1x1x128xf32, #tpu.memory_space<vmem>>, vector<1x1x128xf32>
    %147 = vector.shape_cast %146 : vector<1x1x128xf32> to vector<1x128xf32>
    %148 = vector.broadcast %147 : vector<1x128xf32> to vector<8x128xf32>
    %149 = arith.addf %145, %148 : vector<8x128xf32>
    %150 = arith.mulf %149, %149 : vector<8x128xf32>
    %151 = arith.mulf %149, %150 : vector<8x128xf32>
    %cst_56 = arith.constant 4.471500e-02 : f32
    %152 = vector.broadcast %cst_56 : f32 to vector<8x128xf32>
    %153 = arith.mulf %152, %151 : vector<8x128xf32>
    %154 = arith.addf %149, %153 : vector<8x128xf32>
    %cst_57 = arith.constant 0.797884583 : f32
    %155 = vector.broadcast %cst_57 : f32 to vector<8x128xf32>
    %156 = arith.mulf %155, %154 : vector<8x128xf32>
    %157 = math.tanh %156 : vector<8x128xf32>
    %cst_58 = arith.constant 1.000000e+00 : f32
    %158 = vector.broadcast %cst_58 : f32 to vector<8x128xf32>
    %159 = arith.addf %158, %157 : vector<8x128xf32>
    %cst_59 = arith.constant 5.000000e-01 : f32
    %160 = vector.broadcast %cst_59 : f32 to vector<8x128xf32>
    %161 = arith.mulf %160, %159 : vector<8x128xf32>
    %162 = arith.mulf %149, %161 : vector<8x128xf32>
    %163 = arith.truncf %162 : vector<8x128xf32> to vector<8x128xbf16>
    %c0_60 = arith.constant 0 : index
    %c0_61 = arith.constant 0 : index
    %c0_62 = arith.constant 0 : index
    %164 = vector.load %arg14[%c0_60, %c0_61, %c0_62] : memref<1x128x64xbf16, #tpu.memory_space<vmem>>, vector<1x128x64xbf16>
    %165 = vector.shape_cast %164 : vector<1x128x64xbf16> to vector<128x64xbf16>
    %cst_63 = arith.constant dense<0.000000e+00> : vector<8x64xf32>
    %166 = tpu.matmul %163, %165, %cst_63 {dimension_numbers = #tpu.dot_dimension_numbers<[1], [0], [0], [1], [0, 0, 1, 1], [], []>} : vector<8x128xbf16>, vector<128x64xbf16>, vector<8x64xf32> -> vector<8x64xf32>
    %c0_64 = arith.constant 0 : index
    %c0_65 = arith.constant 0 : index
    %c0_66 = arith.constant 0 : index
    %167 = vector.load %arg15[%c0_64, %c0_65, %c0_66] : memref<1x1x64xf32, #tpu.memory_space<vmem>>, vector<1x1x64xf32>
    %168 = vector.shape_cast %167 : vector<1x1x64xf32> to vector<1x64xf32>
    %169 = vector.broadcast %168 : vector<1x64xf32> to vector<8x64xf32>
    %170 = arith.addf %166, %169 : vector<8x64xf32>
    %171 = arith.addf %141, %170 : vector<8x64xf32>
    %c0_67 = arith.constant 0 : index
    %c0_68 = arith.constant 0 : index
    %c0_69 = arith.constant 0 : index
    %172 = vector.load %arg16[%c0_67, %c0_68, %c0_69] : memref<1x1x64xf32, #tpu.memory_space<vmem>>, vector<1x1x64xf32>
    %173 = vector.shape_cast %172 : vector<1x1x64xf32> to vector<1x64xf32>
    %c0_70 = arith.constant 0 : index
    %c0_71 = arith.constant 0 : index
    %c0_72 = arith.constant 0 : index
    %174 = vector.load %arg17[%c0_70, %c0_71, %c0_72] : memref<1x1x64xf32, #tpu.memory_space<vmem>>, vector<1x1x64xf32>
    %175 = vector.shape_cast %174 : vector<1x1x64xf32> to vector<1x64xf32>
    %cst_73 = arith.constant dense<0.000000e+00> : vector<8xf32>
    %176 = vector.multi_reduction <add>, %171, %cst_73 [1] : vector<8x64xf32> to vector<8xf32>
    %177 = vector.shape_cast %176 : vector<8xf32> to vector<8x1xf32>
    %178 = arith.mulf %171, %171 : vector<8x64xf32>
    %cst_74 = arith.constant dense<0.000000e+00> : vector<8xf32>
    %179 = vector.multi_reduction <add>, %178, %cst_74 [1] : vector<8x64xf32> to vector<8xf32>
    %180 = vector.shape_cast %179 : vector<8xf32> to vector<8x1xf32>
    %cst_75 = arith.constant 6.400000e+01 : f32
    %181 = vector.broadcast %cst_75 : f32 to vector<8x1xf32>
    %182 = arith.divf %177, %181 : vector<8x1xf32>
    %cst_76 = arith.constant 6.400000e+01 : f32
    %183 = vector.broadcast %cst_76 : f32 to vector<8x1xf32>
    %184 = arith.divf %180, %183 : vector<8x1xf32>
    %185 = arith.mulf %182, %182 : vector<8x1xf32>
    %186 = arith.subf %184, %185 : vector<8x1xf32>
    %187 = vector.broadcast %182 : vector<8x1xf32> to vector<8x64xf32>
    %188 = arith.subf %171, %187 : vector<8x64xf32>
    %cst_77 = arith.constant 9.99999996E-13 : f32
    %189 = vector.broadcast %cst_77 : f32 to vector<8x1xf32>
    %190 = arith.addf %186, %189 : vector<8x1xf32>
    %191 = math.rsqrt %190 : vector<8x1xf32>
    %192 = vector.broadcast %191 : vector<8x1xf32> to vector<8x64xf32>
    %193 = arith.mulf %188, %192 : vector<8x64xf32>
    %194 = vector.broadcast %173 : vector<1x64xf32> to vector<8x64xf32>
    %195 = arith.mulf %193, %194 : vector<8x64xf32>
    %196 = vector.broadcast %175 : vector<1x64xf32> to vector<8x64xf32>
    %197 = arith.addf %195, %196 : vector<8x64xf32>
    %c0_78 = arith.constant 0 : index
    %c0_79 = arith.constant 0 : index
    %198 = vector.load %arg19[%c0_78, %c0_79] : memref<8x64xf32, #tpu.memory_space<vmem>>, vector<8x64xf32>
    tpu.vector_store %arg19[%c0_78, %c0_79], %197 {strides = array<i32>} : memref<8x64xf32, #tpu.memory_space<vmem>>, vector<8x64xf32>,
    %c0_80 = arith.constant 0 : index
    %c0_81 = arith.constant 0 : index
    %c0_82 = arith.constant 0 : index
    %c0_83 = arith.constant 0 : index
    %199 = vector.load %arg18[%c0_80, %c0_81, %c0_82, %c0_83] : memref<1x1x8x64xf32, #tpu.memory_space<vmem>>, vector<1x1x8x64xf32>
    %200 = vector.shape_cast %199 : vector<1x1x8x64xf32> to vector<8x64xf32>
    %201 = vector.shape_cast %197 : vector<8x64xf32> to vector<1x1x8x64xf32>
    tpu.vector_store %arg18[%c0_80, %c0_81, %c0_82, %c0_83], %201 {strides = array<i32>} : memref<1x1x8x64xf32, #tpu.memory_space<vmem>>, vector<1x1x8x64xf32>,
    return
  }
  func.func @transform_0(%arg0: i32, %arg1: i32) -> (i32, i32, i32) {
    %c0_i32 = arith.constant 0 : i32
    %c0_i32_0 = arith.constant 0 : i32
    %c0_i32_1 = arith.constant 0 : i32
    return %arg0, %c0_i32, %c0_i32_0 : i32, i32, i32
  }
  func.func @transform_1(%arg0: i32, %arg1: i32) -> (i32, i32, i32) {
    %c0_i32 = arith.constant 0 : i32
    %c0_i32_0 = arith.constant 0 : i32
    %c0_i32_1 = arith.constant 0 : i32
    return %arg0, %c0_i32, %c0_i32_0 : i32, i32, i32
  }
  func.func @transform_2(%arg0: i32, %arg1: i32) -> (i32, i32) {
    %c0_i32 = arith.constant 0 : i32
    %c0_i32_0 = arith.constant 0 : i32
    %c0_i32_1 = arith.constant 0 : i32
    return %c0_i32, %c0_i32_0 : i32, i32
  }
  func.func @transform_3(%arg0: i32, %arg1: i32) -> (i32, i32) {
    %c0_i32 = arith.constant 0 : i32
    %c0_i32_0 = arith.constant 0 : i32
    %c0_i32_1 = arith.constant 0 : i32
    return %c0_i32, %c0_i32_0 : i32, i32
  }
  func.func @transform_4(%arg0: i32, %arg1: i32) -> (i32, i32, i32) {
    %c0_i32 = arith.constant 0 : i32
    %c0_i32_0 = arith.constant 0 : i32
    %c0_i32_1 = arith.constant 0 : i32
    return %arg1, %c0_i32, %c0_i32_0 : i32, i32, i32
  }
  func.func @transform_5(%arg0: i32, %arg1: i32) -> (i32, i32, i32) {
    %c0_i32 = arith.constant 0 : i32
    %c0_i32_0 = arith.constant 0 : i32
    %c0_i32_1 = arith.constant 0 : i32
    return %arg1, %c0_i32, %c0_i32_0 : i32, i32, i32
  }
  func.func @transform_6(%arg0: i32, %arg1: i32) -> (i32, i32, i32) {
    %c0_i32 = arith.constant 0 : i32
    %c0_i32_0 = arith.constant 0 : i32
    %c0_i32_1 = arith.constant 0 : i32
    return %arg1, %c0_i32, %c0_i32_0 : i32, i32, i32
  }
  func.func @transform_7(%arg0: i32, %arg1: i32) -> (i32, i32, i32) {
    %c0_i32 = arith.constant 0 : i32
    %c0_i32_0 = arith.constant 0 : i32
    %c0_i32_1 = arith.constant 0 : i32
    return %arg1, %c0_i32, %c0_i32_0 : i32, i32, i32
  }
  func.func @transform_8(%arg0: i32, %arg1: i32) -> (i32, i32, i32) {
    %c0_i32 = arith.constant 0 : i32
    %c0_i32_0 = arith.constant 0 : i32
    %c0_i32_1 = arith.constant 0 : i32
    return %arg1, %c0_i32, %c0_i32_0 : i32, i32, i32
  }
  func.func @transform_9(%arg0: i32, %arg1: i32) -> (i32, i32, i32) {
    %c0_i32 = arith.constant 0 : i32
    %c0_i32_0 = arith.constant 0 : i32
    %c0_i32_1 = arith.constant 0 : i32
    return %arg1, %c0_i32, %c0_i32_0 : i32, i32, i32
  }
  func.func @transform_10(%arg0: i32, %arg1: i32) -> (i32, i32, i32) {
    %c0_i32 = arith.constant 0 : i32
    %c0_i32_0 = arith.constant 0 : i32
    %c0_i32_1 = arith.constant 0 : i32
    return %arg1, %c0_i32, %c0_i32_0 : i32, i32, i32
  }
  func.func @transform_11(%arg0: i32, %arg1: i32) -> (i32, i32, i32) {
    %c0_i32 = arith.constant 0 : i32
    %c0_i32_0 = arith.constant 0 : i32
    %c0_i32_1 = arith.constant 0 : i32
    return %arg1, %c0_i32, %c0_i32_0 : i32, i32, i32
  }
  func.func @transform_12(%arg0: i32, %arg1: i32) -> (i32, i32, i32) {
    %c0_i32 = arith.constant 0 : i32
    %c0_i32_0 = arith.constant 0 : i32
    %c0_i32_1 = arith.constant 0 : i32
    return %arg1, %c0_i32, %c0_i32_0 : i32, i32, i32
  }
  func.func @transform_13(%arg0: i32, %arg1: i32) -> (i32, i32, i32) {
    %c0_i32 = arith.constant 0 : i32
    %c0_i32_0 = arith.constant 0 : i32
    %c0_i32_1 = arith.constant 0 : i32
    return %arg1, %c0_i32, %c0_i32_0 : i32, i32, i32
  }
  func.func @transform_14(%arg0: i32, %arg1: i32) -> (i32, i32, i32) {
    %c0_i32 = arith.constant 0 : i32
    %c0_i32_0 = arith.constant 0 : i32
    %c0_i32_1 = arith.constant 0 : i32
    return %arg1, %c0_i32, %c0_i32_0 : i32, i32, i32
  }
  func.func @transform_15(%arg0: i32, %arg1: i32) -> (i32, i32, i32) {
    %c0_i32 = arith.constant 0 : i32
    %c0_i32_0 = arith.constant 0 : i32
    %c0_i32_1 = arith.constant 0 : i32
    return %arg1, %c0_i32, %c0_i32_0 : i32, i32, i32
  }
  func.func @transform_16(%arg0: i32, %arg1: i32) -> (i32, i32, i32, i32) {
    %c0_i32 = arith.constant 0 : i32
    %c0_i32_0 = arith.constant 0 : i32
    %c0_i32_1 = arith.constant 0 : i32
    return %arg1, %arg0, %c0_i32, %c0_i32_0 : i32, i32, i32, i32
  }
}

module attributes {stable_mosaic.version = 11 : i64} {
  func.func @pool_cls_kernel(%arg0: i32, %arg1: memref<2x64xf32, #tpu.memory_space<vmem>>, %arg2: memref<64x64xbf16, #tpu.memory_space<vmem>>, %arg3: memref<1x64xf32, #tpu.memory_space<vmem>>, %arg4: memref<64x128xbf16, #tpu.memory_space<vmem>>, %arg5: memref<1x128xf32, #tpu.memory_space<vmem>>, %arg6: memref<2x128xf32, #tpu.memory_space<vmem>>) attributes {dimension_semantics = [#tpu.dimension_semantics<arbitrary>], iteration_bounds = array<i64: 1>, scalar_prefetch = 0 : i64, scratch_operands = 0 : i64, tpu.core_type = #tpu.core_type<tc>, window_params = [{pipeline_mode = #tpu.pipeline_mode<synchronous>, transform_indices = @transform_0, window_bounds = array<i64: 2, 64>}, {pipeline_mode = #tpu.pipeline_mode<synchronous>, transform_indices = @transform_1, window_bounds = array<i64: 64, 64>}, {pipeline_mode = #tpu.pipeline_mode<synchronous>, transform_indices = @transform_2, window_bounds = array<i64: 1, 64>}, {pipeline_mode = #tpu.pipeline_mode<synchronous>, transform_indices = @transform_3, window_bounds = array<i64: 64, 128>}, {pipeline_mode = #tpu.pipeline_mode<synchronous>, transform_indices = @transform_4, window_bounds = array<i64: 1, 128>}, {pipeline_mode = #tpu.pipeline_mode<synchronous>, transform_indices = @transform_5, window_bounds = array<i64: 2, 128>}]} {
    %c0 = arith.constant 0 : index
    %c0_0 = arith.constant 0 : index
    %0 = vector.load %arg1[%c0, %c0_0] : memref<2x64xf32, #tpu.memory_space<vmem>>, vector<2x64xf32>
    %1 = arith.truncf %0 : vector<2x64xf32> to vector<2x64xbf16>
    %c0_1 = arith.constant 0 : index
    %c0_2 = arith.constant 0 : index
    %2 = vector.load %arg2[%c0_1, %c0_2] : memref<64x64xbf16, #tpu.memory_space<vmem>>, vector<64x64xbf16>
    %cst = arith.constant dense<0.000000e+00> : vector<2x64xf32>
    %3 = tpu.matmul %1, %2, %cst {dimension_numbers = #tpu.dot_dimension_numbers<[1], [0], [0], [1], [0, 0, 1, 1], [], []>} : vector<2x64xbf16>, vector<64x64xbf16>, vector<2x64xf32> -> vector<2x64xf32>
    %c0_3 = arith.constant 0 : index
    %c0_4 = arith.constant 0 : index
    %4 = vector.load %arg3[%c0_3, %c0_4] : memref<1x64xf32, #tpu.memory_space<vmem>>, vector<1x64xf32>
    %5 = vector.broadcast %4 : vector<1x64xf32> to vector<2x64xf32>
    %6 = arith.addf %3, %5 : vector<2x64xf32>
    %7 = math.tanh %6 : vector<2x64xf32>
    %8 = arith.truncf %7 : vector<2x64xf32> to vector<2x64xbf16>
    %c0_5 = arith.constant 0 : index
    %c0_6 = arith.constant 0 : index
    %9 = vector.load %arg4[%c0_5, %c0_6] : memref<64x128xbf16, #tpu.memory_space<vmem>>, vector<64x128xbf16>
    %cst_7 = arith.constant dense<0.000000e+00> : vector<2x128xf32>
    %10 = tpu.matmul %8, %9, %cst_7 {dimension_numbers = #tpu.dot_dimension_numbers<[1], [0], [0], [1], [0, 0, 1, 1], [], []>} : vector<2x64xbf16>, vector<64x128xbf16>, vector<2x128xf32> -> vector<2x128xf32>
    %c0_8 = arith.constant 0 : index
    %c0_9 = arith.constant 0 : index
    %11 = vector.load %arg5[%c0_8, %c0_9] : memref<1x128xf32, #tpu.memory_space<vmem>>, vector<1x128xf32>
    %12 = vector.broadcast %11 : vector<1x128xf32> to vector<2x128xf32>
    %13 = arith.addf %10, %12 : vector<2x128xf32>
    %c0_10 = arith.constant 0 : index
    %c0_11 = arith.constant 0 : index
    %14 = vector.load %arg6[%c0_10, %c0_11] : memref<2x128xf32, #tpu.memory_space<vmem>>, vector<2x128xf32>
    tpu.vector_store %arg6[%c0_10, %c0_11], %13 {strides = array<i32>} : memref<2x128xf32, #tpu.memory_space<vmem>>, vector<2x128xf32>,
    return
  }
  func.func @transform_0(%arg0: i32) -> (i32, i32) {
    %c0_i32 = arith.constant 0 : i32
    %c0_i32_0 = arith.constant 0 : i32
    %c0_i32_1 = arith.constant 0 : i32
    return %c0_i32, %c0_i32_0 : i32, i32
  }
  func.func @transform_1(%arg0: i32) -> (i32, i32) {
    %c0_i32 = arith.constant 0 : i32
    %c0_i32_0 = arith.constant 0 : i32
    %c0_i32_1 = arith.constant 0 : i32
    return %c0_i32, %c0_i32_0 : i32, i32
  }
  func.func @transform_2(%arg0: i32) -> (i32, i32) {
    %c0_i32 = arith.constant 0 : i32
    %c0_i32_0 = arith.constant 0 : i32
    %c0_i32_1 = arith.constant 0 : i32
    return %c0_i32, %c0_i32_0 : i32, i32
  }
  func.func @transform_3(%arg0: i32) -> (i32, i32) {
    %c0_i32 = arith.constant 0 : i32
    %c0_i32_0 = arith.constant 0 : i32
    %c0_i32_1 = arith.constant 0 : i32
    return %c0_i32, %c0_i32_0 : i32, i32
  }
  func.func @transform_4(%arg0: i32) -> (i32, i32) {
    %c0_i32 = arith.constant 0 : i32
    %c0_i32_0 = arith.constant 0 : i32
    %c0_i32_1 = arith.constant 0 : i32
    return %c0_i32, %c0_i32_0 : i32, i32
  }
  func.func @transform_5(%arg0: i32) -> (i32, i32) {
    %c0_i32 = arith.constant 0 : i32
    %c0_i32_0 = arith.constant 0 : i32
    %c0_i32_1 = arith.constant 0 : i32
    return %c0_i32, %c0_i32_0 : i32, i32
  }
}

module attributes {stable_mosaic.version = 11 : i64} {
  func.func @kd_loss_kernel(%arg0: i32, %arg1: memref<2x128xf32, #tpu.memory_space<vmem>>, %arg2: memref<2x128xf32, #tpu.memory_space<vmem>>, %arg3: memref<2x128xf32, #tpu.memory_space<vmem>>, %arg4: memref<1x128xf32, #tpu.memory_space<vmem>>, %arg5: memref<1x128xf32, #tpu.memory_space<vmem>>, %arg6: memref<1x128xf32, #tpu.memory_space<vmem>>) attributes {dimension_semantics = [#tpu.dimension_semantics<arbitrary>], iteration_bounds = array<i64: 1>, scalar_prefetch = 0 : i64, scratch_operands = 0 : i64, tpu.core_type = #tpu.core_type<tc>, window_params = [{pipeline_mode = #tpu.pipeline_mode<synchronous>, transform_indices = @transform_0, window_bounds = array<i64: 2, 128>}, {pipeline_mode = #tpu.pipeline_mode<synchronous>, transform_indices = @transform_1, window_bounds = array<i64: 2, 128>}, {pipeline_mode = #tpu.pipeline_mode<synchronous>, transform_indices = @transform_2, window_bounds = array<i64: 2, 128>}, {pipeline_mode = #tpu.pipeline_mode<synchronous>, transform_indices = @transform_3, window_bounds = array<i64: 1, 128>}, {pipeline_mode = #tpu.pipeline_mode<synchronous>, transform_indices = @transform_4, window_bounds = array<i64: 1, 128>}, {pipeline_mode = #tpu.pipeline_mode<synchronous>, transform_indices = @transform_5, window_bounds = array<i64: 1, 128>}]} {
    %c0 = arith.constant 0 : index
    %c0_0 = arith.constant 0 : index
    %0 = vector.load %arg1[%c0, %c0_0] : memref<2x128xf32, #tpu.memory_space<vmem>>, vector<2x128xf32>
    %c0_1 = arith.constant 0 : index
    %c0_2 = arith.constant 0 : index
    %1 = vector.load %arg2[%c0_1, %c0_2] : memref<2x128xf32, #tpu.memory_space<vmem>>, vector<2x128xf32>
    %c0_3 = arith.constant 0 : index
    %c0_4 = arith.constant 0 : index
    %2 = vector.load %arg3[%c0_3, %c0_4] : memref<2x128xf32, #tpu.memory_space<vmem>>, vector<2x128xf32>
    %3 = tpu.iota {dimensions = array<i32: 1>} : vector<2x128xi32>
    %c3_i32 = arith.constant 3 : i32
    %4 = vector.broadcast %c3_i32 : i32 to vector<2x128xi32>
    %5 = arith.cmpi slt, %3, %4 : vector<2x128xi32>
    %cst = arith.constant -1.000000e+30 : f32
    %6 = vector.broadcast %cst : f32 to vector<2x128xf32>
    %7 = arith.select %5, %0, %6 : vector<2x128xi1>, vector<2x128xf32>
    %cst_5 = arith.constant -1.000000e+30 : f32
    %8 = vector.broadcast %cst_5 : f32 to vector<2x128xf32>
    %9 = arith.select %5, %1, %8 : vector<2x128xi1>, vector<2x128xf32>
    %cst_6 = arith.constant dense<0xFF800000> : vector<2xf32>
    %10 = vector.multi_reduction <maximumf>, %9, %cst_6 [1] : vector<2x128xf32> to vector<2xf32>
    %11 = vector.shape_cast %10 : vector<2xf32> to vector<2x1xf32>
    %12 = vector.broadcast %11 : vector<2x1xf32> to vector<2x128xf32>
    %13 = arith.subf %9, %12 : vector<2x128xf32>
    %14 = math.exp %13 : vector<2x128xf32>
    %cst_7 = arith.constant 0.000000e+00 : f32
    %15 = vector.broadcast %cst_7 : f32 to vector<2x128xf32>
    %16 = arith.select %5, %14, %15 : vector<2x128xi1>, vector<2x128xf32>
    %cst_8 = arith.constant dense<0.000000e+00> : vector<2xf32>
    %17 = vector.multi_reduction <add>, %16, %cst_8 [1] : vector<2x128xf32> to vector<2xf32>
    %18 = vector.shape_cast %17 : vector<2xf32> to vector<2x1xf32>
    %19 = math.log %18 : vector<2x1xf32>
    %20 = vector.broadcast %19 : vector<2x1xf32> to vector<2x128xf32>
    %21 = arith.subf %13, %20 : vector<2x128xf32>
    %22 = arith.mulf %2, %21 : vector<2x128xf32>
    %cst_9 = arith.constant 0.000000e+00 : f32
    %23 = vector.broadcast %cst_9 : f32 to vector<2x128xf32>
    %24 = arith.select %5, %22, %23 : vector<2x128xi1>, vector<2x128xf32>
    %25 = vector.shape_cast %24 : vector<2x128xf32> to vector<1x2x128xf32>
    %cst_10 = arith.constant dense<0.000000e+00> : vector<1xf32>
    %26 = vector.multi_reduction <add>, %25, %cst_10 [1, 2] : vector<1x2x128xf32> to vector<1xf32>
    %27 = vector.shape_cast %26 : vector<1xf32> to vector<1x1x1xf32>
    %28 = vector.extract %27[0, 0, 0] : f32 from vector<1x1x1xf32>
    %cst_11 = arith.constant 0.000000e+00 : f32
    %29 = arith.subf %cst_11, %28 : f32
    %cst_12 = arith.constant 2.000000e+00 : f32
    %30 = arith.divf %29, %cst_12 : f32
    %cst_13 = arith.constant dense<0xFF800000> : vector<2xf32>
    %31 = vector.multi_reduction <maximumf>, %7, %cst_13 [1] : vector<2x128xf32> to vector<2xf32>
    %32 = vector.shape_cast %31 : vector<2xf32> to vector<2x1xf32>
    %33 = vector.broadcast %32 : vector<2x1xf32> to vector<2x128xf32>
    %34 = arith.subf %7, %33 : vector<2x128xf32>
    %35 = math.exp %34 : vector<2x128xf32>
    %cst_14 = arith.constant 0.000000e+00 : f32
    %36 = vector.broadcast %cst_14 : f32 to vector<2x128xf32>
    %37 = arith.select %5, %35, %36 : vector<2x128xi1>, vector<2x128xf32>
    %cst_15 = arith.constant dense<0.000000e+00> : vector<2xf32>
    %38 = vector.multi_reduction <add>, %37, %cst_15 [1] : vector<2x128xf32> to vector<2xf32>
    %39 = vector.shape_cast %38 : vector<2xf32> to vector<2x1xf32>
    %40 = math.log %39 : vector<2x1xf32>
    %41 = vector.broadcast %40 : vector<2x1xf32> to vector<2x128xf32>
    %42 = arith.subf %34, %41 : vector<2x128xf32>
    %43 = math.exp %42 : vector<2x128xf32>
    %cst_16 = arith.constant 1.000000e+00 : f32
    %44 = vector.broadcast %cst_16 : f32 to vector<2x128xf32>
    %45 = arith.mulf %43, %44 : vector<2x128xf32>
    %46 = arith.subf %42, %21 : vector<2x128xf32>
    %47 = arith.mulf %45, %46 : vector<2x128xf32>
    %cst_17 = arith.constant 0.000000e+00 : f32
    %48 = vector.broadcast %cst_17 : f32 to vector<2x128xf32>
    %49 = arith.select %5, %47, %48 : vector<2x128xi1>, vector<2x128xf32>
    %50 = vector.shape_cast %49 : vector<2x128xf32> to vector<1x2x128xf32>
    %cst_18 = arith.constant dense<0.000000e+00> : vector<1xf32>
    %51 = vector.multi_reduction <add>, %50, %cst_18 [1, 2] : vector<1x2x128xf32> to vector<1xf32>
    %52 = vector.shape_cast %51 : vector<1xf32> to vector<1x1x1xf32>
    %53 = vector.extract %52[0, 0, 0] : f32 from vector<1x1x1xf32>
    %cst_19 = arith.constant 2.000000e+00 : f32
    %54 = arith.divf %53, %cst_19 : f32
    %cst_20 = arith.constant 5.000000e-01 : f32
    %55 = arith.mulf %cst_20, %30 : f32
    %cst_21 = arith.constant 5.000000e-01 : f32
    %56 = arith.mulf %cst_21, %54 : f32
    %57 = arith.addf %55, %56 : f32
    %58 = vector.broadcast %30 : f32 to vector<1x128xf32>
    %c0_22 = arith.constant 0 : index
    %c0_23 = arith.constant 0 : index
    %59 = vector.load %arg4[%c0_22, %c0_23] : memref<1x128xf32, #tpu.memory_space<vmem>>, vector<1x128xf32>
    tpu.vector_store %arg4[%c0_22, %c0_23], %58 {strides = array<i32>} : memref<1x128xf32, #tpu.memory_space<vmem>>, vector<1x128xf32>,
    %60 = vector.broadcast %54 : f32 to vector<1x128xf32>
    %c0_24 = arith.constant 0 : index
    %c0_25 = arith.constant 0 : index
    %61 = vector.load %arg5[%c0_24, %c0_25] : memref<1x128xf32, #tpu.memory_space<vmem>>, vector<1x128xf32>
    tpu.vector_store %arg5[%c0_24, %c0_25], %60 {strides = array<i32>} : memref<1x128xf32, #tpu.memory_space<vmem>>, vector<1x128xf32>,
    %62 = vector.broadcast %57 : f32 to vector<1x128xf32>
    %c0_26 = arith.constant 0 : index
    %c0_27 = arith.constant 0 : index
    %63 = vector.load %arg6[%c0_26, %c0_27] : memref<1x128xf32, #tpu.memory_space<vmem>>, vector<1x128xf32>
    tpu.vector_store %arg6[%c0_26, %c0_27], %62 {strides = array<i32>} : memref<1x128xf32, #tpu.memory_space<vmem>>, vector<1x128xf32>,
    return
  }
  func.func @transform_0(%arg0: i32) -> (i32, i32) {
    %c0_i32 = arith.constant 0 : i32
    %c0_i32_0 = arith.constant 0 : i32
    %c0_i32_1 = arith.constant 0 : i32
    return %c0_i32, %c0_i32_0 : i32, i32
  }
  func.func @transform_1(%arg0: i32) -> (i32, i32) {
    %c0_i32 = arith.constant 0 : i32
    %c0_i32_0 = arith.constant 0 : i32
    %c0_i32_1 = arith.constant 0 : i32
    return %c0_i32, %c0_i32_0 : i32, i32
  }
  func.func @transform_2(%arg0: i32) -> (i32, i32) {
    %c0_i32 = arith.constant 0 : i32
    %c0_i32_0 = arith.constant 0 : i32
    %c0_i32_1 = arith.constant 0 : i32
    return %c0_i32, %c0_i32_0 : i32, i32
  }
  func.func @transform_3(%arg0: i32) -> (i32, i32) {
    %c0_i32 = arith.constant 0 : i32
    %c0_i32_0 = arith.constant 0 : i32
    %c0_i32_1 = arith.constant 0 : i32
    return %c0_i32, %c0_i32_0 : i32, i32
  }
  func.func @transform_4(%arg0: i32) -> (i32, i32) {
    %c0_i32 = arith.constant 0 : i32
    %c0_i32_0 = arith.constant 0 : i32
    %c0_i32_1 = arith.constant 0 : i32
    return %c0_i32, %c0_i32_0 : i32, i32
  }
  func.func @transform_5(%arg0: i32) -> (i32, i32) {
    %c0_i32 = arith.constant 0 : i32
    %c0_i32_0 = arith.constant 0 : i32
    %c0_i32_1 = arith.constant 0 : i32
    return %c0_i32, %c0_i32_0 : i32, i32
  }
}

</mosaic_0001>

<bundles_post_ra>
// kernel: kd_forward.8
= control target key start
LH: loop header
LB: loop body
LE: loop exit
PB: predicated region body
PF: predicated region fallthrough
CT: control target
= control target key end

     0   :  { %v201_v0 = vmov 0.0   ;;  %vm202_vm0 = vmmov 0   ;;  %vm46_vm1 = vcmask 261120   ;;  %s259_s1 = inlined_call_operand.vmem [shape: bf16[32,32], index: 1, kind: input, shape index: {}]   ;;  %s260_s0 = inlined_call_operand.vmem [shape: f32[2,32], index: 0, kind: input, shape index: {}]   ;;  %s261_s3 = inlined_call_operand.vmem [shape: bf16[32,128], index: 3, kind: input, shape index: {}]   ;;  %s262_s2 = inlined_call_operand.vmem [shape: f32[1,32], index: 2, kind: input, shape index: {}]   ;;  %s263_s4 = inlined_call_operand.vmem [shape: f32[1,128], index: 4, kind: input, shape index: {}]   ;;  %s264_s5 = inlined_call_operand.vmem [shape: f32[2,128], index: 5, kind: output, shape index: {}]  }
   0x1   :  { %177 = vmatprep.subr.bf16.mxu0 %v201_v0  ;;  %v195_v1 = vld [vmem:[%s259_s1] sm:$0xff]   ;;  %181 = vmatprep.mubr.msk.bf16.mxu0 %vm202_vm0, %v201_v0  ;;  %v196_v2 = vld [vmem:[%s259_s1 + $0x8] sm:$0xff]  }
   0x2   :  { %185 = vmatprep.subr.bf16.mxu1 %v201_v0  ;;  %189 = vmatprep.mubr.msk.bf16.mxu1 %vm202_vm0, %v201_v0  ;;  %v21_v3 = vld [vmem:[%s260_s0] sm:$0x3]  ;;  %v198_v6 = vld [vmem:[%s261_s3 + $0x8] sm:$0xff]  }
   0x3   :  { %178 = vmatpush3.bf16.msra.mxu0 %v195_v1  ;;  %v22_v4 = vpack.c.bf16 %v21_v3, %v21_v3  ;;  %v197_v5 = vld [vmem:[%s261_s3] sm:$0xff]  }
   0x4   :  { %179 = vmatprep.subr.bf16.mxu0 %v201_v0  ;;  %186 = vmatpush3.bf16.msra.mxu1 %v197_v5  ;;  %v163_v7 = vld [vmem:[%s262_s2] ss:$0 sm:$0xff] }
   0x5   :  { %187 = vmatprep.subr.bf16.mxu1 %v201_v0  ;;  %v167_v15 = vld [vmem:[%s263_s4] ss:$0 sm:$0xff] }
   0x7   :  { %180 = vmatpush3.bf16.msra.mxu0 %v196_v2 }
   0x8   :  { %188 = vmatpush3.bf16.msra.mxu1 %v198_v6 }
   0xa   :  { %182 = vmatmul.mubr.msk.bf16.vlgmr.msra.gmra.mrb[0].mxu0 %vm46_vm1, %v22_v4 }
  0xdd   :  { %v84_v8 = vpop.f32.mrb[0].mxu0 }
  0xde   :  { %v85_v9 = vadd.f32 %v163_v7, %v84_v8  ;;  %v183_v10 = vpop.f32.mrb[1].mxu0 }
  0xdf   :  { %v87_v11 = vpop.f32.mrb[2].mxu0 }
  0xe0   :  { %199 = vtanh.f32 %v85_v9  ;;  %v184_v12 = vpop.f32.mrb[3].mxu0 }
  0xea   :  { %v200_v13 = vpop.eup %199 }
  0xeb   :  { %v91_v14 = vpack.c.bf16 %v200_v13, %v200_v13 }
  0xed   :  { %190 = vmatmul.mubr.msk.bf16.vlgmr.msra.gmra.mrb[0].mxu1 %vm46_vm1, %v91_v14 }
 0x1c0   :  { %v152_v16 = vpop.f32.mrb[0].mxu1 }
 0x1c1   :  { %v153_v17 = vadd.f32 %v167_v15, %v152_v16  ;;  %v191_v18 = vpop.f32.mrb[1].mxu1 }
 0x1c2   :  { %v155_v19 = vpop.f32.mrb[2].mxu1 }
 0x1c3   :  { %158 = vst [vmem:[%s264_s5] sm:$0x3] %v153_v17  ;;  %v192_v20 = vpop.f32.mrb[3].mxu1 }

// kernel: kd_forward.6
= control target key start
LH: loop header
LB: loop body
LE: loop exit
PB: predicated region body
PF: predicated region fallthrough
CT: control target
= control target key end

     0   :  { %v253_v0 = vmov 0.0   ;;  %vm254_vm0 = vmmov 0   ;;  %vm62_vm1 = vcmask 523264   ;;  %s323_s1 = inlined_call_operand.vmem [shape: bf16[64,64], index: 1, kind: input, shape index: {}]   ;;  %s324_s0 = inlined_call_operand.vmem [shape: f32[2,64], index: 0, kind: input, shape index: {}]   ;;  %s325_s3 = inlined_call_operand.vmem [shape: bf16[64,128], index: 3, kind: input, shape index: {}]   ;;  %s326_s2 = inlined_call_operand.vmem [shape: f32[1,64], index: 2, kind: input, shape index: {}]   ;;  %s327_s4 = inlined_call_operand.vmem [shape: f32[1,128], index: 4, kind: input, shape index: {}]   ;;  %s328_s5 = inlined_call_operand.vmem [shape: f32[2,128], index: 5, kind: output, shape index: {}]  }
   0x1   :  { %217 = vmatprep.subr.bf16.mxu0 %v253_v0  ;;  %v243_v1 = vld [vmem:[%s323_s1] sm:$0xff]   ;;  %225 = vmatprep.mubr.msk.bf16.mxu0 %vm254_vm0, %v253_v0  ;;  %v244_v2 = vld [vmem:[%s323_s1 + $0x8] sm:$0xff]   ;;  %v245_v3 = vld [vmem:[%s323_s1 + $0x10] sm:$0xff]  }
   0x2   :  { %229 = vmatprep.subr.bf16.mxu1 %v253_v0  ;;  %237 = vmatprep.mubr.msk.bf16.mxu1 %vm254_vm0, %v253_v0  ;;  %v246_v4 = vld [vmem:[%s323_s1 + $0x18] sm:$0xff]   ;;  %v21_v5 = vld [vmem:[%s324_s0] sm:$0x3]  ;;  %v248_v8 = vld [vmem:[%s325_s3 + $0x8] sm:$0xff]  }
   0x3   :  { %218 = vmatpush3.bf16.msra.mxu0 %v243_v1  ;;  %v22_v6 = vpack.c.bf16 %v21_v5, %v21_v5  ;;  %v247_v7 = vld [vmem:[%s325_s3] sm:$0xff]   ;;  %v249_v9 = vld [vmem:[%s325_s3 + $0x10] sm:$0xff]   ;;  %v250_v10 = vld [vmem:[%s325_s3 + $0x18] sm:$0xff]  }
   0x4   :  { %219 = vmatprep.subr.bf16.mxu0 %v253_v0  ;;  %230 = vmatpush3.bf16.msra.mxu1 %v247_v7  ;;  %v195_v11 = vld [vmem:[%s326_s2] ss:$0 sm:$0xff] }
   0x5   :  { %231 = vmatprep.subr.bf16.mxu1 %v253_v0  ;;  %v201_v19 = vld [vmem:[%s327_s4] ss:$0 sm:$0xff] }
   0x7   :  { %220 = vmatpush3.bf16.msra.mxu0 %v244_v2 }
   0x8   :  { %221 = vmatprep.subr.bf16.mxu0 %v253_v0  ;;  %232 = vmatpush3.bf16.msra.mxu1 %v248_v8 }
   0x9   :  { %233 = vmatprep.subr.bf16.mxu1 %v253_v0 }
   0xb   :  { %222 = vmatpush3.bf16.msra.mxu0 %v245_v3 }
   0xc   :  { %223 = vmatprep.subr.bf16.mxu0 %v253_v0  ;;  %234 = vmatpush3.bf16.msra.mxu1 %v249_v9 }
   0xd   :  { %235 = vmatprep.subr.bf16.mxu1 %v253_v0 }
   0xf   :  { %224 = vmatpush3.bf16.msra.mxu0 %v246_v4 }
  0x10   :  { %236 = vmatpush3.bf16.msra.mxu1 %v250_v10 }
  0x12   :  { %226 = vmatmul.mubr.msk.bf16.vlgmr.msra.gmra.mrb[0].mxu0 %vm62_vm1, %v22_v6 }
  0xe5   :  { %v100_v12 = vpop.f32.mrb[0].mxu0 }
  0xe6   :  { %v101_v13 = vadd.f32 %v195_v11, %v100_v12  ;;  %v227_v14 = vpop.f32.mrb[1].mxu0 }
  0xe7   :  { %v103_v15 = vpop.f32.mrb[2].mxu0 }
  0xe8   :  { %251 = vtanh.f32 %v101_v13  ;;  %v228_v16 = vpop.f32.mrb[3].mxu0 }
  0xf2   :  { %v252_v17 = vpop.eup %251 }
  0xf3   :  { %v107_v18 = vpack.c.bf16 %v252_v17, %v252_v17 }
  0xf5   :  { %238 = vmatmul.mubr.msk.bf16.vlgmr.msra.gmra.mrb[0].mxu1 %vm62_vm1, %v107_v18 }
 0x1c8   :  { %v184_v20 = vpop.f32.mrb[0].mxu1 }
 0x1c9   :  { %v185_v21 = vadd.f32 %v201_v19, %v184_v20  ;;  %v239_v22 = vpop.f32.mrb[1].mxu1 }
 0x1ca   :  { %v187_v23 = vpop.f32.mrb[2].mxu1 }
 0x1cb   :  { %190 = vst [vmem:[%s328_s5] sm:$0x3] %v185_v21  ;;  %v240_v24 = vpop.f32.mrb[3].mxu1 }

// kernel: kd_forward.7
= control target key start
LH: loop header
LB: loop body
LE: loop exit
PB: predicated region body
PF: predicated region fallthrough
CT: control target
= control target key end

     0   :  { %s1937_s21 = smov 0   ;;  %s1939_s22 = smov 0   ;;  %s2180_s0 = inlined_call_operand.vmem [shape: f32[2,8,32], index: 0, kind: input, shape index: {}]   ;;  %s2181_s1 = inlined_call_operand.vmem [shape: f32[2,1,8], index: 1, kind: input, shape index: {}]   ;;  %s2182_s2 = inlined_call_operand.vmem [shape: f32[1,32], index: 2, kind: input, shape index: {}]   ;;  %s2183_s3 = inlined_call_operand.vmem [shape: f32[1,32], index: 3, kind: input, shape index: {}]   ;;  %s2184_s4 = inlined_call_operand.vmem [shape: bf16[2,32,96], index: 4, kind: input, shape index: {}]   ;;  %s2185_s5 = inlined_call_operand.vmem [shape: f32[2,1,96], index: 5, kind: input, shape index: {}]   ;;  %s2186_s6 = inlined_call_operand.vmem [shape: bf16[2,32,32], index: 6, kind: input, shape index: {}]   ;;  %s2187_s7 = inlined_call_operand.vmem [shape: f32[2,1,32], index: 7, kind: input, shape index: {}]   ;;  %s2188_s8 = inlined_call_operand.vmem [shape: f32[2,1,32], index: 8, kind: input, shape index: {}]   ;;  %s2189_s9 = inlined_call_operand.vmem [shape: f32[2,1,32], index: 9, kind: input, shape index: {}]   ;;  %s2190_s10 = inlined_call_operand.vmem [shape: bf16[2,32,64], index: 10, kind: input, shape index: {}]   ;;  %s2191_s11 = inlined_call_operand.vmem [shape: f32[2,1,64], index: 11, kind: input, shape index: {}]   ;;  %s2192_s12 = inlined_call_operand.vmem [shape: bf16[2,64,32], index: 12, kind: input, shape index: {}]   ;;  %s2193_s13 = inlined_call_operand.vmem [shape: f32[2,1,32], index: 13, kind: input, shape index: {}]   ;;  %s2194_s14 = inlined_call_operand.vmem [shape: f32[2,1,32], index: 14, kind: input, shape index: {}]   ;;  %s2195_s15 = inlined_call_operand.vmem [shape: f32[2,1,32], index: 15, kind: input, shape index: {}]   ;;  %s2196_s16 = inlined_call_operand.vmem [shape: f32[2,2,8,32], index: 16, kind: output, shape index: {}]  }
   0x1   :  { %2202 = sst [smem:[#allocation10_spill]] %s2180_s0  ;;  %s1941_s23 = smov 0  }
   0x2   :  { %2203 = sst [smem:[#allocation11_spill]] %s2181_s1  ;;  %s1943_s24 = smov 0  }
   0x3   :  { %2204 = sst [smem:[#allocation12_spill]] %s2182_s2  ;;  %s1945_s25 = smov 0  }
   0x4   :  { %2205 = sst [smem:[#allocation13_spill]] %s2183_s3 }
   0x5   :  { %2206 = sst [smem:[#allocation14_spill]] %s2184_s4 }
   0x6   :  { %2207 = sst [smem:[#allocation15_spill]] %s2186_s6 }
   0x7   :  { %2208 = sst [smem:[#allocation16_spill]] %s2190_s10 }
   0x8   :  { %2209 = sst [smem:[#allocation17_spill]] %s2191_s11 }
   0x9   :  { %2210 = sst [smem:[#allocation18_spill]] %s2196_s16 }
   0xa LB: > { %2211 = sst [smem:[#allocation3_spill]] %s1826_s21  ;;  %s35_s26 = sadd.s32 1, %s1834_s23  ;;  %s1842_s25 = sphi %s1945_s25, %s26_s25   ;;  %s1838_s24 = sphi %s1943_s24, %s2242_s24   ;;  %s1834_s23 = sphi %s1941_s23, %s2241_s23   ;;  %s1830_s22 = sphi %s1939_s22, %s2240_s22   ;;  %s1826_s21 = sphi %s1937_s21, %s2239_s21  }
   0xb   : > { %2212 = sst [smem:[#allocation4_spill]] %s1834_s23  ;;  %s38_s27 = sadd.s32 1, %s1838_s24 }
   0xc   : > { %2213 = sst [smem:[#allocation5_spill]] %s1838_s24  ;;  %p36_p0 = scmp.ge.s32.totalorder %s35_s26, 2 }
   0xd   : > { %2214 = sst [smem:[#allocation6_spill]] %s1842_s25  ;;  %p1600_p1 = scmp.ge.s32.totalorder %s1842_s25, 1 }
   0xe   : > { %p587_p2 = scmp.lt.s32.totalorder %s1842_s25, 5  ;;  %s2244_s26 = smov (%p36_p0, %s35_s26), 0 }
   0xf   : > { %2215 = sst [smem:[#allocation7_spill]] %s2244_s26  ;;  %s2246_s27 = smov (!%p36_p0, %s38_s27), %s1838_s24 }
  0x10   : > { %p588_p3 = pnand %p1600_p1, %p587_p2  ;;  %p40_p4 = scmp.ge.s32.totalorder %s2246_s27, 2 }
  0x12   : > { %s2248_s27 = smov (%p40_p4, %s2246_s27), 0  ;;  %591 = sbr.rel (%p588_p3) target bundleno = 2455 (0x997), region = 84 }
  0x13   : > { %2216 = sst [smem:[#allocation8_spill]] %s2248_s27 }
  0x19   : > { %p686_p5 = scmp.lt.s32.totalorder %s1830_s22, 1  ;;  %p693_p6 = scmp.lt.s32.totalorder %s1826_s21, 1 }
  0x1a   : > { %s2218_s20 = sld [smem:[#allocation10_spill]]  ;;  %s2219_s4 = sld [smem:[#allocation14_spill]] }
  0x1b   : > { %s2250_s22 = smov (!%p686_p5, %s1830_s22), 1  ;;  %s2221_s6 = sld [smem:[#allocation15_spill]] }
  0x1c   : > { %s1973_s28 = scalar_select %p693_p6, %s1826_s21, 1 }
  0x1d   : > { %s1601_s29 = sshll.u32 %s2250_s22, 3  ;;  %s2222_s10 = sld [smem:[#allocation16_spill]] }
  0x1e   : > { %s1644_s26 = sshll.u32 %s1973_s28, 4  ;;  %s1610_s16 = sshll.u32 %s1973_s28, 1 }
  0x1f   : > { %s742_s30 = sadd.s32 %s1610_s16, %s2250_s22  ;;  %s2224_s17 = sld [smem:[#allocation18_spill]] }
  0x20   : > { %s689_s27 = scalar_lea.vmem %s2218_s20, %s1601_s29  ;;  %s1987_s25 = scalar_lea.vmem %s2219_s4, %s1644_s26 }
  0x21   : > { %2220 = sst [smem:[#allocation9_spill]] %s1987_s25  ;;  %s1996_s0 = scalar_lea.vmem %s2221_s6, %s1644_s26 }
  0x22   : > { %s1647_s6 = sshll.u32 %s1973_s28, 5  ;;  %s733_s25 = scalar_lea.vmem %s2194_s14, %s1973_s28 }
  0x23   : > { %s2013_s3 = scalar_lea.vmem %s2222_s10, %s1644_s26  ;;  %s2027_s1 = scalar_lea.vmem %s2192_s12, %s1647_s6 }
  0x24   : > { %s736_s4 = scalar_lea.vmem %s2195_s15, %s1973_s28  ;;  %s1611_s21 = sshll.u32 %s742_s30, 3 }
  0x25   : > { %s2042_s18 = scalar_lea.vmem %s2224_s17, %s1611_s21  ;;  %s2225_s29 = sld [smem:[#allocation3_spill]] }
  0x2b   : > { %p1612_p7 = scmp.ne.s32.totalorder %s2225_s29, 0 }
  0x2c   : > { %v750_v0 = vld [vmem:[%s689_s27] sm:$0xff] (!%p1612_p7)  ;;  %vm753_vm0 = vcmask (!%p1612_p7), 261120   ;;  %s2226_s11 = sld [smem:[#allocation12_spill]] (!%p1612_p7)  ;;  %s2227_s29 = sld [smem:[#allocation13_spill]] (!%p1612_p7) }
  0x2d   : > { %749 = sbr.rel (%p1612_p7) target bundleno = 216 (0xd8), region = 88  ;;  %v754_v1 = vsel (!%p1612_p7), %vm753_vm0, %v750_v0, 0.0  ;;  %v757_v2 = vmul.f32 (!%p1612_p7), %v750_v0, %v750_v0 }
  0x2e   : > { %755 = vadd.xlane.f32.xlu0 (!%p1612_p7), %v754_v1 }
  0x2f   : > { %v758_v3 = vsel (!%p1612_p7), %vm753_vm0, %v757_v2, 0.0 }
  0x32   : > { %759 = vadd.xlane.f32.xlu0 (!%p1612_p7), %v758_v3  ;;  %v1613_v13 = vld [vmem:[%s2226_s11] ss:$0 sm:$0xff] (!%p1612_p7) }
  0x33   : > { %v1614_v15 = vld [vmem:[%s2227_s29] ss:$0 sm:$0xff] (!%p1612_p7) }
  0xbb   : > { %v756_v4 = vpop.xlane.xlu0 %755 }
  0xbc   : > { %v762_v5 = vmul.f32 0.03125, %v756_v4 }
  0xbe   : > { %v764_v7 = vmul.f32 %v762_v5, %v762_v5  ;;  %v766_v11 = vsub.f32 %v750_v0, %v762_v5 }
  0xbf   : > { %v760_v6 = vpop.xlane.xlu0 %759 }
  0xc0   : > { %v763_v8 = vmul.f32 0.03125, %v760_v6 }
  0xc2   : > { %v765_v9 = vsub.f32 %v763_v8, %v764_v7 }
  0xc4   : > { %v767_v10 = vadd.f32 1e-12, %v765_v9 }
  0xc6   : > { %1778 = vrsqrt.f32 %v767_v10 }
  0xd0   : > { %v1779_v12 = vpop.eup %1778 }
  0xd1   : > { %v769_v14 = vmul.f32 %v1779_v12, %v766_v11 }
  0xd3   : > { %v776_v16 = vmul.f32 %v1613_v13, %v769_v14 }
  0xd5   : > { %v783_v17 = vadd.f32 %v1614_v15, %v776_v16 }
  0xd7   : > { %784 = vst.msk [vmem:[#allocation2] sm:$0xff] %vm753_vm0, %v783_v17 }
  0xd8 PF: > { %s2228_s19 = sld [smem:[#allocation9_spill]]  ;;  %v1844_v19 = vmov 0.0   ;;  %vm1845_vm1 = vmmov 0   ;;  %vm811_vm2 = vcmask 261120   ;;  %s2229_s24 = scalar_lea.vmem %s2185_s5, %s1973_s28  ;;  %vm859_vm3 = vcmask 130048   ;;  %v1782_v8 = vld [vmem:[%s1996_s0] sm:$0xff]  }
  0xd9   : > { %1670 = vmatprep.subr.bf16.mxu0 %v1844_v19  ;;  %1678 = vmatprep.subr.bf16.mxu1 %v1844_v19  ;;  %v1615_v23 = vld [vmem:[%s2229_s24] ss:$0 sm:$0xff]  ;;  %s1846_s26 = smov 112   ;;  %s1847_s2 = smov 96   ;;  %vm914_vm4 = vcmask 64512   ;;  %vm932_vm5 = vcmask 1043456  }
  0xda   : > { %1674 = vmatprep.mubr.msk.bf16.mxu0 %vm1845_vm1, %v1844_v19  ;;  %1680 = vmatprep.mubr.msk.bf16.mxu1 %vm1845_vm1, %v1844_v19  ;;  %s1848_s16 = smov 80   ;;  %s2230_s6 = sld [smem:[#allocation11_spill]]  ;;  %v1783_v9 = vld [vmem:[%s1996_s0 + $0x8] sm:$0xff]   ;;  %vm1309_vm6 = vcmask 523264  }
  0xdb   : > { %s1850_s11 = smov 48   ;;  %s1851_s21 = smov 16  }
  0xdc   : > { %s2232_s29 = scalar_lea.vmem %s2187_s7, %s1973_s28  ;;  %s2235_s30 = sld [smem:[#allocation17_spill]] }
  0xde   : > { %v1780_v18 = vld [vmem:[%s2228_s19] sm:$0xff]   ;;  %v1781_v20 = vld [vmem:[%s2228_s19 + $0x8] sm:$0xff]  }
  0xdf   : > { %1671 = vmatpush3.bf16.msra.mxu0 %v1780_v18  ;;  %v2060_v21 = vld [vmem:[#allocation2] sm:$0xff] }
  0xe0   : > { %1672 = vmatprep.subr.bf16.mxu0 %v1844_v19  ;;  %v787_v22 = vpack.c.bf16 %v2060_v21, %v2060_v21  ;;  %s2231_s10 = scalar_lea.vmem %s2230_s6, %s2250_s22  ;;  %s1849_s22 = smov 64  }
  0xe1   : > { %v1620_v36 = vld [vmem:[%s2231_s10] ss:$0 sm:$0xff]  ;;  %s2237_s10 = scalar_lea.vmem %s2193_s13, %s1973_s28 }
  0xe2   : > { %s2236_s17 = scalar_lea.vmem %s2235_s30, %s1973_s28 }
  0xe3   : > { %1673 = vmatpush3.bf16.msra.mxu0 %v1781_v20 }
  0xe4   : > { %1684 = vmatprep.subr.bf16.mxu0 %v1844_v19 }
  0xe6   : > { %1675 = vmatmul.mubr.msk.bf16.vlgmr.msra.gmra.mrb[0].mxu0 %vm811_vm2, %v787_v22 }
  0xe7   : > { %1686 = vmatprep.mubr.msk.bf16.mxu0 %vm1845_vm1, %v1844_v19 }
 0x1b9   : > { %v849_v24 = vpop.f32.mrb[0].mxu0 }
 0x1ba   : > { %v850_v25 = vadd.f32 %v1615_v23, %v849_v24  ;;  %v1676_v26 = vpop.f32.mrb[1].mxu0  ;;  %v1624_v23 = vld [vmem:[%s2232_s29] ss:$0 sm:$0xff] }
 0x1bb   : > { %v852_v27 = vpop.f32.mrb[2].mxu0 }
 0x1bc   : > { %v855_v28 = vpack.c.bf16 %v850_v25, %v850_v25  ;;  %v1677_v29 = vpop.f32.mrb[3].mxu0 }
 0x1be   : > { %976 = vrot.lane.b32.xlu1 %v855_v28, %s1846_s26  ;;  %857 = vrot.lane.b32.xlu0 %v855_v28, %s1847_s2  ;;  %s2234_s26 = scalar_lea.vmem %s2189_s9, %s1973_s28 }
 0x1c2   : > { %978 = vrot.lane.b32.xlu0 %v855_v28, %s1848_s16 }
 0x230   : > { %v858_v30 = vpop.permute.xlu0 %857  ;;  %v977_v34 = vpop.permute.xlu1 %976 }
 0x231   : > { %v864_v31 = vsel %vm859_vm3, %v858_v30, 0 }
 0x232   : > { %1679 = vmatpush3.bf16.xpose.msra.mxu1 %v864_v31 }
 0x233   : > { %1690 = vmatprep.subr.bf16.mxu1 %v1844_v19 }
 0x234   : > { %v979_v32 = vpop.permute.xlu0 %978 }
 0x235   : > { %v984_v33 = vsel %vm859_vm3, %v979_v32, 0 }
 0x239   : > { %1681 = vmatmul.mubr.msk.bf16.vlgmr.msra.gmra.mrb[0].mxu1 %vm859_vm3, %v855_v28 }
 0x23a   : > { %1691 = vmatpush3.bf16.xpose.msra.mxu1 %v984_v33  ;;  %1692 = vmatprep.mubr.msk.bf16.mxu1 %vm1845_vm1, %v1844_v19  ;;  %v1784_v33 = vld [vmem:[%s2013_s3] sm:$0xff]  }
 0x23b   : > { %1702 = vmatprep.subr.bf16.mxu1 %v1844_v19 }
 0x241   : > { %1693 = vmatmul.mubr.msk.bf16.vlgmr.msra.gmra.mrb[4].mxu1 %vm859_vm3, %v977_v34  ;;  %v1785_v34 = vld [vmem:[%s2013_s3 + $0x8] sm:$0xff]   ;;  %s2233_s3 = scalar_lea.vmem %s2188_s8, %s1973_s28 }
 0x242   : > { %1706 = vmatprep.mubr.msk.bf16.mxu1 %vm1845_vm1, %v1844_v19  ;;  %1703 = vmatpush3.bf16.msra.mxu1 %v1782_v8 }
 0x243   : > { %1704 = vmatprep.subr.bf16.mxu1 %v1844_v19 }
 0x246   : > { %1705 = vmatpush3.bf16.msra.mxu1 %v1783_v9 }
 0x247   : > { %1718 = vmatprep.subr.bf16.mxu1 %v1844_v19 }
 0x30c   : > { %v900_v35 = vpop.f32.mrb[0].mxu1 }
 0x30d   : > { %v906_v37 = vmul.f32 0.25, %v900_v35  ;;  %v1682_v38 = vpop.f32.mrb[1].mxu1 }
 0x30e   : > { %v903_v39 = vpop.f32.mrb[2].mxu1 }
 0x30f   : > { %v1683_v40 = vpop.f32.mrb[3].mxu1  ;;  %v913_v41 = vadd.f32 %v1620_v36, %v906_v37 }
 0x311   : > { %v915_v42 = vsel %vm914_vm4, %v913_v41, -inf }
 0x312   : > { %916 = vmax.xlane.f32.xlu1 %v915_v42 }
 0x314   : > { %v1020_v43 = vpop.f32.mrb[4].mxu1 }
 0x315   : > { %v1026_v44 = vmul.f32 0.25, %v1020_v43  ;;  %v1694_v45 = vpop.f32.mrb[5].mxu1  ;;  %v1628_v43 = vld [vmem:[%s2233_s3] ss:$0 sm:$0xff] }
 0x316   : > { %v1023_v46 = vpop.f32.mrb[6].mxu1  ;;  %v1629_v45 = vld [vmem:[%s2234_s26] ss:$0 sm:$0xff] }
 0x317   : > { %v1695_v47 = vpop.f32.mrb[7].mxu1  ;;  %v1027_v48 = vadd.f32 %v1620_v36, %v1026_v44 }
 0x319   : > { %v1028_v49 = vsel %vm914_vm4, %v1027_v48, -inf }
 0x31a   : > { %1029 = vmax.xlane.f32.xlu0 %v1028_v49  ;;  %v1786_v49 = vld [vmem:[%s2027_s1] sm:$0xff]  }
 0x39f   : > { %v917_v50 = vpop.xlane.xlu1 %916 }
 0x3a0   : > { %v918_v51 = vsub.f32 %v913_v41, %v917_v50  ;;  %v1787_v50 = vld [vmem:[%s2027_s1 + $0x8] sm:$0xff]  }
 0x3a2   : > { %v919_v52 = vmul.f32 1.442695, %v918_v51  ;;  %v1788_v51 = vld [vmem:[%s2027_s1 + $0x10] sm:$0xff]  }
 0x3a4   : > { %1790 = vpow2.f32 %v919_v52  ;;  %v1789_v52 = vld [vmem:[%s2027_s1 + $0x18] sm:$0xff]  }
 0x3a7   : > { %v1030_v53 = vpop.xlane.xlu0 %1029 }
 0x3a8   : > { %v1031_v54 = vsub.f32 %v1027_v48, %v1030_v53  ;;  %v1630_v53 = vld [vmem:[%s2236_s17] ss:$0 sm:$0xff] }
 0x3aa   : > { %v1032_v55 = vmul.f32 1.442695, %v1031_v54 }
 0x3ac   : > { %1792 = vpow2.f32 %v1032_v55 }
 0x3ae   : > { %v1791_v56 = vpop.eup %1790 }
 0x3af   : > { %v921_v57 = vsel %vm914_vm4, %v1791_v56, 0.0 }
 0x3b0   : > { %922 = vadd.xlane.f32.xlu0 %v921_v57 }
 0x3b6   : > { %v1793_v58 = vpop.eup %1792 }
 0x3b7   : > { %v1034_v59 = vsel %vm914_vm4, %v1793_v58, 0.0 }
 0x3b8   : > { %1035 = vadd.xlane.f32.xlu1 %v1034_v59 }
 0x3c6   : > { %927 = vrot.lane.b32.xlu0 %v855_v28, %s1849_s22 }
 0x3c9   : > { %1040 = vrot.lane.b32.xlu1 %v855_v28, %s1850_s11 }
 0x43d   : > { %v923_v60 = vpop.xlane.xlu0 %922 }
 0x43e   : > { %1794 = vrcp.f32 %v923_v60 }
 0x441   : > { %v928_v61 = vpop.permute.xlu0 %927 }
 0x442   : > { %v934_v62 = vsel %vm932_vm5, %v928_v61, 0 }
 0x443   : > { %1685 = vmatpush3.bf16.msra.mxu0 %v934_v62 }
 0x444   : > { %1696 = vmatprep.subr.bf16.mxu0 %v1844_v19 }
 0x445   : > { %v1036_v63 = vpop.xlane.xlu1 %1035 }
 0x446   : > { %1796 = vrcp.f32 %v1036_v63 }
 0x448   : > { %v1795_v0 = vpop.eup %1794 }
 0x449   : > { %v925_v1 = vmul.f32 %v1795_v0, %v1791_v56  ;;  %v1041_v2 = vpop.permute.xlu1 %1040 }
 0x44a   : > { %v1046_v4 = vsel %vm932_vm5, %v1041_v2, 0 }
 0x44b   : > { %v926_v3 = vpack.c.bf16 %v925_v1, %v925_v1 }
 0x44d   : > { %1687 = vmatmul.mubr.msk.bf16.vlgmr.msra.gmra.mrb[4].mxu0 %vm914_vm4, %v926_v3 }
 0x44e   : > { %1697 = vmatpush3.bf16.msra.mxu0 %v1046_v4  ;;  %1698 = vmatprep.mubr.msk.bf16.mxu0 %vm1845_vm1, %v1844_v19  ;;  %v1634_v4 = vld [vmem:[%s2237_s10] ss:$0 sm:$0xff] }
 0x44f   : > { %1710 = vmatprep.subr.bf16.mxu0 %v1844_v19 }
 0x450   : > { %v1797_v5 = vpop.eup %1796 }
 0x451   : > { %v1038_v6 = vmul.f32 %v1797_v5, %v1793_v58 }
 0x453   : > { %v1039_v7 = vpack.c.bf16 %v1038_v6, %v1038_v6 }
 0x455   : > { %1699 = vmatmul.mubr.msk.bf16.vlgmr.msra.gmra.mrb[8].mxu0 %vm914_vm4, %v1039_v7 }
 0x456   : > { %1714 = vmatprep.mubr.msk.bf16.mxu0 %vm1845_vm1, %v1844_v19  ;;  %1711 = vmatpush3.bf16.msra.mxu0 %v1784_v33 }
 0x457   : > { %1712 = vmatprep.subr.bf16.mxu0 %v1844_v19 }
 0x45a   : > { %1713 = vmatpush3.bf16.msra.mxu0 %v1785_v34 }
 0x520   : > { %v970_v10 = vpop.f32.mrb[4].mxu0 }
 0x521   : > { %v1688_v11 = vpop.f32.mrb[5].mxu0 }
 0x522   : > { %v973_v12 = vpop.f32.mrb[6].mxu0 }
 0x523   : > { %v1689_v13 = vpop.f32.mrb[7].mxu0 }
 0x528   : > { %v1082_v14 = vpop.f32.mrb[8].mxu0 }
 0x529   : > { %1089 = vrot.lane.b32.xlu1 %v1082_v14, %s1851_s21  ;;  %v1700_v15 = vpop.f32.mrb[9].mxu0 }
 0x52a   : > { %v1085_v16 = vpop.f32.mrb[10].mxu0 }
 0x52b   : > { %v1701_v17 = vpop.f32.mrb[11].mxu0 }
 0x59b   : > { %v1090_v18 = vpop.permute.xlu1 %1089 }
 0x59c   : > { %v1092_v20 = vsel %vm859_vm3, %v970_v10, %v1090_v18 }
 0x59d   : > { %v1093_v22 = vpack.c.bf16 %v1092_v20, %v1092_v20 }
 0x59f   : > { %1707 = vmatmul.mubr.msk.bf16.vlgmr.msra.gmra.mrb[8].mxu1 %vm811_vm2, %v1093_v22 }
 0x5a0   : > { %1726 = vmatprep.mubr.msk.bf16.mxu1 %vm1845_vm1, %v1844_v19  ;;  %1719 = vmatpush3.bf16.msra.mxu1 %v1786_v49 }
 0x5a1   : > { %1720 = vmatprep.subr.bf16.mxu1 %v1844_v19 }
 0x5a4   : > { %1721 = vmatpush3.bf16.msra.mxu1 %v1787_v50 }
 0x5a5   : > { %1722 = vmatprep.subr.bf16.mxu1 %v1844_v19 }
 0x5a8   : > { %1723 = vmatpush3.bf16.msra.mxu1 %v1788_v51 }
 0x5a9   : > { %1724 = vmatprep.subr.bf16.mxu1 %v1844_v19 }
 0x5ac   : > { %1725 = vmatpush3.bf16.msra.mxu1 %v1789_v52 }
 0x672   : > { %v1154_v24 = vpop.f32.mrb[8].mxu1 }
 0x673   : > { %v1155_v25 = vadd.f32 %v1624_v23, %v1154_v24  ;;  %v1708_v26 = vpop.f32.mrb[9].mxu1 }
 0x674   : > { %v1157_v27 = vpop.f32.mrb[10].mxu1 }
 0x675   : > { %v1160_v28 = vadd.f32 %v1155_v25, %v2060_v21  ;;  %v1709_v29 = vpop.f32.mrb[11].mxu1  ;;  %v1640_v25 = vld [vmem:[%s733_s25] ss:$0 sm:$0xff] }
 0x676   : > { %v1641_v27 = vld [vmem:[%s736_s4] ss:$0 sm:$0xff] }
 0x677   : > { %v1163_v30 = vsel %vm811_vm2, %v1160_v28, 0.0  ;;  %v1166_v31 = vmul.f32 %v1160_v28, %v1160_v28 }
 0x678   : > { %1164 = vadd.xlane.f32.xlu0 %v1163_v30 }
 0x679   : > { %v1167_v32 = vsel %vm811_vm2, %v1166_v31, 0.0 }
 0x67a   : > { %1168 = vadd.xlane.f32.xlu1 %v1167_v32 }
 0x705   : > { %v1165_v35 = vpop.xlane.xlu0 %1164 }
 0x706   : > { %v1171_v36 = vmul.f32 0.03125, %v1165_v35 }
 0x707   : > { %v1169_v21 = vpop.xlane.xlu1 %1168 }
 0x708   : > { %v1173_v37 = vmul.f32 %v1171_v36, %v1171_v36  ;;  %v1172_v38 = vmul.f32 0.03125, %v1169_v21  ;;  %v1175_v41 = vsub.f32 %v1160_v28, %v1171_v36 }
 0x70a   : > { %v1174_v39 = vsub.f32 %v1172_v38, %v1173_v37 }
 0x70c   : > { %v1176_v40 = vadd.f32 1e-12, %v1174_v39 }
 0x70e   : > { %1798 = vrsqrt.f32 %v1176_v40 }
 0x718   : > { %v1799_v42 = vpop.eup %1798 }
 0x719   : > { %v1178_v44 = vmul.f32 %v1799_v42, %v1175_v41 }
 0x71b   : > { %v1185_v46 = vmul.f32 %v1628_v43, %v1178_v44 }
 0x71d   : > { %v1192_v47 = vadd.f32 %v1629_v45, %v1185_v46 }
 0x71f   : > { %v1193_v48 = vpack.c.bf16 %v1192_v47, %v1192_v47 }
 0x721   : > { %1715 = vmatmul.mubr.msk.bf16.vlgmr.msra.gmra.mrb[12].mxu0 %vm811_vm2, %v1193_v48 }
 0x7f4   : > { %v1254_v54 = vpop.f32.mrb[12].mxu0 }
 0x7f5   : > { %v1255_v55 = vadd.f32 %v1630_v53, %v1254_v54  ;;  %v1716_v56 = vpop.f32.mrb[13].mxu0 }
 0x7f6   : > { %v1257_v57 = vpop.f32.mrb[14].mxu0 }
 0x7f7   : > { %v1260_v58 = vmul.f32 %v1255_v55, %v1255_v55  ;;  %v1717_v59 = vpop.f32.mrb[15].mxu0 }
 0x7f9   : > { %v1261_v60 = vmul.f32 %v1260_v58, %v1255_v55 }
 0x7fb   : > { %v1262_v61 = vmul.f32 0.044715, %v1261_v60 }
 0x7fd   : > { %v1263_v62 = vadd.f32 %v1262_v61, %v1255_v55 }
 0x7ff   : > { %v1264_v63 = vmul.f32 0.7978846, %v1263_v62 }
 0x801   : > { %1800 = vtanh.f32 %v1264_v63 }
 0x80b   : > { %v1801_v19 = vpop.eup %1800 }
 0x80c   : > { %v1266_v0 = vadd.f32 1.0, %v1801_v19 }
 0x80e   : > { %v1267_v1 = vmul.f32 0.5, %v1266_v0 }
 0x810   : > { %v1268_v2 = vmul.f32 %v1267_v1, %v1255_v55 }
 0x812   : > { %v1269_v3 = vpack.c.bf16 %v1268_v2, %v1268_v2 }
 0x814   : > { %1727 = vmatmul.mubr.msk.bf16.vlgmr.msra.gmra.mrb[12].mxu1 %vm1309_vm6, %v1269_v3 }
 0x8e7   : > { %v1347_v5 = vpop.f32.mrb[12].mxu1 }
 0x8e8   : > { %v1348_v6 = vadd.f32 %v1634_v4, %v1347_v5  ;;  %v1728_v7 = vpop.f32.mrb[13].mxu1 }
 0x8e9   : > { %v1350_v8 = vpop.f32.mrb[14].mxu1 }
 0x8ea   : > { %v1353_v9 = vadd.f32 %v1348_v6, %v1192_v47  ;;  %v1729_v10 = vpop.f32.mrb[15].mxu1 }
 0x8ec   : > { %v1356_v11 = vsel %vm811_vm2, %v1353_v9, 0.0  ;;  %v1359_v12 = vmul.f32 %v1353_v9, %v1353_v9 }
 0x8ed   : > { %1357 = vadd.xlane.f32.xlu0 %v1356_v11 }
 0x8ee   : > { %v1360_v13 = vsel %vm811_vm2, %v1359_v12, 0.0 }
 0x8f1   : > { %1361 = vadd.xlane.f32.xlu0 %v1360_v13 }
 0x97a   : > { %v1358_v14 = vpop.xlane.xlu0 %1357 }
 0x97b   : > { %v1363_v15 = vmul.f32 0.03125, %v1358_v14 }
 0x97d   : > { %v1365_v17 = vmul.f32 %v1363_v15, %v1363_v15  ;;  %v1367_v23 = vsub.f32 %v1353_v9, %v1363_v15 }
 0x97e   : > { %v1362_v16 = vpop.xlane.xlu0 %1361 }
 0x97f   : > { %v1364_v18 = vmul.f32 0.03125, %v1362_v16 }
 0x981   : > { %v1366_v20 = vsub.f32 %v1364_v18, %v1365_v17 }
 0x983   : > { %v1368_v22 = vadd.f32 1e-12, %v1366_v20 }
 0x985   : > { %1802 = vrsqrt.f32 %v1368_v22 }
 0x98f   : > { %v1803_v24 = vpop.eup %1802 }
 0x990   : > { %v1370_v26 = vmul.f32 %v1803_v24, %v1367_v23 }
 0x992   : > { %v1377_v28 = vmul.f32 %v1640_v25, %v1370_v26 }
 0x994   : > { %v1384_v29 = vadd.f32 %v1641_v27, %v1377_v28 }
 0x996   : > { %1385 = vst.msk [vmem:[#allocation2] sm:$0xff] %vm811_vm2, %v1384_v29  ;;  %1386 = vst.msk [vmem:[%s2042_s18] sm:$0xff] %vm811_vm2, %v1384_v29 }
 0x997 PF: > { %s2238_s27 = sld [smem:[#allocation6_spill]]  ;;  %s2239_s21 = sld [smem:[#allocation4_spill]] }
 0x998   : > { %s2240_s22 = sld [smem:[#allocation5_spill]]  ;;  %s2241_s23 = sld [smem:[#allocation7_spill]] }
 0x999   : > { %s2242_s24 = sld [smem:[#allocation8_spill]] }
 0x99d   : > { %s26_s25 = sadd.s32 1, %s2238_s27  }
 0x99e   : > { %p23_p8 = scmp.ge.s32.totalorder %s26_s25, 6  }
 0x9a0   :  { %25 = sbr.rel (!%p23_p8) target bundleno = 10 (0xa), region = 157 }

// kernel: kd_forward.9
= control target key start
LH: loop header
LB: loop body
LE: loop exit
PB: predicated region body
PF: predicated region fallthrough
CT: control target
= control target key end

     0   :  { %11 = vsyncpa [#allocation3], 0  ;;  %v22_v0 = vlaneseq  ;;  %s277_s0 = inlined_call_operand.vmem [shape: f32[2,128], index: 0, kind: input, shape index: {}]   ;;  %s278_s1 = inlined_call_operand.vmem [shape: f32[2,128], index: 1, kind: input, shape index: {}]   ;;  %s279_s2 = inlined_call_operand.vmem [shape: f32[2,128], index: 2, kind: input, shape index: {}]   ;;  %s280_s3 = inlined_call_operand.vmem [shape: f32[1,128], index: 3, kind: output, shape index: {0}]   ;;  %s281_s4 = inlined_call_operand.hbm [shape: f32[1,128], index: 4, kind: output, shape index: {1}]   ;;  %s282_s5 = inlined_call_operand.hbm [shape: f32[1,128], index: 5, kind: output, shape index: {2}]  }
   0x1   :  { %12 = vsyncpa [#allocation5], 0  ;;  %v19_v1 = vld [vmem:[%s277_s0] sm:$0x3]  ;;  %vm27_vm0 = vcmask 1041408   ;;  %s193_s26 = smov [#allocation2]  }
   0x2   :  { %v23_v2 = vand.u32 127, %v22_v0  ;;  %v20_v3 = vld [vmem:[%s278_s1] sm:$0x3]  ;;  %s105_s27 = sshll.u32 %s193_s26, 4  ;;  %s194_s7 = smov [#allocation4]   ;;  %s106_s27 = int_to_ptr.vmem [resolvable:$true] %s105_s27 }
   0x3   :  { %v21_v28 = vld [vmem:[%s279_s2] sm:$0x3]  ;;  %s115_s8 = sshll.u32 %s194_s7, 4  ;;  %s145_s9 = scalar_lea.vmem %s106_s27, 16  ;;  %s116_s8 = int_to_ptr.vmem [resolvable:$true] %s115_s8 }
   0x4   :  { %vm24_vm1 = vcmp.lt.s32.totalorder %v23_v2, 3  ;;  %p146_p0 = scmp.ne.s32.totalorder %s106_s27, %s145_s9  ;;  %s149_s10 = scalar_lea.vmem %s106_s27, 32 }
   0x5   :  { %v25_v4 = vsel %vm24_vm1, %v19_v1, -1e+30  ;;  %v26_v5 = vsel %vm24_vm1, %v20_v3, -1e+30  ;;  %p150_p1 = scmp.lt.s32.totalorder %s106_s27, %s106_s27  ;;  %p151_p2 = scmp.lt.s32.totalorder %s149_s10, %s145_s9 }
   0x6   :  { %v57_v6 = vsel %vm27_vm0, %v25_v4, -inf  ;;  %v28_v7 = vsel %vm27_vm0, %v26_v5, -inf }
   0x7   :  { %58 = vmax.xlane.f32.xlu0 %v57_v6  ;;  %p152_p3 = por %p151_p2, %p150_p1 }
   0x9   :  { %p153_p4 = pnand %p152_p3, %p146_p0 }
   0xb   :  { %29 = vmax.xlane.f32.xlu0 %v28_v7 }
  0x94   :  { %v59_v8 = vpop.xlane.xlu0 %58 }
  0x95   :  { %v60_v9 = vsub.f32 %v25_v4, %v59_v8 }
  0x97   :  { %v61_v10 = vmul.f32 1.442695, %v60_v9 }
  0x98   :  { %v30_v11 = vpop.xlane.xlu0 %29 }
  0x99   :  { %135 = vpow2.f32 %v61_v10  ;;  %v31_v12 = vsub.f32 %v26_v5, %v30_v11 }
  0x9b   :  { %v32_v13 = vmul.f32 1.442695, %v31_v12 }
  0x9d   :  { %137 = vpow2.f32 %v32_v13 }
  0xa3   :  { %v136_v14 = vpop.eup %135 }
  0xa4   :  { %v63_v15 = vsel %vm24_vm1, %v136_v14, 0.0 }
  0xa5   :  { %v64_v16 = vsel %vm27_vm0, %v63_v15, 0.0 }
  0xa6   :  { %65 = vadd.xlane.f32.xlu1 %v64_v16 }
  0xa7   :  { %v138_v17 = vpop.eup %137 }
  0xa8   :  { %v34_v18 = vsel %vm24_vm1, %v138_v17, 0.0 }
  0xa9   :  { %v35_v19 = vsel %vm27_vm0, %v34_v18, 0.0 }
  0xaa   :  { %36 = vadd.xlane.f32.xlu1 %v35_v19 }
 0x133   :  { %v66_v20 = vpop.xlane.xlu1 %65 }
 0x134   :  { %139 = vlog2.f32 %v66_v20 }
 0x137   :  { %v37_v21 = vpop.xlane.xlu1 %36 }
 0x138   :  { %141 = vlog2.f32 %v37_v21 }
 0x13e   :  { %v140_v22 = vpop.eup %139 }
 0x13f   :  { %v68_v23 = vmul.f32 0.6931472, %v140_v22 }
 0x141   :  { %v69_v24 = vsub.f32 %v60_v9, %v68_v23 }
 0x142   :  { %v142_v25 = vpop.eup %141 }
 0x143   :  { %v70_v26 = vmul.f32 1.442695, %v69_v24  ;;  %v39_v27 = vmul.f32 0.6931472, %v142_v25 }
 0x145   :  { %143 = vpow2.f32 %v70_v26  ;;  %v40_v29 = vsub.f32 %v31_v12, %v39_v27 }
 0x147   :  { %v41_v30 = vmul.f32 %v40_v29, %v21_v28  ;;  %v72_v33 = vsub.f32 %v69_v24, %v40_v29 }
 0x149   :  { %v42_v31 = vsel %vm24_vm1, %v41_v30, 0.0 }
 0x14a   :  { %v43_v32 = vsel %vm27_vm0, %v42_v31, 0.0 }
 0x14b   :  { %44 = vadd.xlane.f32.xlu0 %v43_v32 }
 0x14f   :  { %v144_v34 = vpop.eup %143 }
 0x150   :  { %v73_v35 = vmul.f32 %v144_v34, %v72_v33 }
 0x152   :  { %v74_v36 = vsel %vm24_vm1, %v73_v35, 0.0 }
 0x153   :  { %v75_v37 = vsel %vm27_vm0, %v74_v36, 0.0 }
 0x154   :  { %76 = vadd.xlane.f32.xlu1 %v75_v37 }
 0x1d8   :  { %v45_v38 = vpop.xlane.xlu0 %44 }
 0x1d9   :  { %v46_v39 = vrot.slane %v45_v38, 4 }
 0x1db   :  { %v47_v40 = vadd.f32 %v46_v39, %v45_v38 }
 0x1dd   :  { %v48_v41 = vrot.slane %v47_v40, 2 }
 0x1df   :  { %v49_v42 = vadd.f32 %v48_v41, %v47_v40 }
 0x1e1   :  { %v77_v43 = vpop.xlane.xlu1 %76  ;;  %v50_v44 = vrot.slane %v49_v42, 1 }
 0x1e2   :  { %v78_v45 = vrot.slane %v77_v43, 4 }
 0x1e3   :  { %v51_v46 = vadd.f32 %v50_v44, %v49_v42 }
 0x1e4   :  { %v79_v47 = vadd.f32 %v78_v45, %v77_v43 }
 0x1e5   :  { %129 = vpush %v51_v46 }
 0x1e6   :  { %v80_v48 = vrot.slane %v79_v47, 2 }
 0x1e8   :  { %v81_v49 = vadd.f32 %v80_v48, %v79_v47 }
 0x1ea   :  { %v82_v50 = vrot.slane %v81_v49, 1 }
 0x1ec   :  { %v83_v51 = vadd.f32 %v82_v50, %v81_v49 }
 0x1ee   :  { %131 = vpush %v83_v51 }
 0x216   :  { %s130_s2 = spop %129 }
 0x217   :  { %s53_s22 = ssub.f32 0.0, %s130_s2 }
 0x219   :  { %s246_s23 = smul.f32 0.5, %s53_s22 }
 0x21b   :  { %v91_v52 = vstv %s246_s23  ;;  %s88_s6 = smul.f32 0.5, %s246_s23 }
 0x21c   :  { %92 = vst [vmem:[%s280_s3] sm:$0x1] %v91_v52 }
 0x21f   :  { %s132_s28 = spop %131 }
 0x220   :  { %s87_s29 = smul.f32 0.5, %s132_s28 }
 0x222   :  { %s89_s30 = smul.f32 0.5, %s87_s29  ;;  %v93_v53 = vstv %s87_s29 }
 0x223   :  { %94 = vst [vmem:[#allocation2] sm:$0x1] %v93_v53 }
 0x224   :  { %156 = shalt.err (!%p153_p4)
}
 0x225   :  { %s157_s12 = scalar_lea.hbm %s281_s4, 16 }
 0x226   :  { %p158_p5 = scmp.ne.s32.totalorder %s281_s4, %s157_s12  ;;  %p161_p6 = scmp.lt.u32.totalorder %s157_s12, %s281_s4 }
 0x228   :  { %p163_p7 = pnand %p161_p6, %p158_p5 }
 0x22a   :  { %166 = shalt.err (!%p163_p7)
}
 0x22b   :  { %108 = dma.vmem_to_hbm [thread:$0]  %s106_s27, 16, %s281_s4, [#allocation3]  }
 0x22c   :  { %s90_s19 = sadd.f32 %s89_s30, %s88_s6  ;;  %s167_s20 = scalar_lea.vmem %s116_s8, 16 }
 0x22d   :  { %p168_p8 = scmp.ne.s32.totalorder %s116_s8, %s167_s20  ;;  %s171_s21 = scalar_lea.vmem %s116_s8, 32 }
 0x22e   :  { %v95_v54 = vstv %s90_s19  ;;  %p172_p9 = scmp.lt.s32.totalorder %s116_s8, %s116_s8  ;;  %p173_p10 = scmp.lt.s32.totalorder %s171_s21, %s167_s20 }
 0x22f   :  { %96 = vst [vmem:[#allocation4] sm:$0x1] %v95_v54 }
 0x230   :  { %p174_p11 = por %p173_p10, %p172_p9 }
 0x232   :  { %p175_p12 = pnand %p174_p11, %p168_p8 }
 0x234   :  { %178 = shalt.err (!%p175_p12)
}
 0x235   :  { %s179_s2 = scalar_lea.hbm %s282_s5, 16 }
 0x236   :  { %p180_p13 = scmp.ne.s32.totalorder %s282_s5, %s179_s2  ;;  %p183_p0 = scmp.lt.u32.totalorder %s179_s2, %s282_s5 }
 0x238   :  { %p185_p1 = pnand %p183_p0, %p180_p13 }
 0x23a   :  { %188 = shalt.err (!%p185_p1)
}
 0x23b   :  { %118 = dma.vmem_to_hbm [thread:$0]  %s116_s8, 16, %s282_s5, [#allocation5]  }
 0x23c   :  { %189 = dma.done.wait [#allocation3], 16  }
 0x23d   :  { %190 = vsyncadd [#allocation3], 4294967280 }
 0x23e   :  { %191 = dma.done.wait [#allocation5], 16  }
 0x23f   :  { %192 = vsyncadd [#allocation5], 4294967280 }
 0x240   :  { %127 = vsyncpa [#allocation3], 1 }
 0x241   :  { %128 = vsyncpa [#allocation5], 1 }

// kernel: kd_forward.5
= control target key start
LH: loop header
LB: loop body
LE: loop exit
PB: predicated region body
PF: predicated region fallthrough
CT: control target
= control target key end

     0   :  { %s2369_s21 = smov 0   ;;  %s2371_s22 = smov 0   ;;  %s2671_s0 = inlined_call_operand.vmem [shape: f32[2,8,64], index: 0, kind: input, shape index: {}]   ;;  %s2672_s1 = inlined_call_operand.vmem [shape: f32[2,1,8], index: 1, kind: input, shape index: {}]   ;;  %s2673_s2 = inlined_call_operand.vmem [shape: f32[1,64], index: 2, kind: input, shape index: {}]   ;;  %s2674_s3 = inlined_call_operand.vmem [shape: f32[1,64], index: 3, kind: input, shape index: {}]   ;;  %s2675_s4 = inlined_call_operand.vmem [shape: bf16[2,64,192], index: 4, kind: input, shape index: {}]   ;;  %s2676_s5 = inlined_call_operand.vmem [shape: f32[2,1,192], index: 5, kind: input, shape index: {}]   ;;  %s2677_s6 = inlined_call_operand.vmem [shape: bf16[2,64,64], index: 6, kind: input, shape index: {}]   ;;  %s2678_s7 = inlined_call_operand.vmem [shape: f32[2,1,64], index: 7, kind: input, shape index: {}]   ;;  %s2679_s8 = inlined_call_operand.vmem [shape: f32[2,1,64], index: 8, kind: input, shape index: {}]   ;;  %s2680_s9 = inlined_call_operand.vmem [shape: f32[2,1,64], index: 9, kind: input, shape index: {}]   ;;  %s2681_s10 = inlined_call_operand.vmem [shape: bf16[2,64,128], index: 10, kind: input, shape index: {}]   ;;  %s2682_s11 = inlined_call_operand.vmem [shape: f32[2,1,128], index: 11, kind: input, shape index: {}]   ;;  %s2683_s12 = inlined_call_operand.vmem [shape: bf16[2,128,64], index: 12, kind: input, shape index: {}]   ;;  %s2684_s13 = inlined_call_operand.vmem [shape: f32[2,1,64], index: 13, kind: input, shape index: {}]   ;;  %s2685_s14 = inlined_call_operand.vmem [shape: f32[2,1,64], index: 14, kind: input, shape index: {}]   ;;  %s2686_s15 = inlined_call_operand.vmem [shape: f32[2,1,64], index: 15, kind: input, shape index: {}]   ;;  %s2687_s16 = inlined_call_operand.vmem [shape: f32[2,2,8,64], index: 16, kind: output, shape index: {}]  }
   0x1   :  { %2694 = sst [smem:[#allocation12_spill]] %s2671_s0  ;;  %s2373_s23 = smov 0  }
   0x2   :  { %2695 = sst [smem:[#allocation13_spill]] %s2672_s1  ;;  %s2375_s24 = smov 0  }
   0x3   :  { %2696 = sst [smem:[#allocation14_spill]] %s2673_s2  ;;  %s2377_s25 = smov 0  }
   0x4   :  { %2697 = sst [smem:[#allocation15_spill]] %s2674_s3 }
   0x5   :  { %2698 = sst [smem:[#allocation16_spill]] %s2675_s4 }
   0x6   :  { %2699 = sst [smem:[#allocation17_spill]] %s2676_s5 }
   0x7   :  { %2700 = sst [smem:[#allocation18_spill]] %s2677_s6 }
   0x8   :  { %2701 = sst [smem:[#allocation19_spill]] %s2681_s10 }
   0x9   :  { %2702 = sst [smem:[#allocation20_spill]] %s2687_s16 }
   0xa LB: > { %2703 = sst [smem:[#allocation3_spill]] %s2256_s21  ;;  %s35_s26 = sadd.s32 1, %s2264_s23  ;;  %s2272_s25 = sphi %s2377_s25, %s26_s25   ;;  %s2268_s24 = sphi %s2375_s24, %s2735_s24   ;;  %s2264_s23 = sphi %s2373_s23, %s2734_s23   ;;  %s2260_s22 = sphi %s2371_s22, %s2733_s22   ;;  %s2256_s21 = sphi %s2369_s21, %s2732_s21  }
   0xb   : > { %2704 = sst [smem:[#allocation4_spill]] %s2264_s23  ;;  %s38_s27 = sadd.s32 1, %s2268_s24 }
   0xc   : > { %2705 = sst [smem:[#allocation5_spill]] %s2268_s24  ;;  %p36_p0 = scmp.ge.s32.totalorder %s35_s26, 2 }
   0xd   : > { %2706 = sst [smem:[#allocation6_spill]] %s2272_s25  ;;  %p1940_p1 = scmp.ge.s32.totalorder %s2272_s25, 1 }
   0xe   : > { %p588_p2 = scmp.lt.s32.totalorder %s2272_s25, 5  ;;  %s2737_s26 = smov (%p36_p0, %s35_s26), 0 }
   0xf   : > { %2707 = sst [smem:[#allocation7_spill]] %s2737_s26  ;;  %s2739_s27 = smov (!%p36_p0, %s38_s27), %s2268_s24 }
  0x10   : > { %p589_p3 = pnand %p1940_p1, %p588_p2  ;;  %p40_p4 = scmp.ge.s32.totalorder %s2739_s27, 2 }
  0x12   : > { %s2741_s27 = smov (%p40_p4, %s2739_s27), 0  ;;  %592 = sbr.rel (%p589_p3) target bundleno = 2513 (0x9d1), region = 84 }
  0x13   : > { %2708 = sst [smem:[#allocation8_spill]] %s2741_s27 }
  0x19   : > { %p688_p5 = scmp.lt.s32.totalorder %s2260_s22, 1  ;;  %p695_p6 = scmp.lt.s32.totalorder %s2256_s21, 1 }
  0x1a   : > { %s2710_s20 = sld [smem:[#allocation12_spill]]  ;;  %s2711_s4 = sld [smem:[#allocation16_spill]] }
  0x1b   : > { %s2743_s22 = smov (!%p688_p5, %s2260_s22), 1  ;;  %s2713_s5 = sld [smem:[#allocation17_spill]] }
  0x1c   : > { %s2405_s28 = scalar_select %p695_p6, %s2256_s21, 1 }
  0x1d   : > { %s1941_s29 = sshll.u32 %s2743_s22, 3  ;;  %s2715_s6 = sld [smem:[#allocation18_spill]] }
  0x1e   : > { %s2001_s26 = sshll.u32 %s2405_s28, 6  ;;  %s1944_s3 = sshll.u32 %s2405_s28, 1 }
  0x1f   : > { %s2002_s30 = sshll.u32 %s2405_s28, 5  ;;  %s2717_s10 = sld [smem:[#allocation19_spill]] }
  0x20   : > { %s691_s27 = scalar_lea.vmem %s2710_s20, %s1941_s29  ;;  %s2419_s25 = scalar_lea.vmem %s2711_s4, %s2001_s26 }
  0x21   : > { %2712 = sst [smem:[#allocation9_spill]] %s2419_s25  ;;  %s2425_s16 = scalar_lea.vmem %s2713_s5, %s1944_s3 }
  0x22   : > { %2714 = sst [smem:[#allocation10_spill]] %s2425_s16  ;;  %s2457_s19 = scalar_lea.vmem %s2683_s12, %s2001_s26 }
  0x23   : > { %s2431_s18 = scalar_lea.vmem %s2715_s6, %s2002_s30  ;;  %s733_s24 = scalar_lea.vmem %s2684_s13, %s2405_s28 }
  0x24   : > { %2716 = sst [smem:[#allocation11_spill]] %s2431_s18  ;;  %s736_s2 = scalar_lea.vmem %s2685_s14, %s2405_s28 }
  0x25   : > { %s2448_s16 = scalar_lea.vmem %s2717_s10, %s2002_s30  ;;  %s739_s21 = scalar_lea.vmem %s2686_s15, %s2405_s28 }
  0x26   : > { %s745_s20 = sadd.s32 %s1944_s3, %s2743_s22  ;;  %s2718_s10 = sld [smem:[#allocation20_spill]] }
  0x27   : > { %s1952_s17 = sshll.u32 %s745_s20, 3  ;;  %s2719_s26 = sld [smem:[#allocation3_spill]] }
  0x2c   : > { %s2475_s18 = scalar_lea.vmem %s2718_s10, %s1952_s17 }
  0x2d   : > { %p1953_p7 = scmp.ne.s32.totalorder %s2719_s26, 0 }
  0x2e   : > { %v753_v0 = vld [vmem:[%s691_s27] sm:$0xff] (!%p1953_p7)  ;;  %vm756_vm0 = vcmask (!%p1953_p7), 523264   ;;  %s2720_s10 = sld [smem:[#allocation14_spill]] (!%p1953_p7)  ;;  %s2721_s29 = sld [smem:[#allocation15_spill]] (!%p1953_p7) }
  0x2f   : > { %752 = sbr.rel (%p1953_p7) target bundleno = 218 (0xda), region = 88  ;;  %v757_v1 = vsel (!%p1953_p7), %vm756_vm0, %v753_v0, 0.0  ;;  %v760_v2 = vmul.f32 (!%p1953_p7), %v753_v0, %v753_v0 }
  0x30   : > { %758 = vadd.xlane.f32.xlu0 (!%p1953_p7), %v757_v1 }
  0x31   : > { %v761_v3 = vsel (!%p1953_p7), %vm756_vm0, %v760_v2, 0.0 }
  0x34   : > { %762 = vadd.xlane.f32.xlu0 (!%p1953_p7), %v761_v3  ;;  %v1954_v13 = vld [vmem:[%s2720_s10] ss:$0 sm:$0xff] (!%p1953_p7) }
  0x35   : > { %v1955_v15 = vld [vmem:[%s2721_s29] ss:$0 sm:$0xff] (!%p1953_p7) }
  0xbd   : > { %v759_v4 = vpop.xlane.xlu0 %758 }
  0xbe   : > { %v765_v5 = vmul.f32 0.015625, %v759_v4 }
  0xc0   : > { %v767_v7 = vmul.f32 %v765_v5, %v765_v5  ;;  %v769_v11 = vsub.f32 %v753_v0, %v765_v5 }
  0xc1   : > { %v763_v6 = vpop.xlane.xlu0 %762 }
  0xc2   : > { %v766_v8 = vmul.f32 0.015625, %v763_v6 }
  0xc4   : > { %v768_v9 = vsub.f32 %v766_v8, %v767_v7 }
  0xc6   : > { %v770_v10 = vadd.f32 1e-12, %v768_v9 }
  0xc8   : > { %2182 = vrsqrt.f32 %v770_v10 }
  0xd2   : > { %v2183_v12 = vpop.eup %2182 }
  0xd3   : > { %v772_v14 = vmul.f32 %v2183_v12, %v769_v11 }
  0xd5   : > { %v779_v16 = vmul.f32 %v1954_v13, %v772_v14 }
  0xd7   : > { %v786_v17 = vadd.f32 %v1955_v15, %v779_v16 }
  0xd9   : > { %787 = vst.msk [vmem:[#allocation2] sm:$0xff] %vm756_vm0, %v786_v17 }
  0xda PF: > { %s2722_s1 = sld [smem:[#allocation9_spill]]  ;;  %v2274_v20 = vmov 0   ;;  %s2723_s23 = sld [smem:[#allocation10_spill]]  ;;  %vm851_vm1 = vcmask 523264   ;;  %v801_v29 = vlaneseq  ;;  %v2275_v31 = vmov 0.0  }
  0xdb   : > { %887 = vmatprep.mubr.bf16.mxu1 %v2274_v20  ;;  %2052 = vmatprep.subr.bf16.mxu0 %v2275_v31  ;;  %vm2276_vm2 = vmmov 0   ;;  %s2277_s4 = smov 112   ;;  %s2278_s25 = smov 64   ;;  %vm901_vm3 = vcmask 130048   ;;  %vm972_vm4 = vcmask 1043456   ;;  %vm956_vm5 = vcmask 64512  }
  0xdc   : > { %v802_v30 = vshrl.u32 %v801_v29, 7  ;;  %2054 = vmatprep.mubr.msk.bf16.mxu0 %vm2276_vm2, %v2275_v31  ;;  %s2279_s5 = smov 32   ;;  %s2280_s30 = smov 48   ;;  %vm1366_vm6 = vcmask 261120   ;;  %vm1368_vm7 = vcmask 392192  }
  0xdd   : > { %s2281_s17 = smov 16   ;;  %s2282_s0 = smov 96  }
  0xde   : > { %v803_v32 = vsub.s32 0, %v802_v30  ;;  %s2283_s26 = smov 80   ;;  %v807_v41 = vsub.s32 1, %v802_v30  ;;  %s2724_s10 = sld [smem:[#allocation13_spill]] }
  0xe0   : > { %v2184_v18 = vld [vmem:[%s2722_s1 + $0x4] ss:$8 sps:$4 sm:$0xff]   ;;  %v2186_v19 = vld [vmem:[%s2722_s1] ss:$8 sps:$4 sm:$0xff]   ;;  %v2187_v21 = vld [vmem:[%s2722_s1 + $0x14] ss:$8 sps:$4 sm:$0xff]  }
  0xe1   : > { %855 = vmatprep.subr.bf16.mxu1 %v2184_v18  ;;  %v2189_v22 = vld [vmem:[%s2722_s1 + $0x10] ss:$8 sps:$4 sm:$0xff]   ;;  %v2190_v23 = vld [vmem:[%s2722_s1 + $0x24] ss:$8 sps:$4 sm:$0xff]   ;;  %v2192_v24 = vld [vmem:[%s2722_s1 + $0x20] ss:$8 sps:$4 sm:$0xff]  }
  0xe2   : > { %856 = vmatpush1.bf16.msra.mxu1 %v2186_v19  ;;  %v2193_v25 = vld [vmem:[%s2722_s1 + $0x34] ss:$8 sps:$4 sm:$0xff]   ;;  %v2195_v26 = vld [vmem:[%s2722_s1 + $0x30] ss:$8 sps:$4 sm:$0xff]   ;;  %v2495_v27 = vld [vmem:[#allocation2] sm:$0xff]  ;;  %s2727_s1 = scalar_lea.vmem %s2678_s7, %s2405_s28 }
  0xe3   : > { %857 = vmatprep.subr.bf16.mxu1 %v2187_v21  ;;  %v790_v28 = vpack.c.bf16 %v2495_v27, %v2495_v27  ;;  %v799_v33 = vld [vmem:[%s2723_s23] sm:$0x3] }
  0xe4   : > { %v804_v34 = vrot.slane %v799_v33, %v803_v32  ;;  %v808_v42 = vrot.slane %v799_v33, %v807_v41  ;;  %s2725_s27 = scalar_lea.vmem %s2724_s10, %s2743_s22  ;;  %s2726_s22 = sld [smem:[#allocation11_spill]] }
  0xe5   : > { %v1966_v58 = vld [vmem:[%s2725_s27] ss:$0 sm:$0xff] }
  0xe6   : > { %858 = vmatpush1.bf16.msra.mxu1 %v2189_v22 }
  0xe7   : > { %859 = vmatprep.subr.bf16.mxu1 %v2190_v23 }
  0xea   : > { %860 = vmatpush1.bf16.msra.mxu1 %v2192_v24 }
  0xeb   : > { %861 = vmatprep.subr.bf16.mxu1 %v2193_v25 }
  0xee   : > { %862 = vmatpush1.bf16.msra.mxu1 %v2195_v26 }
  0xef   : > { %2040 = vmatprep.subr.bf16.mxu1 %v2275_v31 }
  0xf1   : > { %1964 = vmatmul.mubr.msk.bf16.vlgmr.msra.gmra.mrb[0].mxu1 %vm851_vm1, %v790_v28 }
  0xf2   : > { %2042 = vmatprep.mubr.msk.bf16.mxu1 %vm2276_vm2, %v2275_v31 }
 0x1c4   : > { %v889_v35 = vpop.f32.mrb[0].mxu1 }
 0x1c5   : > { %v890_v36 = vadd.f32 %v889_v35, %v804_v34  ;;  %v891_v37 = vpop.f32.mrb[1].mxu1 }
 0x1c6   : > { %v893_v38 = vpop.f32.mrb[2].mxu1  ;;  %v892_v44 = vadd.f32 %v891_v37, %v808_v42 }
 0x1c7   : > { %v896_v39 = vpack.c.bf16 %v890_v36, %v890_v36  ;;  %v894_v40 = vpop.f32.mrb[3].mxu1 }
 0x1c8   : > { %v2515_v48 = vpack.c.bf16 %v892_v44, %v892_v44 }
 0x1c9   : > { %1016 = vrot.lane.b32.xlu1 %v896_v39, %s2277_s4  ;;  %899 = vrot.lane.b32.xlu0 %v896_v39, %s2278_s25 }
 0x1ca   : > { %v974_v50 = vsel %vm972_vm4, %v2515_v48, 0 }
 0x1cd   : > { %1131 = vrot.lane.b32.xlu1 %v896_v39, %s2279_s5  ;;  %1018 = vrot.lane.b32.xlu0 %v896_v39, %s2280_s30 }
 0x1d1   : > { %1243 = vrot.lane.b32.xlu1 %v896_v39, %s2281_s17  ;;  %1129 = vrot.lane.b32.xlu0 %v896_v39, %s2282_s0 }
 0x1d5   : > { %1241 = vrot.lane.b32.xlu0 %v896_v39, %s2283_s26 }
 0x23b   : > { %v900_v43 = vpop.permute.xlu0 %899  ;;  %v1017_v46 = vpop.permute.xlu1 %1016 }
 0x23c   : > { %v906_v45 = vsel %vm901_vm3, %v900_v43, 0 }
 0x23d   : > { %2041 = vmatpush3.bf16.xpose.msra.mxu1 %v906_v45 }
 0x23e   : > { %2046 = vmatprep.subr.bf16.mxu1 %v2275_v31 }
 0x23f   : > { %v1019_v47 = vpop.permute.xlu0 %1018  ;;  %v1132_v51 = vpop.permute.xlu1 %1131 }
 0x240   : > { %v1024_v49 = vsel %vm901_vm3, %v1019_v47, 0  ;;  %v1137_v52 = vsel %vm901_vm3, %v1132_v51, 0 }
 0x241   : > { %2053 = vmatpush3.bf16.xpose.msra.mxu0 %v1024_v49 }
 0x242   : > { %2064 = vmatprep.subr.bf16.mxu0 %v2275_v31 }
 0x243   : > { %v1244_v53 = vpop.permute.xlu1 %1243  ;;  %v1130_v54 = vpop.permute.xlu0 %1129 }
 0x244   : > { %2043 = vmatmul.mubr.msk.bf16.vlgmr.msra.gmra.mrb[4].mxu1 %vm901_vm3, %v896_v39  ;;  %v1249_v55 = vsel %vm901_vm3, %v1244_v53, 0 }
 0x245   : > { %2047 = vmatpush3.bf16.msra.mxu1 %v974_v50  ;;  %2048 = vmatprep.mubr.msk.bf16.mxu1 %vm2276_vm2, %v2275_v31 }
 0x246   : > { %2058 = vmatprep.subr.bf16.mxu1 %v2275_v31 }
 0x247   : > { %v1242_v56 = vpop.permute.xlu0 %1241 }
 0x248   : > { %2055 = vmatmul.mubr.msk.bf16.vlgmr.msra.gmra.mrb[0].mxu0 %vm901_vm3, %v1017_v46 }
 0x249   : > { %2065 = vmatpush3.bf16.xpose.msra.mxu0 %v1137_v52  ;;  %2066 = vmatprep.mubr.msk.bf16.mxu0 %vm2276_vm2, %v2275_v31 }
 0x24a   : > { %2076 = vmatprep.subr.bf16.mxu0 %v2275_v31 }
 0x250   : > { %2067 = vmatmul.mubr.msk.bf16.vlgmr.msra.gmra.mrb[4].mxu0 %vm901_vm3, %v1130_v54 }
 0x251   : > { %2077 = vmatpush3.bf16.xpose.msra.mxu0 %v1249_v55  ;;  %2078 = vmatprep.mubr.msk.bf16.mxu0 %vm2276_vm2, %v2275_v31 }
 0x252   : > { %2088 = vmatprep.subr.bf16.mxu0 %v2275_v31 }
 0x258   : > { %2079 = vmatmul.mubr.msk.bf16.vlgmr.msra.gmra.mrb[8].mxu0 %vm901_vm3, %v1242_v56 }
 0x259   : > { %2096 = vmatprep.mubr.msk.bf16.mxu0 %vm2276_vm2, %v2275_v31 }
 0x317   : > { %v942_v57 = vpop.f32.mrb[4].mxu1 }
 0x318   : > { %v948_v59 = vmul.f32 0.25, %v942_v57  ;;  %v2044_v60 = vpop.f32.mrb[5].mxu1 }
 0x319   : > { %v945_v61 = vpop.f32.mrb[6].mxu1 }
 0x31a   : > { %v2045_v62 = vpop.f32.mrb[7].mxu1  ;;  %v955_v63 = vadd.f32 %v1966_v58, %v948_v59 }
 0x31b   : > { %v1060_v0 = vpop.f32.mrb[0].mxu0 }
 0x31c   : > { %v1066_v1 = vmul.f32 0.25, %v1060_v0  ;;  %v2056_v2 = vpop.f32.mrb[1].mxu0  ;;  %v957_v3 = vsel %vm956_vm5, %v955_v63, -inf }
 0x31d   : > { %958 = vmax.xlane.f32.xlu1 %v957_v3  ;;  %v1063_v4 = vpop.f32.mrb[2].mxu0 }
 0x31e   : > { %v2057_v5 = vpop.f32.mrb[3].mxu0  ;;  %v1067_v6 = vadd.f32 %v1966_v58, %v1066_v1 }
 0x320   : > { %v1068_v7 = vsel %vm956_vm5, %v1067_v6, -inf }
 0x321   : > { %1069 = vmax.xlane.f32.xlu0 %v1068_v7  ;;  %v2197_v7 = vld [vmem:[%s2726_s22 + $0x8] sm:$0xff]  }
 0x323   : > { %v1173_v8 = vpop.f32.mrb[4].mxu0 }
 0x324   : > { %v1179_v9 = vmul.f32 0.25, %v1173_v8  ;;  %v2068_v10 = vpop.f32.mrb[5].mxu0 }
 0x325   : > { %v1176_v11 = vpop.f32.mrb[6].mxu0 }
 0x326   : > { %v2069_v12 = vpop.f32.mrb[7].mxu0  ;;  %v1180_v13 = vadd.f32 %v1966_v58, %v1179_v9  ;;  %v2198_v11 = vld [vmem:[%s2726_s22 + $0x10] sm:$0xff]  }
 0x328   : > { %v1181_v14 = vsel %vm956_vm5, %v1180_v13, -inf }
 0x329   : > { %1182 = vmax.xlane.f32.xlu0 %v1181_v14 }
 0x32b   : > { %v1285_v15 = vpop.f32.mrb[8].mxu0 }
 0x32c   : > { %v1291_v16 = vmul.f32 0.25, %v1285_v15  ;;  %v2080_v17 = vpop.f32.mrb[9].mxu0 }
 0x32d   : > { %v1288_v18 = vpop.f32.mrb[10].mxu0  ;;  %v2199_v17 = vld [vmem:[%s2726_s22 + $0x18] sm:$0xff]  }
 0x32e   : > { %v2081_v19 = vpop.f32.mrb[11].mxu0  ;;  %v1292_v20 = vadd.f32 %v1966_v58, %v1291_v16 }
 0x330   : > { %v1293_v21 = vsel %vm956_vm5, %v1292_v20, -inf }
 0x331   : > { %1294 = vmax.xlane.f32.xlu1 %v1293_v21 }
 0x3aa   : > { %v959_v22 = vpop.xlane.xlu1 %958 }
 0x3ab   : > { %v960_v23 = vsub.f32 %v955_v63, %v959_v22 }
 0x3ad   : > { %v961_v24 = vmul.f32 1.442695, %v960_v23 }
 0x3ae   : > { %v1070_v25 = vpop.xlane.xlu0 %1069 }
 0x3af   : > { %2212 = vpow2.f32 %v961_v24  ;;  %v1071_v26 = vsub.f32 %v1067_v6, %v1070_v25  ;;  %v2196_v6 = vld [vmem:[%s2726_s22] sm:$0xff]  }
 0x3b0   : > { %2089 = vmatpush3.bf16.msra.mxu0 %v2196_v6 }
 0x3b1   : > { %v1072_v28 = vmul.f32 1.442695, %v1071_v26  ;;  %2090 = vmatprep.subr.bf16.mxu0 %v2275_v31 }
 0x3b3   : > { %2214 = vpow2.f32 %v1072_v28 }
 0x3b4   : > { %2091 = vmatpush3.bf16.msra.mxu0 %v2197_v7 }
 0x3b5   : > { %2092 = vmatprep.subr.bf16.mxu0 %v2275_v31 }
 0x3b6   : > { %v1183_v29 = vpop.xlane.xlu0 %1182 }
 0x3b7   : > { %v1184_v30 = vsub.f32 %v1180_v13, %v1183_v29 }
 0x3b8   : > { %2093 = vmatpush3.bf16.msra.mxu0 %v2198_v11 }
 0x3b9   : > { %v2213_v32 = vpop.eup %2212  ;;  %v1185_v33 = vmul.f32 1.442695, %v1184_v30  ;;  %2094 = vmatprep.subr.bf16.mxu0 %v2275_v31  ;;  %v1974_v30 = vld [vmem:[%s2727_s1] ss:$0 sm:$0xff] }
 0x3ba   : > { %v963_v34 = vsel %vm956_vm5, %v2213_v32, 0.0 }
 0x3bb   : > { %2216 = vpow2.f32 %v1185_v33  ;;  %964 = vadd.xlane.f32.xlu0 %v963_v34 }
 0x3bc   : > { %2095 = vmatpush3.bf16.msra.mxu0 %v2199_v17 }
 0x3bd   : > { %v2215_v35 = vpop.eup %2214  ;;  %2112 = vmatprep.subr.bf16.mxu0 %v2275_v31 }
 0x3be   : > { %v1074_v36 = vsel %vm956_vm5, %v2215_v35, 0.0  ;;  %v1295_v39 = vpop.xlane.xlu1 %1294 }
 0x3bf   : > { %1075 = vadd.xlane.f32.xlu1 %v1074_v36  ;;  %v1296_v40 = vsub.f32 %v1292_v20, %v1295_v39 }
 0x3c1   : > { %v1297_v41 = vmul.f32 1.442695, %v1296_v40 }
 0x3c3   : > { %2218 = vpow2.f32 %v1297_v41  ;;  %v2200_v41 = vld [vmem:[%s2448_s16] sm:$0xff]  }
 0x3c5   : > { %v2217_v37 = vpop.eup %2216 }
 0x3c6   : > { %v1187_v38 = vsel %vm956_vm5, %v2217_v37, 0.0 }
 0x3c7   : > { %1188 = vadd.xlane.f32.xlu0 %v1187_v38 }
 0x3cd   : > { %v2219_v42 = vpop.eup %2218 }
 0x3ce   : > { %v1299_v43 = vsel %vm956_vm5, %v2219_v42, 0.0 }
 0x3d0   : > { %1193 = vrot.lane.b32.xlu1 %v2515_v48, %s2282_s0 }
 0x3dd   : > { %1081 = vrot.lane.b32.xlu0 %v2515_v48, %s2277_s4 }
 0x3f4   : > { %1300 = vadd.xlane.f32.xlu1 %v1299_v43  ;;  %v2202_v43 = vld [vmem:[%s2448_s16 + $0x10] sm:$0xff]  }
 0x405   : > { %1305 = vrot.lane.b32.xlu1 %v2515_v48, %s2283_s26  ;;  %s2730_s26 = scalar_lea.vmem %s2682_s11, %s2405_s28 }
 0x448   : > { %v965_v44 = vpop.xlane.xlu0 %964 }
 0x449   : > { %2220 = vrcp.f32 %v965_v44 }
 0x44c   : > { %v1076_v45 = vpop.xlane.xlu1 %1075 }
 0x44d   : > { %2222 = vrcp.f32 %v1076_v45 }
 0x450   : > { %v1194_v48 = vpop.permute.xlu1 %1193 }
 0x451   : > { %v1199_v57 = vsel %vm972_vm4, %v1194_v48, 0 }
 0x453   : > { %v2221_v46 = vpop.eup %2220 }
 0x454   : > { %v967_v47 = vmul.f32 %v2221_v46, %v2213_v32  ;;  %v1189_v49 = vpop.xlane.xlu0 %1188 }
 0x455   : > { %2224 = vrcp.f32 %v1189_v49 }
 0x456   : > { %v968_v50 = vpack.c.bf16 %v967_v47, %v967_v47 }
 0x457   : > { %v2223_v51 = vpop.eup %2222 }
 0x458   : > { %2049 = vmatmul.mubr.msk.bf16.vlgmr.msra.gmra.mrb[8].mxu1 %vm956_vm5, %v968_v50  ;;  %v1082_v52 = vpop.permute.xlu0 %1081  ;;  %v1078_v54 = vmul.f32 %v2223_v51, %v2215_v35 }
 0x459   : > { %v1087_v53 = vsel %vm972_vm4, %v1082_v52, 0  ;;  %2060 = vmatprep.mubr.msk.bf16.mxu1 %vm2276_vm2, %v2275_v31 }
 0x45a   : > { %2059 = vmatpush3.bf16.msra.mxu1 %v1087_v53  ;;  %v1079_v55 = vpack.c.bf16 %v1078_v54, %v1078_v54 }
 0x45b   : > { %2070 = vmatprep.subr.bf16.mxu1 %v2275_v31 }
 0x45f   : > { %v2225_v56 = vpop.eup %2224 }
 0x460   : > { %2061 = vmatmul.mubr.msk.bf16.vlgmr.msra.gmra.mrb[12].mxu1 %vm956_vm5, %v1079_v55  ;;  %v1191_v58 = vmul.f32 %v2225_v56, %v2217_v37 }
 0x461   : > { %2071 = vmatpush3.bf16.msra.mxu1 %v1199_v57  ;;  %2072 = vmatprep.mubr.msk.bf16.mxu1 %vm2276_vm2, %v2275_v31 }
 0x462   : > { %2082 = vmatprep.subr.bf16.mxu1 %v2275_v31  ;;  %v1192_v59 = vpack.c.bf16 %v1191_v58, %v1191_v58 }
 0x468   : > { %2073 = vmatmul.mubr.msk.bf16.vlgmr.msra.gmra.mrb[16].mxu1 %vm956_vm5, %v1192_v59  ;;  %v2204_v59 = vld [vmem:[%s2457_s19] sm:$0xff]  }
 0x469   : > { %2084 = vmatprep.mubr.msk.bf16.mxu1 %vm2276_vm2, %v2275_v31 }
 0x481   : > { %v1301_v60 = vpop.xlane.xlu1 %1300 }
 0x482   : > { %2226 = vrcp.f32 %v1301_v60  ;;  %v2205_v60 = vld [vmem:[%s2457_s19 + $0x8] sm:$0xff]  }
 0x485   : > { %v1306_v61 = vpop.permute.xlu1 %1305 }
 0x486   : > { %v1311_v62 = vsel %vm972_vm4, %v1306_v61, 0  ;;  %v2206_v61 = vld [vmem:[%s2457_s19 + $0x10] sm:$0xff]  }
 0x487   : > { %2083 = vmatpush3.bf16.msra.mxu1 %v1311_v62  ;;  %v2207_v62 = vld [vmem:[%s2457_s19 + $0x18] sm:$0xff]  }
 0x488   : > { %2100 = vmatprep.subr.bf16.mxu1 %v2275_v31 }
 0x48c   : > { %v2227_v63 = vpop.eup %2226 }
 0x48d   : > { %v1303_v0 = vmul.f32 %v2227_v63, %v2219_v42  ;;  %v2201_v42 = vld [vmem:[%s2448_s16 + $0x8] sm:$0xff]   ;;  %v2208_v63 = vld [vmem:[%s2457_s19 + $0x20] sm:$0xff]  }
 0x48f   : > { %v1304_v1 = vpack.c.bf16 %v1303_v0, %v1303_v0  ;;  %v2209_v0 = vld [vmem:[%s2457_s19 + $0x28] sm:$0xff]  }
 0x491   : > { %2085 = vmatmul.mubr.msk.bf16.vlgmr.msra.gmra.mrb[20].mxu1 %vm956_vm5, %v1304_v1  ;;  %v2210_v1 = vld [vmem:[%s2457_s19 + $0x30] sm:$0xff]  }
 0x492   : > { %2108 = vmatprep.mubr.msk.bf16.mxu1 %vm2276_vm2, %v2275_v31  ;;  %2101 = vmatpush3.bf16.msra.mxu1 %v2200_v41  ;;  %v1998_v41 = vld [vmem:[%s739_s21] ss:$0 sm:$0xff] }
 0x493   : > { %2102 = vmatprep.subr.bf16.mxu1 %v2275_v31 }
 0x496   : > { %2103 = vmatpush3.bf16.msra.mxu1 %v2201_v42 }
 0x497   : > { %2104 = vmatprep.subr.bf16.mxu1 %v2275_v31 }
 0x49a   : > { %2105 = vmatpush3.bf16.msra.mxu1 %v2202_v43 }
 0x49b   : > { %2106 = vmatprep.subr.bf16.mxu1 %v2275_v31 }
 0x52b   : > { %v1010_v2 = vpop.f32.mrb[8].mxu1 }
 0x52c   : > { %v2050_v3 = vpop.f32.mrb[9].mxu1 }
 0x52d   : > { %v1013_v4 = vpop.f32.mrb[10].mxu1  ;;  %v1982_v3 = vld [vmem:[%s2730_s26] ss:$0 sm:$0xff] }
 0x52e   : > { %v2051_v5 = vpop.f32.mrb[11].mxu1 }
 0x533   : > { %v1123_v8 = vpop.f32.mrb[12].mxu1 }
 0x534   : > { %1354 = vrot.lane.b32.xlu0 %v1123_v8, %s2281_s17  ;;  %v2062_v9 = vpop.f32.mrb[13].mxu1 }
 0x535   : > { %v1126_v10 = vpop.f32.mrb[14].mxu1 }
 0x536   : > { %v2063_v12 = vpop.f32.mrb[15].mxu1 }
 0x53b   : > { %v1235_v13 = vpop.f32.mrb[16].mxu1 }
 0x53c   : > { %1358 = vrot.lane.b32.xlu1 %v1235_v13, %s2279_s5  ;;  %v2074_v14 = vpop.f32.mrb[17].mxu1 }
 0x53d   : > { %v1238_v15 = vpop.f32.mrb[18].mxu1 }
 0x53e   : > { %v2075_v16 = vpop.f32.mrb[19].mxu1 }
 0x564   : > { %v1347_v18 = vpop.f32.mrb[20].mxu1 }
 0x565   : > { %1362 = vrot.lane.b32.xlu0 %v1347_v18, %s2280_s30  ;;  %v2086_v19 = vpop.f32.mrb[21].mxu1  ;;  %s2729_s30 = scalar_lea.vmem %s2680_s9, %s2405_s28  ;;  %v1988_v18 = vld [vmem:[%s733_s24] ss:$0 sm:$0xff] }
 0x566   : > { %v1350_v20 = vpop.f32.mrb[22].mxu1  ;;  %v1981_v55 = vld [vmem:[%s2729_s30] ss:$0 sm:$0xff] }
 0x567   : > { %v2087_v21 = vpop.f32.mrb[23].mxu1 }
 0x5a6   : > { %v1355_v22 = vpop.permute.xlu0 %1354 }
 0x5a7   : > { %v1365_v24 = vsel %vm901_vm3, %v1010_v2, %v1355_v22  ;;  %v2211_v2 = vld [vmem:[%s2457_s19 + $0x38] sm:$0xff]  }
 0x5ae   : > { %v1359_v23 = vpop.permute.xlu1 %1358 }
 0x5af   : > { %v1367_v25 = vsel %vm1366_vm6, %v1365_v24, %v1359_v23 }
 0x5d7   : > { %v1363_v26 = vpop.permute.xlu0 %1362 }
 0x5d8   : > { %v1369_v28 = vsel %vm1368_vm7, %v1367_v25, %v1363_v26 }
 0x5d9   : > { %v1370_v29 = vpack.c.bf16 %v1369_v28, %v1369_v28 }
 0x5db   : > { %2097 = vmatmul.mubr.msk.bf16.vlgmr.msra.gmra.mrb[12].mxu0 %vm851_vm1, %v1370_v29 }
 0x5dc   : > { %2128 = vmatprep.mubr.msk.bf16.mxu0 %vm2276_vm2, %v2275_v31  ;;  %2113 = vmatpush3.bf16.msra.mxu0 %v2204_v59 }
 0x5dd   : > { %2114 = vmatprep.subr.bf16.mxu0 %v2275_v31 }
 0x5e0   : > { %2115 = vmatpush3.bf16.msra.mxu0 %v2205_v60 }
 0x5e1   : > { %2116 = vmatprep.subr.bf16.mxu0 %v2275_v31 }
 0x5e4   : > { %2117 = vmatpush3.bf16.msra.mxu0 %v2206_v61 }
 0x5e5   : > { %2118 = vmatprep.subr.bf16.mxu0 %v2275_v31 }
 0x5e8   : > { %2119 = vmatpush3.bf16.msra.mxu0 %v2207_v62 }
 0x5e9   : > { %2120 = vmatprep.subr.bf16.mxu0 %v2275_v31 }
 0x5ec   : > { %2121 = vmatpush3.bf16.msra.mxu0 %v2208_v63 }
 0x5ed   : > { %2122 = vmatprep.subr.bf16.mxu0 %v2275_v31 }
 0x5f0   : > { %2123 = vmatpush3.bf16.msra.mxu0 %v2209_v0 }
 0x5f1   : > { %2124 = vmatprep.subr.bf16.mxu0 %v2275_v31 }
 0x5f4   : > { %2125 = vmatpush3.bf16.msra.mxu0 %v2210_v1 }
 0x5f5   : > { %2126 = vmatprep.subr.bf16.mxu0 %v2275_v31 }
 0x5f8   : > { %2127 = vmatpush3.bf16.msra.mxu0 %v2211_v2 }
 0x6ae   : > { %v1447_v32 = vpop.f32.mrb[12].mxu0 }
 0x6af   : > { %v1448_v33 = vadd.f32 %v1974_v30, %v1447_v32  ;;  %v2098_v34 = vpop.f32.mrb[13].mxu0 }
 0x6b0   : > { %v1450_v35 = vpop.f32.mrb[14].mxu0 }
 0x6b1   : > { %v1453_v36 = vadd.f32 %v1448_v33, %v2495_v27  ;;  %v2099_v37 = vpop.f32.mrb[15].mxu0  ;;  %v2203_v27 = vld [vmem:[%s2448_s16 + $0x18] sm:$0xff]   ;;  %s2728_s16 = scalar_lea.vmem %s2679_s8, %s2405_s28 }
 0x6b2   : > { %2107 = vmatpush3.bf16.msra.mxu1 %v2203_v27  ;;  %v1980_v54 = vld [vmem:[%s2728_s16] ss:$0 sm:$0xff] }
 0x6b3   : > { %v1456_v38 = vsel %vm851_vm1, %v1453_v36, 0.0  ;;  %v1459_v39 = vmul.f32 %v1453_v36, %v1453_v36 }
 0x6b4   : > { %1457 = vadd.xlane.f32.xlu1 %v1456_v38 }
 0x6b5   : > { %v1460_v40 = vsel %vm851_vm1, %v1459_v39, 0.0  ;;  %v1997_v39 = vld [vmem:[%s736_s2] ss:$0 sm:$0xff] }
 0x6b6   : > { %1461 = vadd.xlane.f32.xlu0 %v1460_v40 }
 0x741   : > { %v1458_v44 = vpop.xlane.xlu1 %1457 }
 0x742   : > { %v1464_v45 = vmul.f32 0.015625, %v1458_v44 }
 0x743   : > { %v1462_v46 = vpop.xlane.xlu0 %1461 }
 0x744   : > { %v1466_v47 = vmul.f32 %v1464_v45, %v1464_v45  ;;  %v1465_v49 = vmul.f32 0.015625, %v1462_v46  ;;  %v1468_v52 = vsub.f32 %v1453_v36, %v1464_v45 }
 0x746   : > { %v1467_v50 = vsub.f32 %v1465_v49, %v1466_v47 }
 0x748   : > { %v1469_v51 = vadd.f32 1e-12, %v1467_v50 }
 0x74a   : > { %2228 = vrsqrt.f32 %v1469_v51 }
 0x754   : > { %v2229_v53 = vpop.eup %2228 }
 0x755   : > { %v1471_v48 = vmul.f32 %v2229_v53, %v1468_v52 }
 0x757   : > { %v1478_v56 = vmul.f32 %v1980_v54, %v1471_v48 }
 0x759   : > { %v1485_v57 = vadd.f32 %v1981_v55, %v1478_v56 }
 0x75b   : > { %v1486_v58 = vpack.c.bf16 %v1485_v57, %v1485_v57 }
 0x75d   : > { %2109 = vmatmul.mubr.msk.bf16.vlgmr.msra.gmra.mrb[24].mxu1 %vm851_vm1, %v1486_v58 }
 0x830   : > { %v1563_v4 = vpop.f32.mrb[24].mxu1 }
 0x831   : > { %v1564_v5 = vadd.f32 %v1982_v3, %v1563_v4  ;;  %v2110_v6 = vpop.f32.mrb[25].mxu1 }
 0x832   : > { %v1566_v7 = vpop.f32.mrb[26].mxu1 }
 0x833   : > { %v1569_v8 = vmul.f32 %v1564_v5, %v1564_v5  ;;  %v2111_v9 = vpop.f32.mrb[27].mxu1 }
 0x835   : > { %v1570_v10 = vmul.f32 %v1569_v8, %v1564_v5 }
 0x837   : > { %v1571_v11 = vmul.f32 0.044715, %v1570_v10 }
 0x839   : > { %v1572_v12 = vadd.f32 %v1571_v11, %v1564_v5 }
 0x83b   : > { %v1573_v13 = vmul.f32 0.7978846, %v1572_v12 }
 0x83d   : > { %2230 = vtanh.f32 %v1573_v13 }
 0x847   : > { %v2231_v14 = vpop.eup %2230 }
 0x848   : > { %v1575_v31 = vadd.f32 1.0, %v2231_v14 }
 0x84a   : > { %v1576_v15 = vmul.f32 0.5, %v1575_v31 }
 0x84c   : > { %v1577_v16 = vmul.f32 %v1576_v15, %v1564_v5 }
 0x84e   : > { %v1578_v17 = vpack.c.bf16 %v1577_v16, %v1577_v16 }
 0x850   : > { %2129 = vmatmul.mubr.bf16.vlgmr.msra.gmra.mrb[16].mxu0 %v1578_v17 }
 0x923   : > { %v1684_v19 = vpop.f32.mrb[16].mxu0 }
 0x924   : > { %v1685_v20 = vadd.f32 %v1988_v18, %v1684_v19  ;;  %v2130_v21 = vpop.f32.mrb[17].mxu0 }
 0x925   : > { %v1687_v22 = vpop.f32.mrb[18].mxu0 }
 0x926   : > { %v1690_v23 = vadd.f32 %v1685_v20, %v1485_v57  ;;  %v2131_v24 = vpop.f32.mrb[19].mxu0 }
 0x928   : > { %v1693_v25 = vsel %vm851_vm1, %v1690_v23, 0.0  ;;  %v1696_v26 = vmul.f32 %v1690_v23, %v1690_v23 }
 0x929   : > { %1694 = vadd.xlane.f32.xlu0 %v1693_v25 }
 0x92a   : > { %v1697_v28 = vsel %vm851_vm1, %v1696_v26, 0.0 }
 0x92b   : > { %1698 = vadd.xlane.f32.xlu1 %v1697_v28 }
 0x9b6   : > { %v1695_v29 = vpop.xlane.xlu0 %1694 }
 0x9b7   : > { %v1700_v30 = vmul.f32 0.015625, %v1695_v29 }
 0x9b8   : > { %v1699_v32 = vpop.xlane.xlu1 %1698 }
 0x9b9   : > { %v1702_v33 = vmul.f32 %v1700_v30, %v1700_v30  ;;  %v1701_v34 = vmul.f32 0.015625, %v1699_v32  ;;  %v1704_v37 = vsub.f32 %v1690_v23, %v1700_v30 }
 0x9bb   : > { %v1703_v35 = vsub.f32 %v1701_v34, %v1702_v33 }
 0x9bd   : > { %v1705_v36 = vadd.f32 1e-12, %v1703_v35 }
 0x9bf   : > { %2232 = vrsqrt.f32 %v1705_v36 }
 0x9c9   : > { %v2233_v38 = vpop.eup %2232 }
 0x9ca   : > { %v1707_v40 = vmul.f32 %v2233_v38, %v1704_v37 }
 0x9cc   : > { %v1714_v42 = vmul.f32 %v1997_v39, %v1707_v40 }
 0x9ce   : > { %v1721_v43 = vadd.f32 %v1998_v41, %v1714_v42 }
 0x9d0   : > { %1722 = vst.msk [vmem:[#allocation2] sm:$0xff] %vm851_vm1, %v1721_v43  ;;  %1723 = vst.msk [vmem:[%s2475_s18] sm:$0xff] %vm851_vm1, %v1721_v43 }
 0x9d1 PF: > { %s2731_s22 = sld [smem:[#allocation6_spill]]  ;;  %s2732_s21 = sld [smem:[#allocation4_spill]] }
 0x9d2   : > { %s2734_s23 = sld [smem:[#allocation7_spill]]  ;;  %s2735_s24 = sld [smem:[#allocation8_spill]] }
 0x9d7   : > { %s26_s25 = sadd.s32 1, %s2731_s22   ;;  %s2733_s22 = sld [smem:[#allocation5_spill]] }
 0x9d8   : > { %p23_p8 = scmp.ge.s32.totalorder %s26_s25, 6  }
 0x9da   :  { %25 = sbr.rel (!%p23_p8) target bundleno = 10 (0xa), region = 157 }

</bundles_post_ra>
